<compile_context>
chip_gen: v7x
topology: tpu7x:2x2x1
jax: 0.10.0
libtpu: 0.0.40
codegen_flags: <defaults>
</compile_context>

<pallas_src>
import functools
import math

import jax
import jax.numpy as jnp
from jax.experimental import pallas as pl
from jax.experimental.pallas import tpu as pltpu


# ----------------------------------------------------------------------------
# In-kernel helpers (pure functions on register values / refs)
# ----------------------------------------------------------------------------
def _add_ln_relu(x, y, gamma, beta, eps):
    """relu(LayerNorm(x + y)) with two-pass variance (matches reference)."""
    z = x + y
    mu = jnp.mean(z, axis=-1, keepdims=True)
    d = z - mu
    var = jnp.mean(d * d, axis=-1, keepdims=True)
    zn = d * jax.lax.rsqrt(var + eps)
    return jnp.maximum(zn * gamma + beta, 0.0)


def _mha_tile(xq, wq_ref, bq_ref, wo_ref, bo_ref, k_scr, v_scr,
              *, num_heads, head_dim):
    """Multi-head attention for one query tile against resident [S, D] K/V.

    Q projection and output projection are single dense D-wide matmuls (bf16
    operands, f32 accumulation).  Per-head score/PV matmuls use static 32-lane
    views of the projected activations; softmax math is exact f32.
    """
    scale = 1.0 / math.sqrt(head_dim)
    q = jnp.dot(xq.astype(jnp.bfloat16), wq_ref[...],
                preferred_element_type=jnp.float32) + bq_ref[...]    # [TQ, D] f32
    qb = q.astype(jnp.bfloat16)
    k = k_scr[...]                                                   # [S, D] bf16
    v = v_scr[...]                                                   # [S, D] bf16

    heads = []
    for h in range(num_heads):                 # static unroll (small H)
        lo = h * head_dim
        qh = qb[:, lo:lo + head_dim]           # [TQ, Dh]
        kh = k[:, lo:lo + head_dim]            # [S,  Dh]
        vh = v[:, lo:lo + head_dim]            # [S,  Dh]
        # scores: contract last dims (K consumed un-transposed)
        s = jax.lax.dot_general(qh, kh, (((1,), (1,)), ((), ())),
                                preferred_element_type=jnp.float32) * scale
        s = s - jnp.max(s, axis=-1, keepdims=True)
        p = jnp.exp(s)
        p = p / jnp.sum(p, axis=-1, keepdims=True)      # exact normalization
        heads.append(jnp.dot(p.astype(jnp.bfloat16), vh,
                             preferred_element_type=jnp.float32))    # [TQ, Dh]

    o = jnp.concatenate(heads, axis=-1)                              # [TQ, D] f32
    return jnp.dot(o.astype(jnp.bfloat16), wo_ref[...],
                   preferred_element_type=jnp.float32) + bo_ref[...]


# ----------------------------------------------------------------------------
# Fused decoder-layer kernel (grid = (batch, query_tiles))
# ----------------------------------------------------------------------------
def _decoder_layer_kernel(
    # activations
    x_ref, enc_ref,
    # self-attention weights / biases (dense, un-split)
    sa_wq, sa_wk, sa_wv, sa_wo, sa_bq, sa_bk, sa_bv, sa_bo,
    # cross-attention weights / biases
    ca_wq, ca_wk, ca_wv, ca_wo, ca_bq, ca_bk, ca_bv, ca_bo,
    # feed-forward
    ff_w1, ff_b1, ff_w2, ff_b2,
    # layer-norm affine params
    ln1_g, ln1_b, ln2_g, ln2_b, ln3_g, ln3_b,
    # output
    out_ref,
    # VMEM scratch: lane-dense K/V caches [S, D] bf16, resident across q tiles
    k_self, v_self, k_cross, v_cross,
    *, num_heads, head_dim, q_tile, eps):

    # Project K/V for self- and cross-attention once per batch element
    # (the query-tile axis is the inner "arbitrary" grid axis).
    @pl.when(pl.program_id(1) == 0)
    def _project_kv():
        xb = x_ref[0].astype(jnp.bfloat16)     # [S_tgt, D]
        eb = enc_ref[0].astype(jnp.bfloat16)   # [S_src, D]
        k_self[...] = (jnp.dot(xb, sa_wk[...], preferred_element_type=jnp.float32)
                       + sa_bk[...]).astype(jnp.bfloat16)
        v_self[...] = (jnp.dot(xb, sa_wv[...], preferred_element_type=jnp.float32)
                       + sa_bv[...]).astype(jnp.bfloat16)
        k_cross[...] = (jnp.dot(eb, ca_wk[...], preferred_element_type=jnp.float32)
                        + ca_bk[...]).astype(jnp.bfloat16)
        v_cross[...] = (jnp.dot(eb, ca_wv[...], preferred_element_type=jnp.float32)
                        + ca_bv[...]).astype(jnp.bfloat16)

    # Query tile = free static-stride view of the resident full-x block.
    q_start = pl.multiple_of(pl.program_id(1) * q_tile, q_tile)
    xq = x_ref[0, pl.ds(q_start, q_tile), :]                  # [TQ, D] f32

    # sublayer 1: self-attention -> +residual -> LN1 -> ReLU
    a = _mha_tile(xq, sa_wq, sa_bq, sa_wo, sa_bo, k_self, v_self,
                  num_heads=num_heads, head_dim=head_dim)
    h1 = _add_ln_relu(xq, a, ln1_g[...], ln1_b[...], eps)

    # sublayer 2: cross-attention over encoder output -> +residual -> LN2 -> ReLU
    a = _mha_tile(h1, ca_wq, ca_bq, ca_wo, ca_bo, k_cross, v_cross,
                  num_heads=num_heads, head_dim=head_dim)
    h2 = _add_ln_relu(h1, a, ln2_g[...], ln2_b[...], eps)

    # sublayer 3: position-wise FFN -> +residual -> LN3 -> ReLU
    f = jnp.dot(h2.astype(jnp.bfloat16), ff_w1[...],
                preferred_element_type=jnp.float32) + ff_b1[...]
    f = jnp.maximum(f, 0.0)
    f = jnp.dot(f.astype(jnp.bfloat16), ff_w2[...],
                preferred_element_type=jnp.float32) + ff_b2[...]
    out_ref[0] = _add_ln_relu(h2, f, ln3_g[...], ln3_b[...], eps)


# ----------------------------------------------------------------------------
# Wrapper
# ----------------------------------------------------------------------------
def decoder_layer(x, encoder_out, params, num_heads, *, q_tile=None, eps=1e-5):
    B, S_tgt, D = x.shape
    _, S_src, _ = encoder_out.shape
    head_dim = D // num_heads
    assert num_heads * head_dim == D

    if q_tile is None:
        q_tile = min(S_tgt, 256)     # fill MXU rows / amortize grid-step cost
    assert S_tgt % q_tile == 0, "S_tgt must be a multiple of q_tile"
    assert q_tile % 8 == 0 or q_tile == S_tgt, "q_tile must be sublane-aligned"
    num_q_tiles = S_tgt // q_tile

    sa, ca, ff = params["self_attn"], params["cross_attn"], params["ff"]
    d_ff = ff["w1"].shape[1]
    bf16 = jnp.bfloat16

    kernel = functools.partial(_decoder_layer_kernel, num_heads=num_heads,
                               head_dim=head_dim, q_tile=q_tile, eps=eps)

    def const(shape):
        # constant-index block: fetched once, reused across the whole grid
        return pl.BlockSpec(shape, lambda b, q: (0,) * len(shape))

    in_specs = [
        pl.BlockSpec((1, S_tgt, D), lambda b, q: (b, 0, 0)),   # x (full, per batch)
        pl.BlockSpec((1, S_src, D), lambda b, q: (b, 0, 0)),   # encoder_out (full)
        # self-attention: wq, wk, wv, wo (bf16 [D,D]) + bq, bk, bv, bo (f32 [1,D])
        const((D, D)), const((D, D)), const((D, D)), const((D, D)),
        const((1, D)), const((1, D)), const((1, D)), const((1, D)),
        # cross-attention
        const((D, D)), const((D, D)), const((D, D)), const((D, D)),
        const((1, D)), const((1, D)), const((1, D)), const((1, D)),
        # feed-forward
        const((D, d_ff)), const((1, d_ff)), const((d_ff, D)), const((1, D)),
        # layer norms (gamma, beta) x 3
        const((1, D)), const((1, D)), const((1, D)), const((1, D)),
        const((1, D)), const((1, D)),
    ]

    # Advisory cost estimate for XLA scheduling around the custom call.
    flops = B * (
        8 * S_tgt * D * D + 4 * S_tgt * S_tgt * D            # self-attention
        + 4 * S_tgt * D * D + 4 * S_src * D * D + 4 * S_tgt * S_src * D  # cross
        + 4 * S_tgt * D * d_ff)                               # FFN
    transcendentals = B * num_heads * (S_tgt * S_tgt + S_tgt * S_src)
    bytes_accessed = (4 * B * S_tgt * D * 2 + 4 * B * S_src * D       # x, out, enc
                      + 2 * (8 * D * D + 2 * D * d_ff)                # bf16 weights
                      + 4 * (14 * D + d_ff))                          # f32 biases/LN
    cost = pl.CostEstimate(flops=int(flops), transcendentals=int(transcendentals),
                           bytes_accessed=int(bytes_accessed))

    args = (
        x, encoder_out,
        sa["wq"].astype(bf16), sa["wk"].astype(bf16),
        sa["wv"].astype(bf16), sa["wo"].astype(bf16),
        sa["bq"], sa["bk"], sa["bv"], sa["bo"],
        ca["wq"].astype(bf16), ca["wk"].astype(bf16),
        ca["wv"].astype(bf16), ca["wo"].astype(bf16),
        ca["bq"], ca["bk"], ca["bv"], ca["bo"],
        ff["w1"].astype(bf16), ff["b1"], ff["w2"].astype(bf16), ff["b2"],
        params["ln1_g"], params["ln1_b"], params["ln2_g"], params["ln2_b"],
        params["ln3_g"], params["ln3_b"],
    )

    return pl.pallas_call(
        kernel,
        out_shape=jax.ShapeDtypeStruct((B, S_tgt, D), jnp.float32),
        grid_spec=pltpu.PrefetchScalarGridSpec(
            num_scalar_prefetch=0,
            grid=(B, num_q_tiles),
            in_specs=in_specs,
            out_specs=pl.BlockSpec((1, q_tile, D), lambda b, q: (b, q, 0)),
            scratch_shapes=[
                pltpu.VMEM((S_tgt, D), bf16),   # K self   (lane-dense [S, D])
                pltpu.VMEM((S_tgt, D), bf16),   # V self
                pltpu.VMEM((S_src, D), bf16),   # K cross
                pltpu.VMEM((S_src, D), bf16),   # V cross
            ]),
        compiler_params=pltpu.CompilerParams(
            dimension_semantics=("parallel", "arbitrary"),
            vmem_limit_bytes=64 * 1024 * 1024),
        cost_estimate=cost,
    )(*args)


# ----------------------------------------------------------------------------
# Pure-JAX reference (for correctness checking)
# ----------------------------------------------------------------------------
def reference_decoder_layer(x, encoder_out, params, num_heads, eps=1e-5):
    hp = jax.lax.Precision.HIGHEST

    def mha(xq, xkv, p):
        D = xq.shape[-1]
        dh = D // num_heads
        q = jnp.dot(xq, p["wq"], precision=hp) + p["bq"]
        k = jnp.dot(xkv, p["wk"], precision=hp) + p["bk"]
        v = jnp.dot(xkv, p["wv"], precision=hp) + p["bv"]

        def split(t):
            return t.reshape(t.shape[0], t.shape[1], num_heads, dh).transpose(0, 2, 1, 3)

        qh, kh, vh = split(q), split(k), split(v)
        s = jnp.einsum("bhqd,bhkd->bhqk", qh, kh, precision=hp) / math.sqrt(dh)
        w = jax.nn.softmax(s, axis=-1)
        o = jnp.einsum("bhqk,bhkd->bhqd", w, vh, precision=hp)
        o = o.transpose(0, 2, 1, 3).reshape(xq.shape)
        return jnp.dot(o, p["wo"], precision=hp) + p["bo"]

    def ln_relu(z, g, b):
        mu = z.mean(-1, keepdims=True)
        var = ((z - mu) ** 2).mean(-1, keepdims=True)
        return jnp.maximum((z - mu) / jnp.sqrt(var + eps) * g + b, 0.0)

    h = ln_relu(x + mha(x, x, params["self_attn"]), params["ln1_g"], params["ln1_b"])
    h = ln_relu(h + mha(h, encoder_out, params["cross_attn"]),
                params["ln2_g"], params["ln2_b"])
    ff = params["ff"]
    f = jnp.maximum(jnp.dot(h, ff["w1"], precision=hp) + ff["b1"], 0.0)
    f = jnp.dot(f, ff["w2"], precision=hp) + ff["b2"]
    return ln_relu(h + f, params["ln3_g"], params["ln3_b"])


# ----------------------------------------------------------------------------
# Deterministic parameter initialization
# ----------------------------------------------------------------------------
def init_params(key, d_model, d_ff):
    def lin(k, din, dout):
        kw, _ = jax.random.split(k)
        w = jax.random.normal(kw, (din, dout), jnp.float32) * 0.02
        b = jnp.zeros((1, dout), jnp.float32)
        return w, b

    keys = jax.random.split(key, 16)

    def attn_params(ks):
        wq, bq = lin(ks[0], d_model, d_model)
        wk, bk = lin(ks[1], d_model, d_model)
        wv, bv = lin(ks[2], d_model, d_model)
        wo, bo = lin(ks[3], d_model, d_model)
        return dict(wq=wq, wk=wk, wv=wv, wo=wo, bq=bq, bk=bk, bv=bv, bo=bo)

    w1, b1 = lin(keys[8], d_model, d_ff)
    w2, b2 = lin(keys[9], d_ff, d_model)
    ones = jnp.ones((1, d_model), jnp.float32)
    zeros = jnp.zeros((1, d_model), jnp.float32)
    return dict(
        self_attn=attn_params(keys[0:4]),
        cross_attn=attn_params(keys[4:8]),
        ff=dict(w1=w1, b1=b1, w2=w2, b2=b2),
        ln1_g=ones, ln1_b=zeros,
        ln2_g=ones, ln2_b=zeros,
        ln3_g=ones, ln3_b=zeros,
    )


if __name__ == "__main__":
    # Small but lane-dense demo shapes (last dims multiples of 128).
    B, S_TGT, S_SRC = 2, 16, 16
    D_MODEL, NUM_HEADS, D_FF = 128, 4, 256

    key = jax.random.PRNGKey(0)
    k_x, k_enc, k_p = jax.random.split(key, 3)
    x = jax.random.normal(k_x, (B, S_TGT, D_MODEL), jnp.float32)
    encoder_out = jax.random.normal(k_enc, (B, S_SRC, D_MODEL), jnp.float32)
    params = init_params(k_p, D_MODEL, D_FF)

    # q_tile=8 -> grid (2, 2): exercises the K/V-scratch reuse across q tiles.
    out = decoder_layer(x, encoder_out, params, NUM_HEADS, q_tile=8)
    out = jax.block_until_ready(out)

    assert out.shape == (B, S_TGT, D_MODEL)
    assert bool(jnp.all(jnp.isfinite(out)))

    ref = reference_decoder_layer(x, encoder_out, params, NUM_HEADS)
    max_err = float(jnp.max(jnp.abs(out - ref)))
    assert jnp.allclose(out, ref, atol=2e-2, rtol=2e-2), f"max_err={max_err}"

    print("KERNEL_OK")
</pallas_src>

<mosaic_0001>
module attributes {stable_mosaic.version = 11 : i64} {
  func.func @_decoder_layer_kernel(%arg0: i32, %arg1: i32, %arg2: memref<1x16x128xf32, #tpu.memory_space<vmem>>, %arg3: memref<1x16x128xf32, #tpu.memory_space<vmem>>, %arg4: memref<128x128xbf16, #tpu.memory_space<vmem>>, %arg5: memref<128x128xbf16, #tpu.memory_space<vmem>>, %arg6: memref<128x128xbf16, #tpu.memory_space<vmem>>, %arg7: memref<128x128xbf16, #tpu.memory_space<vmem>>, %arg8: memref<1x128xf32, #tpu.memory_space<vmem>>, %arg9: memref<1x128xf32, #tpu.memory_space<vmem>>, %arg10: memref<1x128xf32, #tpu.memory_space<vmem>>, %arg11: memref<1x128xf32, #tpu.memory_space<vmem>>, %arg12: memref<128x128xbf16, #tpu.memory_space<vmem>>, %arg13: memref<128x128xbf16, #tpu.memory_space<vmem>>, %arg14: memref<128x128xbf16, #tpu.memory_space<vmem>>, %arg15: memref<128x128xbf16, #tpu.memory_space<vmem>>, %arg16: memref<1x128xf32, #tpu.memory_space<vmem>>, %arg17: memref<1x128xf32, #tpu.memory_space<vmem>>, %arg18: memref<1x128xf32, #tpu.memory_space<vmem>>, %arg19: memref<1x128xf32, #tpu.memory_space<vmem>>, %arg20: memref<128x256xbf16, #tpu.memory_space<vmem>>, %arg21: memref<1x256xf32, #tpu.memory_space<vmem>>, %arg22: memref<256x128xbf16, #tpu.memory_space<vmem>>, %arg23: memref<1x128xf32, #tpu.memory_space<vmem>>, %arg24: memref<1x128xf32, #tpu.memory_space<vmem>>, %arg25: memref<1x128xf32, #tpu.memory_space<vmem>>, %arg26: memref<1x128xf32, #tpu.memory_space<vmem>>, %arg27: memref<1x128xf32, #tpu.memory_space<vmem>>, %arg28: memref<1x128xf32, #tpu.memory_space<vmem>>, %arg29: memref<1x128xf32, #tpu.memory_space<vmem>>, %arg30: memref<1x8x128xf32, #tpu.memory_space<vmem>>, %arg31: memref<16x128xbf16, #tpu.memory_space<vmem>>, %arg32: memref<16x128xbf16, #tpu.memory_space<vmem>>, %arg33: memref<16x128xbf16, #tpu.memory_space<vmem>>, %arg34: memref<16x128xbf16, #tpu.memory_space<vmem>>) attributes {dimension_semantics = [#tpu.dimension_semantics<parallel>, #tpu.dimension_semantics<arbitrary>], iteration_bounds = array<i64: 2, 2>, scalar_prefetch = 0 : i64, scratch_operands = 4 : i64, tpu.core_type = #tpu.core_type<tc>, window_params = [{transform_indices = @transform_0, window_bounds = array<i64: 1, 16, 128>}, {transform_indices = @transform_1, window_bounds = array<i64: 1, 16, 128>}, {pipeline_mode = #tpu.pipeline_mode<synchronous>, transform_indices = @transform_2, window_bounds = array<i64: 128, 128>}, {pipeline_mode = #tpu.pipeline_mode<synchronous>, transform_indices = @transform_3, window_bounds = array<i64: 128, 128>}, {pipeline_mode = #tpu.pipeline_mode<synchronous>, transform_indices = @transform_4, window_bounds = array<i64: 128, 128>}, {pipeline_mode = #tpu.pipeline_mode<synchronous>, transform_indices = @transform_5, window_bounds = array<i64: 128, 128>}, {pipeline_mode = #tpu.pipeline_mode<synchronous>, transform_indices = @transform_6, window_bounds = array<i64: 1, 128>}, {pipeline_mode = #tpu.pipeline_mode<synchronous>, transform_indices = @transform_7, window_bounds = array<i64: 1, 128>}, {pipeline_mode = #tpu.pipeline_mode<synchronous>, transform_indices = @transform_8, window_bounds = array<i64: 1, 128>}, {pipeline_mode = #tpu.pipeline_mode<synchronous>, transform_indices = @transform_9, window_bounds = array<i64: 1, 128>}, {pipeline_mode = #tpu.pipeline_mode<synchronous>, transform_indices = @transform_10, window_bounds = array<i64: 128, 128>}, {pipeline_mode = #tpu.pipeline_mode<synchronous>, transform_indices = @transform_11, window_bounds = array<i64: 128, 128>}, {pipeline_mode = #tpu.pipeline_mode<synchronous>, transform_indices = @transform_12, window_bounds = array<i64: 128, 128>}, {pipeline_mode = #tpu.pipeline_mode<synchronous>, transform_indices = @transform_13, window_bounds = array<i64: 128, 128>}, {pipeline_mode = #tpu.pipeline_mode<synchronous>, transform_indices = @transform_14, window_bounds = array<i64: 1, 128>}, {pipeline_mode = #tpu.pipeline_mode<synchronous>, transform_indices = @transform_15, window_bounds = array<i64: 1, 128>}, {pipeline_mode = #tpu.pipeline_mode<synchronous>, transform_indices = @transform_16, window_bounds = array<i64: 1, 128>}, {pipeline_mode = #tpu.pipeline_mode<synchronous>, transform_indices = @transform_17, window_bounds = array<i64: 1, 128>}, {pipeline_mode = #tpu.pipeline_mode<synchronous>, transform_indices = @transform_18, window_bounds = array<i64: 128, 256>}, {pipeline_mode = #tpu.pipeline_mode<synchronous>, transform_indices = @transform_19, window_bounds = array<i64: 1, 256>}, {pipeline_mode = #tpu.pipeline_mode<synchronous>, transform_indices = @transform_20, window_bounds = array<i64: 256, 128>}, {pipeline_mode = #tpu.pipeline_mode<synchronous>, transform_indices = @transform_21, window_bounds = array<i64: 1, 128>}, {pipeline_mode = #tpu.pipeline_mode<synchronous>, transform_indices = @transform_22, window_bounds = array<i64: 1, 128>}, {pipeline_mode = #tpu.pipeline_mode<synchronous>, transform_indices = @transform_23, window_bounds = array<i64: 1, 128>}, {pipeline_mode = #tpu.pipeline_mode<synchronous>, transform_indices = @transform_24, window_bounds = array<i64: 1, 128>}, {pipeline_mode = #tpu.pipeline_mode<synchronous>, transform_indices = @transform_25, window_bounds = array<i64: 1, 128>}, {pipeline_mode = #tpu.pipeline_mode<synchronous>, transform_indices = @transform_26, window_bounds = array<i64: 1, 128>}, {pipeline_mode = #tpu.pipeline_mode<synchronous>, transform_indices = @transform_27, window_bounds = array<i64: 1, 128>}, {transform_indices = @transform_28, window_bounds = array<i64: 1, 8, 128>}]} {
    %c0_i32 = arith.constant 0 : i32
    %0 = arith.cmpi eq, %arg1, %c0_i32 : i32
    %1 = arith.extui %0 : i1 to i32
    %c0_i32_0 = arith.constant 0 : i32
    %2 = arith.cmpi ne, %1, %c0_i32_0 : i32
    scf.if %2 {
      %c0_113 = arith.constant 0 : index
      %c0_114 = arith.constant 0 : index
      %c0_115 = arith.constant 0 : index
      %268 = vector.load %arg2[%c0_113, %c0_114, %c0_115] : memref<1x16x128xf32, #tpu.memory_space<vmem>>, vector<1x16x128xf32>
      %269 = vector.shape_cast %268 : vector<1x16x128xf32> to vector<16x128xf32>
      %270 = arith.truncf %269 : vector<16x128xf32> to vector<16x128xbf16>
      %c0_116 = arith.constant 0 : index
      %c0_117 = arith.constant 0 : index
      %c0_118 = arith.constant 0 : index
      %271 = vector.load %arg3[%c0_116, %c0_117, %c0_118] : memref<1x16x128xf32, #tpu.memory_space<vmem>>, vector<1x16x128xf32>
      %272 = vector.shape_cast %271 : vector<1x16x128xf32> to vector<16x128xf32>
      %273 = arith.truncf %272 : vector<16x128xf32> to vector<16x128xbf16>
      %c0_119 = arith.constant 0 : index
      %c0_120 = arith.constant 0 : index
      %274 = vector.load %arg5[%c0_119, %c0_120] : memref<128x128xbf16, #tpu.memory_space<vmem>>, vector<128x128xbf16>
      %cst_121 = arith.constant dense<0.000000e+00> : vector<16x128xf32>
      %275 = tpu.matmul %270, %274, %cst_121 {dimension_numbers = #tpu.dot_dimension_numbers<[1], [0], [0], [1], [0, 0, 1, 1], [], []>} : vector<16x128xbf16>, vector<128x128xbf16>, vector<16x128xf32> -> vector<16x128xf32>
      %c0_122 = arith.constant 0 : index
      %c0_123 = arith.constant 0 : index
      %276 = vector.load %arg9[%c0_122, %c0_123] : memref<1x128xf32, #tpu.memory_space<vmem>>, vector<1x128xf32>
      %277 = vector.broadcast %276 : vector<1x128xf32> to vector<16x128xf32>
      %278 = arith.addf %275, %277 : vector<16x128xf32>
      %279 = arith.truncf %278 : vector<16x128xf32> to vector<16x128xbf16>
      %c0_124 = arith.constant 0 : index
      %c0_125 = arith.constant 0 : index
      %280 = vector.load %arg31[%c0_124, %c0_125] : memref<16x128xbf16, #tpu.memory_space<vmem>>, vector<16x128xbf16>
      tpu.vector_store %arg31[%c0_124, %c0_125], %279 {strides = array<i32>} : memref<16x128xbf16, #tpu.memory_space<vmem>>, vector<16x128xbf16>,
      %c0_126 = arith.constant 0 : index
      %c0_127 = arith.constant 0 : index
      %281 = vector.load %arg6[%c0_126, %c0_127] : memref<128x128xbf16, #tpu.memory_space<vmem>>, vector<128x128xbf16>
      %cst_128 = arith.constant dense<0.000000e+00> : vector<16x128xf32>
      %282 = tpu.matmul %270, %281, %cst_128 {dimension_numbers = #tpu.dot_dimension_numbers<[1], [0], [0], [1], [0, 0, 1, 1], [], []>} : vector<16x128xbf16>, vector<128x128xbf16>, vector<16x128xf32> -> vector<16x128xf32>
      %c0_129 = arith.constant 0 : index
      %c0_130 = arith.constant 0 : index
      %283 = vector.load %arg10[%c0_129, %c0_130] : memref<1x128xf32, #tpu.memory_space<vmem>>, vector<1x128xf32>
      %284 = vector.broadcast %283 : vector<1x128xf32> to vector<16x128xf32>
      %285 = arith.addf %282, %284 : vector<16x128xf32>
      %286 = arith.truncf %285 : vector<16x128xf32> to vector<16x128xbf16>
      %c0_131 = arith.constant 0 : index
      %c0_132 = arith.constant 0 : index
      %287 = vector.load %arg32[%c0_131, %c0_132] : memref<16x128xbf16, #tpu.memory_space<vmem>>, vector<16x128xbf16>
      tpu.vector_store %arg32[%c0_131, %c0_132], %286 {strides = array<i32>} : memref<16x128xbf16, #tpu.memory_space<vmem>>, vector<16x128xbf16>,
      %c0_133 = arith.constant 0 : index
      %c0_134 = arith.constant 0 : index
      %288 = vector.load %arg13[%c0_133, %c0_134] : memref<128x128xbf16, #tpu.memory_space<vmem>>, vector<128x128xbf16>
      %cst_135 = arith.constant dense<0.000000e+00> : vector<16x128xf32>
      %289 = tpu.matmul %273, %288, %cst_135 {dimension_numbers = #tpu.dot_dimension_numbers<[1], [0], [0], [1], [0, 0, 1, 1], [], []>} : vector<16x128xbf16>, vector<128x128xbf16>, vector<16x128xf32> -> vector<16x128xf32>
      %c0_136 = arith.constant 0 : index
      %c0_137 = arith.constant 0 : index
      %290 = vector.load %arg17[%c0_136, %c0_137] : memref<1x128xf32, #tpu.memory_space<vmem>>, vector<1x128xf32>
      %291 = vector.broadcast %290 : vector<1x128xf32> to vector<16x128xf32>
      %292 = arith.addf %289, %291 : vector<16x128xf32>
      %293 = arith.truncf %292 : vector<16x128xf32> to vector<16x128xbf16>
      %c0_138 = arith.constant 0 : index
      %c0_139 = arith.constant 0 : index
      %294 = vector.load %arg33[%c0_138, %c0_139] : memref<16x128xbf16, #tpu.memory_space<vmem>>, vector<16x128xbf16>
      tpu.vector_store %arg33[%c0_138, %c0_139], %293 {strides = array<i32>} : memref<16x128xbf16, #tpu.memory_space<vmem>>, vector<16x128xbf16>,
      %c0_140 = arith.constant 0 : index
      %c0_141 = arith.constant 0 : index
      %295 = vector.load %arg14[%c0_140, %c0_141] : memref<128x128xbf16, #tpu.memory_space<vmem>>, vector<128x128xbf16>
      %cst_142 = arith.constant dense<0.000000e+00> : vector<16x128xf32>
      %296 = tpu.matmul %273, %295, %cst_142 {dimension_numbers = #tpu.dot_dimension_numbers<[1], [0], [0], [1], [0, 0, 1, 1], [], []>} : vector<16x128xbf16>, vector<128x128xbf16>, vector<16x128xf32> -> vector<16x128xf32>
      %c0_143 = arith.constant 0 : index
      %c0_144 = arith.constant 0 : index
      %297 = vector.load %arg18[%c0_143, %c0_144] : memref<1x128xf32, #tpu.memory_space<vmem>>, vector<1x128xf32>
      %298 = vector.broadcast %297 : vector<1x128xf32> to vector<16x128xf32>
      %299 = arith.addf %296, %298 : vector<16x128xf32>
      %300 = arith.truncf %299 : vector<16x128xf32> to vector<16x128xbf16>
      %c0_145 = arith.constant 0 : index
      %c0_146 = arith.constant 0 : index
      %301 = vector.load %arg34[%c0_145, %c0_146] : memref<16x128xbf16, #tpu.memory_space<vmem>>, vector<16x128xbf16>
      tpu.vector_store %arg34[%c0_145, %c0_146], %300 {strides = array<i32>} : memref<16x128xbf16, #tpu.memory_space<vmem>>, vector<16x128xbf16>,
    } else {
    }
    %c8_i32 = arith.constant 8 : i32
    %3 = arith.muli %arg1, %c8_i32 : i32
    %4 = tpu.assume_multiple %3, 8 : i32
    %c0 = arith.constant 0 : index
    %5 = arith.index_cast %4 : i32 to index
    %c0_1 = arith.constant 0 : index
    %6 = vector.load %arg2[%c0, %5, %c0_1] : memref<1x16x128xf32, #tpu.memory_space<vmem>>, vector<1x8x128xf32>
    %7 = vector.shape_cast %6 : vector<1x8x128xf32> to vector<8x128xf32>
    %8 = arith.truncf %7 : vector<8x128xf32> to vector<8x128xbf16>
    %c0_2 = arith.constant 0 : index
    %c0_3 = arith.constant 0 : index
    %9 = vector.load %arg4[%c0_2, %c0_3] : memref<128x128xbf16, #tpu.memory_space<vmem>>, vector<128x128xbf16>
    %cst = arith.constant dense<0.000000e+00> : vector<8x128xf32>
    %10 = tpu.matmul %8, %9, %cst {dimension_numbers = #tpu.dot_dimension_numbers<[1], [0], [0], [1], [0, 0, 1, 1], [], []>} : vector<8x128xbf16>, vector<128x128xbf16>, vector<8x128xf32> -> vector<8x128xf32>
    %c0_4 = arith.constant 0 : index
    %c0_5 = arith.constant 0 : index
    %11 = vector.load %arg8[%c0_4, %c0_5] : memref<1x128xf32, #tpu.memory_space<vmem>>, vector<1x128xf32>
    %12 = vector.broadcast %11 : vector<1x128xf32> to vector<8x128xf32>
    %13 = arith.addf %10, %12 : vector<8x128xf32>
    %14 = arith.truncf %13 : vector<8x128xf32> to vector<8x128xbf16>
    %c0_6 = arith.constant 0 : index
    %c0_7 = arith.constant 0 : index
    %15 = vector.load %arg31[%c0_6, %c0_7] : memref<16x128xbf16, #tpu.memory_space<vmem>>, vector<16x128xbf16>
    %c0_8 = arith.constant 0 : index
    %c0_9 = arith.constant 0 : index
    %16 = vector.load %arg32[%c0_8, %c0_9] : memref<16x128xbf16, #tpu.memory_space<vmem>>, vector<16x128xbf16>
    %17 = vector.extract_strided_slice %14 {offsets = [0, 0], sizes = [8, 32], strides = [1, 1]} : vector<8x128xbf16> to vector<8x32xbf16>
    %18 = vector.extract_strided_slice %15 {offsets = [0, 0], sizes = [16, 32], strides = [1, 1]} : vector<16x128xbf16> to vector<16x32xbf16>
    %19 = vector.extract_strided_slice %16 {offsets = [0, 0], sizes = [16, 32], strides = [1, 1]} : vector<16x128xbf16> to vector<16x32xbf16>
    %cst_10 = arith.constant dense<0.000000e+00> : vector<8x16xf32>
    %20 = tpu.matmul %17, %18, %cst_10 {dimension_numbers = #tpu.dot_dimension_numbers<[1], [1], [0], [0], [0, 0, 1, 0], [], []>} : vector<8x32xbf16>, vector<16x32xbf16>, vector<8x16xf32> -> vector<8x16xf32>
    %cst_11 = arith.constant 0.176776692 : f32
    %21 = vector.broadcast %cst_11 : f32 to vector<8x16xf32>
    %22 = arith.mulf %20, %21 : vector<8x16xf32>
    %cst_12 = arith.constant dense<0xFF800000> : vector<8xf32>
    %23 = vector.multi_reduction <maximumf>, %22, %cst_12 [1] : vector<8x16xf32> to vector<8xf32>
    %24 = vector.shape_cast %23 : vector<8xf32> to vector<8x1xf32>
    %25 = vector.broadcast %24 : vector<8x1xf32> to vector<8x16xf32>
    %26 = arith.subf %22, %25 : vector<8x16xf32>
    %27 = math.exp %26 : vector<8x16xf32>
    %cst_13 = arith.constant dense<0.000000e+00> : vector<8xf32>
    %28 = vector.multi_reduction <add>, %27, %cst_13 [1] : vector<8x16xf32> to vector<8xf32>
    %29 = vector.shape_cast %28 : vector<8xf32> to vector<8x1xf32>
    %30 = vector.broadcast %29 : vector<8x1xf32> to vector<8x16xf32>
    %31 = arith.divf %27, %30 : vector<8x16xf32>
    %32 = arith.truncf %31 : vector<8x16xf32> to vector<8x16xbf16>
    %cst_14 = arith.constant dense<0.000000e+00> : vector<8x32xf32>
    %33 = tpu.matmul %32, %19, %cst_14 {dimension_numbers = #tpu.dot_dimension_numbers<[1], [0], [0], [1], [0, 0, 1, 1], [], []>} : vector<8x16xbf16>, vector<16x32xbf16>, vector<8x32xf32> -> vector<8x32xf32>
    %34 = vector.extract_strided_slice %14 {offsets = [0, 32], sizes = [8, 32], strides = [1, 1]} : vector<8x128xbf16> to vector<8x32xbf16>
    %35 = vector.extract_strided_slice %15 {offsets = [0, 32], sizes = [16, 32], strides = [1, 1]} : vector<16x128xbf16> to vector<16x32xbf16>
    %36 = vector.extract_strided_slice %16 {offsets = [0, 32], sizes = [16, 32], strides = [1, 1]} : vector<16x128xbf16> to vector<16x32xbf16>
    %cst_15 = arith.constant dense<0.000000e+00> : vector<8x16xf32>
    %37 = tpu.matmul %34, %35, %cst_15 {dimension_numbers = #tpu.dot_dimension_numbers<[1], [1], [0], [0], [0, 0, 1, 0], [], []>} : vector<8x32xbf16>, vector<16x32xbf16>, vector<8x16xf32> -> vector<8x16xf32>
    %cst_16 = arith.constant 0.176776692 : f32
    %38 = vector.broadcast %cst_16 : f32 to vector<8x16xf32>
    %39 = arith.mulf %37, %38 : vector<8x16xf32>
    %cst_17 = arith.constant dense<0xFF800000> : vector<8xf32>
    %40 = vector.multi_reduction <maximumf>, %39, %cst_17 [1] : vector<8x16xf32> to vector<8xf32>
    %41 = vector.shape_cast %40 : vector<8xf32> to vector<8x1xf32>
    %42 = vector.broadcast %41 : vector<8x1xf32> to vector<8x16xf32>
    %43 = arith.subf %39, %42 : vector<8x16xf32>
    %44 = math.exp %43 : vector<8x16xf32>
    %cst_18 = arith.constant dense<0.000000e+00> : vector<8xf32>
    %45 = vector.multi_reduction <add>, %44, %cst_18 [1] : vector<8x16xf32> to vector<8xf32>
    %46 = vector.shape_cast %45 : vector<8xf32> to vector<8x1xf32>
    %47 = vector.broadcast %46 : vector<8x1xf32> to vector<8x16xf32>
    %48 = arith.divf %44, %47 : vector<8x16xf32>
    %49 = arith.truncf %48 : vector<8x16xf32> to vector<8x16xbf16>
    %cst_19 = arith.constant dense<0.000000e+00> : vector<8x32xf32>
    %50 = tpu.matmul %49, %36, %cst_19 {dimension_numbers = #tpu.dot_dimension_numbers<[1], [0], [0], [1], [0, 0, 1, 1], [], []>} : vector<8x16xbf16>, vector<16x32xbf16>, vector<8x32xf32> -> vector<8x32xf32>
    %51 = vector.extract_strided_slice %14 {offsets = [0, 64], sizes = [8, 32], strides = [1, 1]} : vector<8x128xbf16> to vector<8x32xbf16>
    %52 = vector.extract_strided_slice %15 {offsets = [0, 64], sizes = [16, 32], strides = [1, 1]} : vector<16x128xbf16> to vector<16x32xbf16>
    %53 = vector.extract_strided_slice %16 {offsets = [0, 64], sizes = [16, 32], strides = [1, 1]} : vector<16x128xbf16> to vector<16x32xbf16>
    %cst_20 = arith.constant dense<0.000000e+00> : vector<8x16xf32>
    %54 = tpu.matmul %51, %52, %cst_20 {dimension_numbers = #tpu.dot_dimension_numbers<[1], [1], [0], [0], [0, 0, 1, 0], [], []>} : vector<8x32xbf16>, vector<16x32xbf16>, vector<8x16xf32> -> vector<8x16xf32>
    %cst_21 = arith.constant 0.176776692 : f32
    %55 = vector.broadcast %cst_21 : f32 to vector<8x16xf32>
    %56 = arith.mulf %54, %55 : vector<8x16xf32>
    %cst_22 = arith.constant dense<0xFF800000> : vector<8xf32>
    %57 = vector.multi_reduction <maximumf>, %56, %cst_22 [1] : vector<8x16xf32> to vector<8xf32>
    %58 = vector.shape_cast %57 : vector<8xf32> to vector<8x1xf32>
    %59 = vector.broadcast %58 : vector<8x1xf32> to vector<8x16xf32>
    %60 = arith.subf %56, %59 : vector<8x16xf32>
    %61 = math.exp %60 : vector<8x16xf32>
    %cst_23 = arith.constant dense<0.000000e+00> : vector<8xf32>
    %62 = vector.multi_reduction <add>, %61, %cst_23 [1] : vector<8x16xf32> to vector<8xf32>
    %63 = vector.shape_cast %62 : vector<8xf32> to vector<8x1xf32>
    %64 = vector.broadcast %63 : vector<8x1xf32> to vector<8x16xf32>
    %65 = arith.divf %61, %64 : vector<8x16xf32>
    %66 = arith.truncf %65 : vector<8x16xf32> to vector<8x16xbf16>
    %cst_24 = arith.constant dense<0.000000e+00> : vector<8x32xf32>
    %67 = tpu.matmul %66, %53, %cst_24 {dimension_numbers = #tpu.dot_dimension_numbers<[1], [0], [0], [1], [0, 0, 1, 1], [], []>} : vector<8x16xbf16>, vector<16x32xbf16>, vector<8x32xf32> -> vector<8x32xf32>
    %68 = vector.extract_strided_slice %14 {offsets = [0, 96], sizes = [8, 32], strides = [1, 1]} : vector<8x128xbf16> to vector<8x32xbf16>
    %69 = vector.extract_strided_slice %15 {offsets = [0, 96], sizes = [16, 32], strides = [1, 1]} : vector<16x128xbf16> to vector<16x32xbf16>
    %70 = vector.extract_strided_slice %16 {offsets = [0, 96], sizes = [16, 32], strides = [1, 1]} : vector<16x128xbf16> to vector<16x32xbf16>
    %cst_25 = arith.constant dense<0.000000e+00> : vector<8x16xf32>
    %71 = tpu.matmul %68, %69, %cst_25 {dimension_numbers = #tpu.dot_dimension_numbers<[1], [1], [0], [0], [0, 0, 1, 0], [], []>} : vector<8x32xbf16>, vector<16x32xbf16>, vector<8x16xf32> -> vector<8x16xf32>
    %cst_26 = arith.constant 0.176776692 : f32
    %72 = vector.broadcast %cst_26 : f32 to vector<8x16xf32>
    %73 = arith.mulf %71, %72 : vector<8x16xf32>
    %cst_27 = arith.constant dense<0xFF800000> : vector<8xf32>
    %74 = vector.multi_reduction <maximumf>, %73, %cst_27 [1] : vector<8x16xf32> to vector<8xf32>
    %75 = vector.shape_cast %74 : vector<8xf32> to vector<8x1xf32>
    %76 = vector.broadcast %75 : vector<8x1xf32> to vector<8x16xf32>
    %77 = arith.subf %73, %76 : vector<8x16xf32>
    %78 = math.exp %77 : vector<8x16xf32>
    %cst_28 = arith.constant dense<0.000000e+00> : vector<8xf32>
    %79 = vector.multi_reduction <add>, %78, %cst_28 [1] : vector<8x16xf32> to vector<8xf32>
    %80 = vector.shape_cast %79 : vector<8xf32> to vector<8x1xf32>
    %81 = vector.broadcast %80 : vector<8x1xf32> to vector<8x16xf32>
    %82 = arith.divf %78, %81 : vector<8x16xf32>
    %83 = arith.truncf %82 : vector<8x16xf32> to vector<8x16xbf16>
    %cst_29 = arith.constant dense<0.000000e+00> : vector<8x32xf32>
    %84 = tpu.matmul %83, %70, %cst_29 {dimension_numbers = #tpu.dot_dimension_numbers<[1], [0], [0], [1], [0, 0, 1, 1], [], []>} : vector<8x16xbf16>, vector<16x32xbf16>, vector<8x32xf32> -> vector<8x32xf32>
    %85 = tpu.concatenate %33, %50, %67, %84 in 1 : vector<8x32xf32>, vector<8x32xf32>, vector<8x32xf32>, vector<8x32xf32> -> vector<8x128xf32>
    %86 = arith.truncf %85 : vector<8x128xf32> to vector<8x128xbf16>
    %c0_30 = arith.constant 0 : index
    %c0_31 = arith.constant 0 : index
    %87 = vector.load %arg7[%c0_30, %c0_31] : memref<128x128xbf16, #tpu.memory_space<vmem>>, vector<128x128xbf16>
    %cst_32 = arith.constant dense<0.000000e+00> : vector<8x128xf32>
    %88 = tpu.matmul %86, %87, %cst_32 {dimension_numbers = #tpu.dot_dimension_numbers<[1], [0], [0], [1], [0, 0, 1, 1], [], []>} : vector<8x128xbf16>, vector<128x128xbf16>, vector<8x128xf32> -> vector<8x128xf32>
    %c0_33 = arith.constant 0 : index
    %c0_34 = arith.constant 0 : index
    %89 = vector.load %arg11[%c0_33, %c0_34] : memref<1x128xf32, #tpu.memory_space<vmem>>, vector<1x128xf32>
    %90 = vector.broadcast %89 : vector<1x128xf32> to vector<8x128xf32>
    %91 = arith.addf %88, %90 : vector<8x128xf32>
    %c0_35 = arith.constant 0 : index
    %c0_36 = arith.constant 0 : index
    %92 = vector.load %arg24[%c0_35, %c0_36] : memref<1x128xf32, #tpu.memory_space<vmem>>, vector<1x128xf32>
    %c0_37 = arith.constant 0 : index
    %c0_38 = arith.constant 0 : index
    %93 = vector.load %arg25[%c0_37, %c0_38] : memref<1x128xf32, #tpu.memory_space<vmem>>, vector<1x128xf32>
    %94 = arith.addf %7, %91 : vector<8x128xf32>
    %cst_39 = arith.constant dense<0.000000e+00> : vector<8xf32>
    %95 = vector.multi_reduction <add>, %94, %cst_39 [1] : vector<8x128xf32> to vector<8xf32>
    %96 = vector.shape_cast %95 : vector<8xf32> to vector<8x1xf32>
    %cst_40 = arith.constant 1.280000e+02 : f32
    %97 = vector.broadcast %cst_40 : f32 to vector<8x1xf32>
    %98 = arith.divf %96, %97 : vector<8x1xf32>
    %99 = vector.broadcast %98 : vector<8x1xf32> to vector<8x128xf32>
    %100 = arith.subf %94, %99 : vector<8x128xf32>
    %101 = arith.mulf %100, %100 : vector<8x128xf32>
    %cst_41 = arith.constant dense<0.000000e+00> : vector<8xf32>
    %102 = vector.multi_reduction <add>, %101, %cst_41 [1] : vector<8x128xf32> to vector<8xf32>
    %103 = vector.shape_cast %102 : vector<8xf32> to vector<8x1xf32>
    %cst_42 = arith.constant 1.280000e+02 : f32
    %104 = vector.broadcast %cst_42 : f32 to vector<8x1xf32>
    %105 = arith.divf %103, %104 : vector<8x1xf32>
    %cst_43 = arith.constant 9.99999974E-6 : f32
    %106 = vector.broadcast %cst_43 : f32 to vector<8x1xf32>
    %107 = arith.addf %105, %106 : vector<8x1xf32>
    %108 = math.rsqrt %107 : vector<8x1xf32>
    %109 = vector.broadcast %108 : vector<8x1xf32> to vector<8x128xf32>
    %110 = arith.mulf %100, %109 : vector<8x128xf32>
    %111 = vector.broadcast %92 : vector<1x128xf32> to vector<8x128xf32>
    %112 = arith.mulf %110, %111 : vector<8x128xf32>
    %113 = vector.broadcast %93 : vector<1x128xf32> to vector<8x128xf32>
    %114 = arith.addf %112, %113 : vector<8x128xf32>
    %cst_44 = arith.constant 0.000000e+00 : f32
    %115 = vector.broadcast %cst_44 : f32 to vector<8x128xf32>
    %116 = arith.maximumf %114, %115 : vector<8x128xf32>
    %117 = arith.truncf %116 : vector<8x128xf32> to vector<8x128xbf16>
    %c0_45 = arith.constant 0 : index
    %c0_46 = arith.constant 0 : index
    %118 = vector.load %arg12[%c0_45, %c0_46] : memref<128x128xbf16, #tpu.memory_space<vmem>>, vector<128x128xbf16>
    %cst_47 = arith.constant dense<0.000000e+00> : vector<8x128xf32>
    %119 = tpu.matmul %117, %118, %cst_47 {dimension_numbers = #tpu.dot_dimension_numbers<[1], [0], [0], [1], [0, 0, 1, 1], [], []>} : vector<8x128xbf16>, vector<128x128xbf16>, vector<8x128xf32> -> vector<8x128xf32>
    %c0_48 = arith.constant 0 : index
    %c0_49 = arith.constant 0 : index
    %120 = vector.load %arg16[%c0_48, %c0_49] : memref<1x128xf32, #tpu.memory_space<vmem>>, vector<1x128xf32>
    %121 = vector.broadcast %120 : vector<1x128xf32> to vector<8x128xf32>
    %122 = arith.addf %119, %121 : vector<8x128xf32>
    %123 = arith.truncf %122 : vector<8x128xf32> to vector<8x128xbf16>
    %c0_50 = arith.constant 0 : index
    %c0_51 = arith.constant 0 : index
    %124 = vector.load %arg33[%c0_50, %c0_51] : memref<16x128xbf16, #tpu.memory_space<vmem>>, vector<16x128xbf16>
    %c0_52 = arith.constant 0 : index
    %c0_53 = arith.constant 0 : index
    %125 = vector.load %arg34[%c0_52, %c0_53] : memref<16x128xbf16, #tpu.memory_space<vmem>>, vector<16x128xbf16>
    %126 = vector.extract_strided_slice %123 {offsets = [0, 0], sizes = [8, 32], strides = [1, 1]} : vector<8x128xbf16> to vector<8x32xbf16>
    %127 = vector.extract_strided_slice %124 {offsets = [0, 0], sizes = [16, 32], strides = [1, 1]} : vector<16x128xbf16> to vector<16x32xbf16>
    %128 = vector.extract_strided_slice %125 {offsets = [0, 0], sizes = [16, 32], strides = [1, 1]} : vector<16x128xbf16> to vector<16x32xbf16>
    %cst_54 = arith.constant dense<0.000000e+00> : vector<8x16xf32>
    %129 = tpu.matmul %126, %127, %cst_54 {dimension_numbers = #tpu.dot_dimension_numbers<[1], [1], [0], [0], [0, 0, 1, 0], [], []>} : vector<8x32xbf16>, vector<16x32xbf16>, vector<8x16xf32> -> vector<8x16xf32>
    %cst_55 = arith.constant 0.176776692 : f32
    %130 = vector.broadcast %cst_55 : f32 to vector<8x16xf32>
    %131 = arith.mulf %129, %130 : vector<8x16xf32>
    %cst_56 = arith.constant dense<0xFF800000> : vector<8xf32>
    %132 = vector.multi_reduction <maximumf>, %131, %cst_56 [1] : vector<8x16xf32> to vector<8xf32>
    %133 = vector.shape_cast %132 : vector<8xf32> to vector<8x1xf32>
    %134 = vector.broadcast %133 : vector<8x1xf32> to vector<8x16xf32>
    %135 = arith.subf %131, %134 : vector<8x16xf32>
    %136 = math.exp %135 : vector<8x16xf32>
    %cst_57 = arith.constant dense<0.000000e+00> : vector<8xf32>
    %137 = vector.multi_reduction <add>, %136, %cst_57 [1] : vector<8x16xf32> to vector<8xf32>
    %138 = vector.shape_cast %137 : vector<8xf32> to vector<8x1xf32>
    %139 = vector.broadcast %138 : vector<8x1xf32> to vector<8x16xf32>
    %140 = arith.divf %136, %139 : vector<8x16xf32>
    %141 = arith.truncf %140 : vector<8x16xf32> to vector<8x16xbf16>
    %cst_58 = arith.constant dense<0.000000e+00> : vector<8x32xf32>
    %142 = tpu.matmul %141, %128, %cst_58 {dimension_numbers = #tpu.dot_dimension_numbers<[1], [0], [0], [1], [0, 0, 1, 1], [], []>} : vector<8x16xbf16>, vector<16x32xbf16>, vector<8x32xf32> -> vector<8x32xf32>
    %143 = vector.extract_strided_slice %123 {offsets = [0, 32], sizes = [8, 32], strides = [1, 1]} : vector<8x128xbf16> to vector<8x32xbf16>
    %144 = vector.extract_strided_slice %124 {offsets = [0, 32], sizes = [16, 32], strides = [1, 1]} : vector<16x128xbf16> to vector<16x32xbf16>
    %145 = vector.extract_strided_slice %125 {offsets = [0, 32], sizes = [16, 32], strides = [1, 1]} : vector<16x128xbf16> to vector<16x32xbf16>
    %cst_59 = arith.constant dense<0.000000e+00> : vector<8x16xf32>
    %146 = tpu.matmul %143, %144, %cst_59 {dimension_numbers = #tpu.dot_dimension_numbers<[1], [1], [0], [0], [0, 0, 1, 0], [], []>} : vector<8x32xbf16>, vector<16x32xbf16>, vector<8x16xf32> -> vector<8x16xf32>
    %cst_60 = arith.constant 0.176776692 : f32
    %147 = vector.broadcast %cst_60 : f32 to vector<8x16xf32>
    %148 = arith.mulf %146, %147 : vector<8x16xf32>
    %cst_61 = arith.constant dense<0xFF800000> : vector<8xf32>
    %149 = vector.multi_reduction <maximumf>, %148, %cst_61 [1] : vector<8x16xf32> to vector<8xf32>
    %150 = vector.shape_cast %149 : vector<8xf32> to vector<8x1xf32>
    %151 = vector.broadcast %150 : vector<8x1xf32> to vector<8x16xf32>
    %152 = arith.subf %148, %151 : vector<8x16xf32>
    %153 = math.exp %152 : vector<8x16xf32>
    %cst_62 = arith.constant dense<0.000000e+00> : vector<8xf32>
    %154 = vector.multi_reduction <add>, %153, %cst_62 [1] : vector<8x16xf32> to vector<8xf32>
    %155 = vector.shape_cast %154 : vector<8xf32> to vector<8x1xf32>
    %156 = vector.broadcast %155 : vector<8x1xf32> to vector<8x16xf32>
    %157 = arith.divf %153, %156 : vector<8x16xf32>
    %158 = arith.truncf %157 : vector<8x16xf32> to vector<8x16xbf16>
    %cst_63 = arith.constant dense<0.000000e+00> : vector<8x32xf32>
    %159 = tpu.matmul %158, %145, %cst_63 {dimension_numbers = #tpu.dot_dimension_numbers<[1], [0], [0], [1], [0, 0, 1, 1], [], []>} : vector<8x16xbf16>, vector<16x32xbf16>, vector<8x32xf32> -> vector<8x32xf32>
    %160 = vector.extract_strided_slice %123 {offsets = [0, 64], sizes = [8, 32], strides = [1, 1]} : vector<8x128xbf16> to vector<8x32xbf16>
    %161 = vector.extract_strided_slice %124 {offsets = [0, 64], sizes = [16, 32], strides = [1, 1]} : vector<16x128xbf16> to vector<16x32xbf16>
    %162 = vector.extract_strided_slice %125 {offsets = [0, 64], sizes = [16, 32], strides = [1, 1]} : vector<16x128xbf16> to vector<16x32xbf16>
    %cst_64 = arith.constant dense<0.000000e+00> : vector<8x16xf32>
    %163 = tpu.matmul %160, %161, %cst_64 {dimension_numbers = #tpu.dot_dimension_numbers<[1], [1], [0], [0], [0, 0, 1, 0], [], []>} : vector<8x32xbf16>, vector<16x32xbf16>, vector<8x16xf32> -> vector<8x16xf32>
    %cst_65 = arith.constant 0.176776692 : f32
    %164 = vector.broadcast %cst_65 : f32 to vector<8x16xf32>
    %165 = arith.mulf %163, %164 : vector<8x16xf32>
    %cst_66 = arith.constant dense<0xFF800000> : vector<8xf32>
    %166 = vector.multi_reduction <maximumf>, %165, %cst_66 [1] : vector<8x16xf32> to vector<8xf32>
    %167 = vector.shape_cast %166 : vector<8xf32> to vector<8x1xf32>
    %168 = vector.broadcast %167 : vector<8x1xf32> to vector<8x16xf32>
    %169 = arith.subf %165, %168 : vector<8x16xf32>
    %170 = math.exp %169 : vector<8x16xf32>
    %cst_67 = arith.constant dense<0.000000e+00> : vector<8xf32>
    %171 = vector.multi_reduction <add>, %170, %cst_67 [1] : vector<8x16xf32> to vector<8xf32>
    %172 = vector.shape_cast %171 : vector<8xf32> to vector<8x1xf32>
    %173 = vector.broadcast %172 : vector<8x1xf32> to vector<8x16xf32>
    %174 = arith.divf %170, %173 : vector<8x16xf32>
    %175 = arith.truncf %174 : vector<8x16xf32> to vector<8x16xbf16>
    %cst_68 = arith.constant dense<0.000000e+00> : vector<8x32xf32>
    %176 = tpu.matmul %175, %162, %cst_68 {dimension_numbers = #tpu.dot_dimension_numbers<[1], [0], [0], [1], [0, 0, 1, 1], [], []>} : vector<8x16xbf16>, vector<16x32xbf16>, vector<8x32xf32> -> vector<8x32xf32>
    %177 = vector.extract_strided_slice %123 {offsets = [0, 96], sizes = [8, 32], strides = [1, 1]} : vector<8x128xbf16> to vector<8x32xbf16>
    %178 = vector.extract_strided_slice %124 {offsets = [0, 96], sizes = [16, 32], strides = [1, 1]} : vector<16x128xbf16> to vector<16x32xbf16>
    %179 = vector.extract_strided_slice %125 {offsets = [0, 96], sizes = [16, 32], strides = [1, 1]} : vector<16x128xbf16> to vector<16x32xbf16>
    %cst_69 = arith.constant dense<0.000000e+00> : vector<8x16xf32>
    %180 = tpu.matmul %177, %178, %cst_69 {dimension_numbers = #tpu.dot_dimension_numbers<[1], [1], [0], [0], [0, 0, 1, 0], [], []>} : vector<8x32xbf16>, vector<16x32xbf16>, vector<8x16xf32> -> vector<8x16xf32>
    %cst_70 = arith.constant 0.176776692 : f32
    %181 = vector.broadcast %cst_70 : f32 to vector<8x16xf32>
    %182 = arith.mulf %180, %181 : vector<8x16xf32>
    %cst_71 = arith.constant dense<0xFF800000> : vector<8xf32>
    %183 = vector.multi_reduction <maximumf>, %182, %cst_71 [1] : vector<8x16xf32> to vector<8xf32>
    %184 = vector.shape_cast %183 : vector<8xf32> to vector<8x1xf32>
    %185 = vector.broadcast %184 : vector<8x1xf32> to vector<8x16xf32>
    %186 = arith.subf %182, %185 : vector<8x16xf32>
    %187 = math.exp %186 : vector<8x16xf32>
    %cst_72 = arith.constant dense<0.000000e+00> : vector<8xf32>
    %188 = vector.multi_reduction <add>, %187, %cst_72 [1] : vector<8x16xf32> to vector<8xf32>
    %189 = vector.shape_cast %188 : vector<8xf32> to vector<8x1xf32>
    %190 = vector.broadcast %189 : vector<8x1xf32> to vector<8x16xf32>
    %191 = arith.divf %187, %190 : vector<8x16xf32>
    %192 = arith.truncf %191 : vector<8x16xf32> to vector<8x16xbf16>
    %cst_73 = arith.constant dense<0.000000e+00> : vector<8x32xf32>
    %193 = tpu.matmul %192, %179, %cst_73 {dimension_numbers = #tpu.dot_dimension_numbers<[1], [0], [0], [1], [0, 0, 1, 1], [], []>} : vector<8x16xbf16>, vector<16x32xbf16>, vector<8x32xf32> -> vector<8x32xf32>
    %194 = tpu.concatenate %142, %159, %176, %193 in 1 : vector<8x32xf32>, vector<8x32xf32>, vector<8x32xf32>, vector<8x32xf32> -> vector<8x128xf32>
    %195 = arith.truncf %194 : vector<8x128xf32> to vector<8x128xbf16>
    %c0_74 = arith.constant 0 : index
    %c0_75 = arith.constant 0 : index
    %196 = vector.load %arg15[%c0_74, %c0_75] : memref<128x128xbf16, #tpu.memory_space<vmem>>, vector<128x128xbf16>
    %cst_76 = arith.constant dense<0.000000e+00> : vector<8x128xf32>
    %197 = tpu.matmul %195, %196, %cst_76 {dimension_numbers = #tpu.dot_dimension_numbers<[1], [0], [0], [1], [0, 0, 1, 1], [], []>} : vector<8x128xbf16>, vector<128x128xbf16>, vector<8x128xf32> -> vector<8x128xf32>
    %c0_77 = arith.constant 0 : index
    %c0_78 = arith.constant 0 : index
    %198 = vector.load %arg19[%c0_77, %c0_78] : memref<1x128xf32, #tpu.memory_space<vmem>>, vector<1x128xf32>
    %199 = vector.broadcast %198 : vector<1x128xf32> to vector<8x128xf32>
    %200 = arith.addf %197, %199 : vector<8x128xf32>
    %c0_79 = arith.constant 0 : index
    %c0_80 = arith.constant 0 : index
    %201 = vector.load %arg26[%c0_79, %c0_80] : memref<1x128xf32, #tpu.memory_space<vmem>>, vector<1x128xf32>
    %c0_81 = arith.constant 0 : index
    %c0_82 = arith.constant 0 : index
    %202 = vector.load %arg27[%c0_81, %c0_82] : memref<1x128xf32, #tpu.memory_space<vmem>>, vector<1x128xf32>
    %203 = arith.addf %116, %200 : vector<8x128xf32>
    %cst_83 = arith.constant dense<0.000000e+00> : vector<8xf32>
    %204 = vector.multi_reduction <add>, %203, %cst_83 [1] : vector<8x128xf32> to vector<8xf32>
    %205 = vector.shape_cast %204 : vector<8xf32> to vector<8x1xf32>
    %cst_84 = arith.constant 1.280000e+02 : f32
    %206 = vector.broadcast %cst_84 : f32 to vector<8x1xf32>
    %207 = arith.divf %205, %206 : vector<8x1xf32>
    %208 = vector.broadcast %207 : vector<8x1xf32> to vector<8x128xf32>
    %209 = arith.subf %203, %208 : vector<8x128xf32>
    %210 = arith.mulf %209, %209 : vector<8x128xf32>
    %cst_85 = arith.constant dense<0.000000e+00> : vector<8xf32>
    %211 = vector.multi_reduction <add>, %210, %cst_85 [1] : vector<8x128xf32> to vector<8xf32>
    %212 = vector.shape_cast %211 : vector<8xf32> to vector<8x1xf32>
    %cst_86 = arith.constant 1.280000e+02 : f32
    %213 = vector.broadcast %cst_86 : f32 to vector<8x1xf32>
    %214 = arith.divf %212, %213 : vector<8x1xf32>
    %cst_87 = arith.constant 9.99999974E-6 : f32
    %215 = vector.broadcast %cst_87 : f32 to vector<8x1xf32>
    %216 = arith.addf %214, %215 : vector<8x1xf32>
    %217 = math.rsqrt %216 : vector<8x1xf32>
    %218 = vector.broadcast %217 : vector<8x1xf32> to vector<8x128xf32>
    %219 = arith.mulf %209, %218 : vector<8x128xf32>
    %220 = vector.broadcast %201 : vector<1x128xf32> to vector<8x128xf32>
    %221 = arith.mulf %219, %220 : vector<8x128xf32>
    %222 = vector.broadcast %202 : vector<1x128xf32> to vector<8x128xf32>
    %223 = arith.addf %221, %222 : vector<8x128xf32>
    %cst_88 = arith.constant 0.000000e+00 : f32
    %224 = vector.broadcast %cst_88 : f32 to vector<8x128xf32>
    %225 = arith.maximumf %223, %224 : vector<8x128xf32>
    %226 = arith.truncf %225 : vector<8x128xf32> to vector<8x128xbf16>
    %c0_89 = arith.constant 0 : index
    %c0_90 = arith.constant 0 : index
    %227 = vector.load %arg20[%c0_89, %c0_90] : memref<128x256xbf16, #tpu.memory_space<vmem>>, vector<128x256xbf16>
    %cst_91 = arith.constant dense<0.000000e+00> : vector<8x256xf32>
    %228 = tpu.matmul %226, %227, %cst_91 {dimension_numbers = #tpu.dot_dimension_numbers<[1], [0], [0], [1], [0, 0, 1, 1], [], []>} : vector<8x128xbf16>, vector<128x256xbf16>, vector<8x256xf32> -> vector<8x256xf32>
    %c0_92 = arith.constant 0 : index
    %c0_93 = arith.constant 0 : index
    %229 = vector.load %arg21[%c0_92, %c0_93] : memref<1x256xf32, #tpu.memory_space<vmem>>, vector<1x256xf32>
    %230 = vector.broadcast %229 : vector<1x256xf32> to vector<8x256xf32>
    %231 = arith.addf %228, %230 : vector<8x256xf32>
    %cst_94 = arith.constant 0.000000e+00 : f32
    %232 = vector.broadcast %cst_94 : f32 to vector<8x256xf32>
    %233 = arith.maximumf %231, %232 : vector<8x256xf32>
    %234 = arith.truncf %233 : vector<8x256xf32> to vector<8x256xbf16>
    %c0_95 = arith.constant 0 : index
    %c0_96 = arith.constant 0 : index
    %235 = vector.load %arg22[%c0_95, %c0_96] : memref<256x128xbf16, #tpu.memory_space<vmem>>, vector<256x128xbf16>
    %cst_97 = arith.constant dense<0.000000e+00> : vector<8x128xf32>
    %236 = tpu.matmul %234, %235, %cst_97 {dimension_numbers = #tpu.dot_dimension_numbers<[1], [0], [0], [1], [0, 0, 1, 1], [], []>} : vector<8x256xbf16>, vector<256x128xbf16>, vector<8x128xf32> -> vector<8x128xf32>
    %c0_98 = arith.constant 0 : index
    %c0_99 = arith.constant 0 : index
    %237 = vector.load %arg23[%c0_98, %c0_99] : memref<1x128xf32, #tpu.memory_space<vmem>>, vector<1x128xf32>
    %238 = vector.broadcast %237 : vector<1x128xf32> to vector<8x128xf32>
    %239 = arith.addf %236, %238 : vector<8x128xf32>
    %c0_100 = arith.constant 0 : index
    %c0_101 = arith.constant 0 : index
    %240 = vector.load %arg28[%c0_100, %c0_101] : memref<1x128xf32, #tpu.memory_space<vmem>>, vector<1x128xf32>
    %c0_102 = arith.constant 0 : index
    %c0_103 = arith.constant 0 : index
    %241 = vector.load %arg29[%c0_102, %c0_103] : memref<1x128xf32, #tpu.memory_space<vmem>>, vector<1x128xf32>
    %242 = arith.addf %225, %239 : vector<8x128xf32>
    %cst_104 = arith.constant dense<0.000000e+00> : vector<8xf32>
    %243 = vector.multi_reduction <add>, %242, %cst_104 [1] : vector<8x128xf32> to vector<8xf32>
    %244 = vector.shape_cast %243 : vector<8xf32> to vector<8x1xf32>
    %cst_105 = arith.constant 1.280000e+02 : f32
    %245 = vector.broadcast %cst_105 : f32 to vector<8x1xf32>
    %246 = arith.divf %244, %245 : vector<8x1xf32>
    %247 = vector.broadcast %246 : vector<8x1xf32> to vector<8x128xf32>
    %248 = arith.subf %242, %247 : vector<8x128xf32>
    %249 = arith.mulf %248, %248 : vector<8x128xf32>
    %cst_106 = arith.constant dense<0.000000e+00> : vector<8xf32>
    %250 = vector.multi_reduction <add>, %249, %cst_106 [1] : vector<8x128xf32> to vector<8xf32>
    %251 = vector.shape_cast %250 : vector<8xf32> to vector<8x1xf32>
    %cst_107 = arith.constant 1.280000e+02 : f32
    %252 = vector.broadcast %cst_107 : f32 to vector<8x1xf32>
    %253 = arith.divf %251, %252 : vector<8x1xf32>
    %cst_108 = arith.constant 9.99999974E-6 : f32
    %254 = vector.broadcast %cst_108 : f32 to vector<8x1xf32>
    %255 = arith.addf %253, %254 : vector<8x1xf32>
    %256 = math.rsqrt %255 : vector<8x1xf32>
    %257 = vector.broadcast %256 : vector<8x1xf32> to vector<8x128xf32>
    %258 = arith.mulf %248, %257 : vector<8x128xf32>
    %259 = vector.broadcast %240 : vector<1x128xf32> to vector<8x128xf32>
    %260 = arith.mulf %258, %259 : vector<8x128xf32>
    %261 = vector.broadcast %241 : vector<1x128xf32> to vector<8x128xf32>
    %262 = arith.addf %260, %261 : vector<8x128xf32>
    %cst_109 = arith.constant 0.000000e+00 : f32
    %263 = vector.broadcast %cst_109 : f32 to vector<8x128xf32>
    %264 = arith.maximumf %262, %263 : vector<8x128xf32>
    %c0_110 = arith.constant 0 : index
    %c0_111 = arith.constant 0 : index
    %c0_112 = arith.constant 0 : index
    %265 = vector.load %arg30[%c0_110, %c0_111, %c0_112] : memref<1x8x128xf32, #tpu.memory_space<vmem>>, vector<1x8x128xf32>
    %266 = vector.shape_cast %265 : vector<1x8x128xf32> to vector<8x128xf32>
    %267 = vector.shape_cast %264 : vector<8x128xf32> to vector<1x8x128xf32>
    tpu.vector_store %arg30[%c0_110, %c0_111, %c0_112], %267 {strides = array<i32>} : memref<1x8x128xf32, #tpu.memory_space<vmem>>, vector<1x8x128xf32>,
    return
  }
  func.func @transform_0(%arg0: i32, %arg1: i32) -> (i32, i32, i32) {
    %c0_i32 = arith.constant 0 : i32
    %c0_i32_0 = arith.constant 0 : i32
    %c0_i32_1 = arith.constant 0 : i32
    return %arg0, %c0_i32, %c0_i32_0 : i32, i32, i32
  }
  func.func @transform_1(%arg0: i32, %arg1: i32) -> (i32, i32, i32) {
    %c0_i32 = arith.constant 0 : i32
    %c0_i32_0 = arith.constant 0 : i32
    %c0_i32_1 = arith.constant 0 : i32
    return %arg0, %c0_i32, %c0_i32_0 : i32, i32, i32
  }
  func.func @transform_2(%arg0: i32, %arg1: i32) -> (i32, i32) {
    %c0_i32 = arith.constant 0 : i32
    %c0_i32_0 = arith.constant 0 : i32
    %c0_i32_1 = arith.constant 0 : i32
    return %c0_i32, %c0_i32_0 : i32, i32
  }
  func.func @transform_3(%arg0: i32, %arg1: i32) -> (i32, i32) {
    %c0_i32 = arith.constant 0 : i32
    %c0_i32_0 = arith.constant 0 : i32
    %c0_i32_1 = arith.constant 0 : i32
    return %c0_i32, %c0_i32_0 : i32, i32
  }
  func.func @transform_4(%arg0: i32, %arg1: i32) -> (i32, i32) {
    %c0_i32 = arith.constant 0 : i32
    %c0_i32_0 = arith.constant 0 : i32
    %c0_i32_1 = arith.constant 0 : i32
    return %c0_i32, %c0_i32_0 : i32, i32
  }
  func.func @transform_5(%arg0: i32, %arg1: i32) -> (i32, i32) {
    %c0_i32 = arith.constant 0 : i32
    %c0_i32_0 = arith.constant 0 : i32
    %c0_i32_1 = arith.constant 0 : i32
    return %c0_i32, %c0_i32_0 : i32, i32
  }
  func.func @transform_6(%arg0: i32, %arg1: i32) -> (i32, i32) {
    %c0_i32 = arith.constant 0 : i32
    %c0_i32_0 = arith.constant 0 : i32
    %c0_i32_1 = arith.constant 0 : i32
    return %c0_i32, %c0_i32_0 : i32, i32
  }
  func.func @transform_7(%arg0: i32, %arg1: i32) -> (i32, i32) {
    %c0_i32 = arith.constant 0 : i32
    %c0_i32_0 = arith.constant 0 : i32
    %c0_i32_1 = arith.constant 0 : i32
    return %c0_i32, %c0_i32_0 : i32, i32
  }
  func.func @transform_8(%arg0: i32, %arg1: i32) -> (i32, i32) {
    %c0_i32 = arith.constant 0 : i32
    %c0_i32_0 = arith.constant 0 : i32
    %c0_i32_1 = arith.constant 0 : i32
    return %c0_i32, %c0_i32_0 : i32, i32
  }
  func.func @transform_9(%arg0: i32, %arg1: i32) -> (i32, i32) {
    %c0_i32 = arith.constant 0 : i32
    %c0_i32_0 = arith.constant 0 : i32
    %c0_i32_1 = arith.constant 0 : i32
    return %c0_i32, %c0_i32_0 : i32, i32
  }
  func.func @transform_10(%arg0: i32, %arg1: i32) -> (i32, i32) {
    %c0_i32 = arith.constant 0 : i32
    %c0_i32_0 = arith.constant 0 : i32
    %c0_i32_1 = arith.constant 0 : i32
    return %c0_i32, %c0_i32_0 : i32, i32
  }
  func.func @transform_11(%arg0: i32, %arg1: i32) -> (i32, i32) {
    %c0_i32 = arith.constant 0 : i32
    %c0_i32_0 = arith.constant 0 : i32
    %c0_i32_1 = arith.constant 0 : i32
    return %c0_i32, %c0_i32_0 : i32, i32
  }
  func.func @transform_12(%arg0: i32, %arg1: i32) -> (i32, i32) {
    %c0_i32 = arith.constant 0 : i32
    %c0_i32_0 = arith.constant 0 : i32
    %c0_i32_1 = arith.constant 0 : i32
    return %c0_i32, %c0_i32_0 : i32, i32
  }
  func.func @transform_13(%arg0: i32, %arg1: i32) -> (i32, i32) {
    %c0_i32 = arith.constant 0 : i32
    %c0_i32_0 = arith.constant 0 : i32
    %c0_i32_1 = arith.constant 0 : i32
    return %c0_i32, %c0_i32_0 : i32, i32
  }
  func.func @transform_14(%arg0: i32, %arg1: i32) -> (i32, i32) {
    %c0_i32 = arith.constant 0 : i32
    %c0_i32_0 = arith.constant 0 : i32
    %c0_i32_1 = arith.constant 0 : i32
    return %c0_i32, %c0_i32_0 : i32, i32
  }
  func.func @transform_15(%arg0: i32, %arg1: i32) -> (i32, i32) {
    %c0_i32 = arith.constant 0 : i32
    %c0_i32_0 = arith.constant 0 : i32
    %c0_i32_1 = arith.constant 0 : i32
    return %c0_i32, %c0_i32_0 : i32, i32
  }
  func.func @transform_16(%arg0: i32, %arg1: i32) -> (i32, i32) {
    %c0_i32 = arith.constant 0 : i32
    %c0_i32_0 = arith.constant 0 : i32
    %c0_i32_1 = arith.constant 0 : i32
    return %c0_i32, %c0_i32_0 : i32, i32
  }
  func.func @transform_17(%arg0: i32, %arg1: i32) -> (i32, i32) {
    %c0_i32 = arith.constant 0 : i32
    %c0_i32_0 = arith.constant 0 : i32
    %c0_i32_1 = arith.constant 0 : i32
    return %c0_i32, %c0_i32_0 : i32, i32
  }
  func.func @transform_18(%arg0: i32, %arg1: i32) -> (i32, i32) {
    %c0_i32 = arith.constant 0 : i32
    %c0_i32_0 = arith.constant 0 : i32
    %c0_i32_1 = arith.constant 0 : i32
    return %c0_i32, %c0_i32_0 : i32, i32
  }
  func.func @transform_19(%arg0: i32, %arg1: i32) -> (i32, i32) {
    %c0_i32 = arith.constant 0 : i32
    %c0_i32_0 = arith.constant 0 : i32
    %c0_i32_1 = arith.constant 0 : i32
    return %c0_i32, %c0_i32_0 : i32, i32
  }
  func.func @transform_20(%arg0: i32, %arg1: i32) -> (i32, i32) {
    %c0_i32 = arith.constant 0 : i32
    %c0_i32_0 = arith.constant 0 : i32
    %c0_i32_1 = arith.constant 0 : i32
    return %c0_i32, %c0_i32_0 : i32, i32
  }
  func.func @transform_21(%arg0: i32, %arg1: i32) -> (i32, i32) {
    %c0_i32 = arith.constant 0 : i32
    %c0_i32_0 = arith.constant 0 : i32
    %c0_i32_1 = arith.constant 0 : i32
    return %c0_i32, %c0_i32_0 : i32, i32
  }
  func.func @transform_22(%arg0: i32, %arg1: i32) -> (i32, i32) {
    %c0_i32 = arith.constant 0 : i32
    %c0_i32_0 = arith.constant 0 : i32
    %c0_i32_1 = arith.constant 0 : i32
    return %c0_i32, %c0_i32_0 : i32, i32
  }
  func.func @transform_23(%arg0: i32, %arg1: i32) -> (i32, i32) {
    %c0_i32 = arith.constant 0 : i32
    %c0_i32_0 = arith.constant 0 : i32
    %c0_i32_1 = arith.constant 0 : i32
    return %c0_i32, %c0_i32_0 : i32, i32
  }
  func.func @transform_24(%arg0: i32, %arg1: i32) -> (i32, i32) {
    %c0_i32 = arith.constant 0 : i32
    %c0_i32_0 = arith.constant 0 : i32
    %c0_i32_1 = arith.constant 0 : i32
    return %c0_i32, %c0_i32_0 : i32, i32
  }
  func.func @transform_25(%arg0: i32, %arg1: i32) -> (i32, i32) {
    %c0_i32 = arith.constant 0 : i32
    %c0_i32_0 = arith.constant 0 : i32
    %c0_i32_1 = arith.constant 0 : i32
    return %c0_i32, %c0_i32_0 : i32, i32
  }
  func.func @transform_26(%arg0: i32, %arg1: i32) -> (i32, i32) {
    %c0_i32 = arith.constant 0 : i32
    %c0_i32_0 = arith.constant 0 : i32
    %c0_i32_1 = arith.constant 0 : i32
    return %c0_i32, %c0_i32_0 : i32, i32
  }
  func.func @transform_27(%arg0: i32, %arg1: i32) -> (i32, i32) {
    %c0_i32 = arith.constant 0 : i32
    %c0_i32_0 = arith.constant 0 : i32
    %c0_i32_1 = arith.constant 0 : i32
    return %c0_i32, %c0_i32_0 : i32, i32
  }
  func.func @transform_28(%arg0: i32, %arg1: i32) -> (i32, i32, i32) {
    %c0_i32 = arith.constant 0 : i32
    %c0_i32_0 = arith.constant 0 : i32
    return %arg0, %arg1, %c0_i32 : i32, i32, i32
  }
}

</mosaic_0001>

<bundles_post_ra>
// kernel: tpu_custom_call.1
= control target key start
LH: loop header
LB: loop body
LE: loop exit
PB: predicated region body
PF: predicated region fallthrough
CT: control target
= control target key end

     0   :  { %s7259_s0 = inlined_call_operand.hbm [shape: f32[2,16,128], index: 0, kind: input, shape index: {}]   ;;  %s7260_s1 = inlined_call_operand.hbm [shape: f32[2,16,128], index: 1, kind: input, shape index: {}]   ;;  %s7261_s2 = inlined_call_operand.hbm [shape: bf16[128,128], index: 2, kind: input, shape index: {}]   ;;  %s7262_s3 = inlined_call_operand.hbm [shape: bf16[128,128], index: 3, kind: input, shape index: {}]   ;;  %s7263_s4 = inlined_call_operand.hbm [shape: bf16[128,128], index: 4, kind: input, shape index: {}]   ;;  %s7264_s5 = inlined_call_operand.hbm [shape: bf16[128,128], index: 5, kind: input, shape index: {}]   ;;  %s7265_s6 = inlined_call_operand.hbm [shape: f32[1,128], index: 6, kind: input, shape index: {}]   ;;  %s7266_s7 = inlined_call_operand.hbm [shape: f32[1,128], index: 7, kind: input, shape index: {}]   ;;  %s7267_s8 = inlined_call_operand.hbm [shape: f32[1,128], index: 8, kind: input, shape index: {}]   ;;  %s7268_s9 = inlined_call_operand.hbm [shape: f32[1,128], index: 9, kind: input, shape index: {}]   ;;  %s7269_s10 = inlined_call_operand.hbm [shape: bf16[128,128], index: 10, kind: input, shape index: {}]   ;;  %s7270_s11 = inlined_call_operand.hbm [shape: bf16[128,128], index: 11, kind: input, shape index: {}]   ;;  %s7271_s12 = inlined_call_operand.hbm [shape: bf16[128,128], index: 12, kind: input, shape index: {}]   ;;  %s7272_s13 = inlined_call_operand.hbm [shape: bf16[128,128], index: 13, kind: input, shape index: {}]   ;;  %s7273_s14 = inlined_call_operand.hbm [shape: f32[1,128], index: 14, kind: input, shape index: {}]   ;;  %s7274_s15 = inlined_call_operand.hbm [shape: f32[1,128], index: 15, kind: input, shape index: {}]   ;;  %s7275_s16 = inlined_call_operand.hbm [shape: f32[1,128], index: 16, kind: input, shape index: {}]   ;;  %s7276_s17 = inlined_call_operand.hbm [shape: f32[1,128], index: 17, kind: input, shape index: {}]   ;;  %s7277_s18 = inlined_call_operand.hbm [shape: bf16[128,256], index: 18, kind: input, shape index: {}]   ;;  %s7278_s19 = inlined_call_operand.hbm [shape: f32[1,256], index: 19, kind: input, shape index: {}]   ;;  %s7279_s20 = inlined_call_operand.hbm [shape: bf16[256,128], index: 20, kind: input, shape index: {}]   ;;  %s7280_s21 = inlined_call_operand.hbm [shape: f32[1,128], index: 21, kind: input, shape index: {}]   ;;  %s7281_s22 = inlined_call_operand.hbm [shape: f32[1,128], index: 22, kind: input, shape index: {}]   ;;  %s7282_s23 = inlined_call_operand.hbm [shape: f32[1,128], index: 23, kind: input, shape index: {}]   ;;  %s7283_s24 = inlined_call_operand.hbm [shape: f32[1,128], index: 24, kind: input, shape index: {}]   ;;  %s7284_s25 = inlined_call_operand.hbm [shape: f32[1,128], index: 25, kind: input, shape index: {}]   ;;  %s7285_s26 = inlined_call_operand.hbm [shape: f32[1,128], index: 26, kind: input, shape index: {}]   ;;  %s7286_s27 = inlined_call_operand.hbm [shape: f32[1,128], index: 27, kind: input, shape index: {}]   ;;  %s7287_s28 = inlined_call_operand.hbm [shape: f32[2,16,128], index: 28, kind: output, shape index: {}]  }
   0x1   :  { %7345 = sst [smem:[#allocation81_spill]] %s7259_s0 }
   0x2   :  { %7346 = sst [smem:[#allocation82_spill]] %s7260_s1 }
   0x3   :  { %7347 = sst [smem:[#allocation83_spill]] %s7261_s2 }
   0x4   :  { %7348 = sst [smem:[#allocation84_spill]] %s7262_s3 }
   0x5   :  { %7349 = sst [smem:[#allocation85_spill]] %s7263_s4 }
   0x6   :  { %7350 = sst [smem:[#allocation86_spill]] %s7264_s5 }
   0x7   :  { %7351 = sst [smem:[#allocation87_spill]] %s7265_s6 }
   0x8   :  { %7352 = sst [smem:[#allocation88_spill]] %s7266_s7 }
   0x9   :  { %7353 = sst [smem:[#allocation89_spill]] %s7267_s8 }
   0xa   :  { %7354 = sst [smem:[#allocation90_spill]] %s7268_s9 }
   0xb   :  { %7355 = sst [smem:[#allocation91_spill]] %s7269_s10 }
   0xc   :  { %7356 = sst [smem:[#allocation92_spill]] %s7270_s11 }
   0xd   :  { %7357 = sst [smem:[#allocation93_spill]] %s7271_s12 }
   0xe   :  { %7358 = sst [smem:[#allocation94_spill]] %s7272_s13 }
   0xf   :  { %7359 = sst [smem:[#allocation95_spill]] %s7273_s14 }
  0x10   :  { %7360 = sst [smem:[#allocation96_spill]] %s7274_s15 }
  0x11   :  { %7361 = sst [smem:[#allocation97_spill]] %s7275_s16 }
  0x12   :  { %7362 = sst [smem:[#allocation98_spill]] %s7276_s17 }
  0x13   :  { %7363 = sst [smem:[#allocation99_spill]] %s7277_s18 }
  0x14   :  { %7364 = sst [smem:[#allocation100_spill]] %s7278_s19 }
  0x15   :  { %7365 = sst [smem:[#allocation101_spill]] %s7279_s20 }
  0x16   :  { %7366 = sst [smem:[#allocation102_spill]] %s7280_s21 }
  0x17   :  { %7367 = sst [smem:[#allocation103_spill]] %s7281_s22 }
  0x18   :  { %7368 = sst [smem:[#allocation104_spill]] %s7282_s23 }
  0x19   :  { %7369 = sst [smem:[#allocation105_spill]] %s7283_s24 }
  0x1a   :  { %7370 = sst [smem:[#allocation106_spill]] %s7285_s26 }
  0x1b   :  { %7371 = sst [smem:[#allocation107_spill]] %s7286_s27 }
  0x1c   :  { %7372 = sst [smem:[#allocation108_spill]] %s7287_s28 }
  0x1d   :  { %33 = vsyncpa [#allocation7], 0 }
  0x1e   :  { %35 = vsyncpa [#allocation7 + $0x1], 0 }
  0x1f   :  { %36 = vsyncpa [#allocation10], 0 }
  0x20   :  { %38 = vsyncpa [#allocation10 + $0x1], 0 }
  0x21   :  { %39 = vsyncpa [#allocation13], 0 }
  0x22   :  { %40 = vsyncpa [#allocation16], 0 }
  0x23   :  { %41 = vsyncpa [#allocation19], 0 }
  0x24   :  { %42 = vsyncpa [#allocation22], 0 }
  0x25   :  { %43 = vsyncpa [#allocation25], 0 }
  0x26   :  { %44 = vsyncpa [#allocation28], 0 }
  0x27   :  { %45 = vsyncpa [#allocation31], 0 }
  0x28   :  { %46 = vsyncpa [#allocation34], 0 }
  0x29   :  { %47 = vsyncpa [#allocation37], 0 }
  0x2a   :  { %48 = vsyncpa [#allocation40], 0 }
  0x2b   :  { %49 = vsyncpa [#allocation43], 0 }
  0x2c   :  { %50 = vsyncpa [#allocation46], 0 }
  0x2d   :  { %51 = vsyncpa [#allocation49], 0 }
  0x2e   :  { %52 = vsyncpa [#allocation8], 0 }
  0x2f   :  { %54 = vsyncpa [#allocation8 + $0x1], 0  ;;  %s6138_s8 = smov 0   ;;  %s6140_s5 = smov 0  }
  0x30   :  { %s6142_s9 = smov 0   ;;  %s6144_s30 = smov 0  }
  0x31   :  { %s6146_s3 = smov 0   ;;  %s6148_s6 = smov 0  }
  0x32   :  { %7373 = sst [smem:[#allocation68_spill]] %s6146_s3  ;;  %s6150_s10 = smov 0  }
  0x33   :  { %s6152_s0 = smov 0   ;;  %s6154_s11 = smov 0  }
  0x34   :  { %s6156_s29 = smov 0   ;;  %s6158_s2 = smov 0  }
  0x35 LB: > { %s7375_s3 = sld [smem:[#allocation68_spill]]  ;;  %7377 = sst [smem:[#allocation69_spill]] %s5914_s5  ;;  %s5950_s2 = sphi %s6158_s2, %s60_s2   ;;  %s5946_s29 = sphi %s6156_s29, %s7502_s29   ;;  %s5942_s11 = sphi %s6154_s11, %s7501_s11   ;;  %s5938_s0 = sphi %s6152_s0, %s7497_s0   ;;  %s5934_s10 = sphi %s6150_s10, %s7496_s10   ;;  %s5930_s6 = sphi %s6148_s6, %s7500_s6   ;;  %s5922_s30 = sphi %s6144_s30, %s7494_s30   ;;  %s5918_s9 = sphi %s6142_s9, %s7498_s9   ;;  %s5914_s5 = sphi %s6140_s5, %s7493_s5   ;;  %s5910_s8 = sphi %s6138_s8, %s7492_s8  }
  0x36   : > { %7376 = sst [smem:[#allocation68_spill]] %s5910_s8  ;;  %s6194_s7 = sadd.s32 4294967295, %s5950_s2  }
  0x37   : > { %7378 = sst [smem:[#allocation70_spill]] %s5918_s9  ;;  %p3876_p0 = scmp.ge.s32.totalorder %s5950_s2, 1 }
  0x38   : > { %7379 = sst [smem:[#allocation71_spill]] %s5922_s30  ;;  %p7320_p1 = scmp.eq.s32.totalorder %s6194_s7, 0 }
  0x39   : > { %7381 = sst [smem:[#allocation73_spill]] %s5930_s6  ;;  %p703_p2 = scmp.lt.s32.totalorder %s5950_s2, 5 }
  0x3a   : > { %7382 = sst [smem:[#allocation74_spill]] %s5934_s10  ;;  %s5952_s1 = smov [#allocation11]  }
  0x3b   : > { %7380 = sst [smem:[#allocation72_spill]] %s7375_s3  ;;  %p6199_p3 = pnand %p3876_p0, %p703_p2 }
  0x3c   : > { %7383 = sst [smem:[#allocation75_spill]] %s5938_s0  ;;  %s715_s4 = sshll.u32 %s5952_s1, 4  ;;  %s6203_s4 = int_to_ptr.vmem [resolvable:$true] %s715_s4 }
  0x3d   : > { %7384 = sst [smem:[#allocation76_spill]] %s5942_s11  ;;  %p4568_p4 = pneg %p6199_p3 }
  0x3e   : > { %7385 = sst [smem:[#allocation77_spill]] %s5946_s29  ;;  %s5953_s0 = smov [#allocation12]  }
  0x3f   : > { %7386 = sst [smem:[#allocation78_spill]] %s5950_s2  ;;  %p6209_p5 = pnand %p4568_p4, %p7320_p1 }
  0x40   : > { %7387 = sst [smem:[#allocation79_spill]] %s6194_s7  ;;  %s728_s10 = sshll.u32 %s5953_s0, 4  ;;  %s6213_s10 = int_to_ptr.vmem [resolvable:$true] %s728_s10 }
  0x41   : > { %s7388_s12 = scalar_select %p6199_p3, 1, 0 }
  0x42   : > { %s5954_s8 = smov [#allocation15]   ;;  %s7391_s1 = sld [smem:[#allocation83_spill]] }
  0x43   : > { %7389 = sst [smem:[#allocation80_spill]] %s7388_s12  ;;  %s6215_s5 = sshll.u32 %s5954_s8, 4  ;;  %s755_s5 = int_to_ptr.vmem [resolvable:$true] %s6215_s5 }
  0x44   : > { %p6225_p7 = pneg %p6209_p5 }
  0x48   : > { %s4980_s3 = scalar_lea.hbm %s7391_s1, 1024 }
  0x49   : > { %p4981_p6 = scmp.ne.s32.totalorder %s7391_s1, %s4980_s3  ;;  %p4987_p10 = scmp.lt.u32.totalorder %s4980_s3, %s7391_s1 }
  0x4b   : > { %p4983_p8 = pnand %p6225_p7, %p4981_p6 }
  0x4d   : > { %p4984_p9 = pneg %p4983_p8 }
  0x4f   : > { %p4989_p11 = pnand %p4987_p10, %p4984_p9 }
  0x51   : > { %4992 = shalt.err (!%p4989_p11)
}
  0x52   : > { %s4993_s9 = scalar_lea.vmem %s6203_s4, 1024  ;;  %p5001_p2 = scmp.lt.s32.totalorder %s6203_s4, %s6203_s4 }
  0x53   : > { %p4994_p12 = scmp.ne.s32.totalorder %s6203_s4, %s4993_s9  ;;  %p5002_p4 = scmp.lt.s32.totalorder %s4993_s9, %s4993_s9 }
  0x55   : > { %p4996_p13 = pnand %p4994_p12, %p6225_p7  ;;  %p5003_p6 = por %p5002_p4, %p5001_p2 }
  0x57   : > { %p4997_p0 = pneg %p4996_p13 }
  0x59   : > { %p5004_p8 = pnand %p5003_p6, %p4997_p0 }
  0x5b   : > { %5007 = shalt.err (!%p5004_p8)
}
  0x5c   : > { %s7327_s30 = smov 64   ;;  %s7325_s3 = smov 4  }
  0x5d   : > { %4571 = dma.hbm_to_vmem [thread:$0]  (!%p6209_p5), %s7391_s1, 1024, %s6203_s4, [#allocation10], %s7327_s30, %s7327_s30, %s7325_s3  }
  0x5e   : > { %s7393_s29 = sld [smem:[#allocation84_spill]] }
  0x64   : > { %s7394_s27 = smov %s7393_s29  ;;  %s5008_s9 = scalar_lea.hbm %s7393_s29, 1024 }
  0x65   : > { %p5009_p9 = scmp.ne.s32.totalorder %s7394_s27, %s5008_s9  ;;  %p5015_p12 = scmp.lt.u32.totalorder %s5008_s9, %s7394_s27 }
  0x67   : > { %p5011_p10 = pnand %p5009_p9, %p6225_p7 }
  0x69   : > { %p5012_p11 = pneg %p5011_p10 }
  0x6b   : > { %p5017_p13 = pnand %p5015_p12, %p5012_p11 }
  0x6d   : > { %5020 = shalt.err (!%p5017_p13)
}
  0x6e   : > { %s5021_s4 = scalar_lea.vmem %s6213_s10, 1024  ;;  %p5029_p6 = scmp.lt.s32.totalorder %s6213_s10, %s6213_s10 }
  0x6f   : > { %p5022_p0 = scmp.ne.s32.totalorder %s6213_s10, %s5021_s4  ;;  %p5030_p8 = scmp.lt.s32.totalorder %s5021_s4, %s5021_s4 }
  0x71   : > { %p5024_p2 = pnand %p5022_p0, %p6225_p7  ;;  %p5031_p9 = por %p5030_p8, %p5029_p6 }
  0x73   : > { %p5025_p4 = pneg %p5024_p2 }
  0x75   : > { %p5032_p10 = pnand %p5031_p9, %p5025_p4 }
  0x77   : > { %5035 = shalt.err (!%p5032_p10)
}
  0x78   : > { %4574 = dma.hbm_to_vmem [thread:$0]  (!%p6209_p5), %s7394_s27, 1024, %s6213_s10, [#allocation13], %s7327_s30, %s7327_s30, %s7325_s3  }
  0x79   : > { %s7395_s2 = sld [smem:[#allocation86_spill]] }
  0x7f   : > { %s7396_s12 = smov %s7395_s2  ;;  %s5036_s6 = scalar_lea.hbm %s7395_s2, 1024 }
  0x80   : > { %p5037_p11 = scmp.ne.s32.totalorder %s7396_s12, %s5036_s6  ;;  %p5043_p0 = scmp.lt.u32.totalorder %s5036_s6, %s7396_s12 }
  0x82   : > { %p5039_p12 = pnand %p5037_p11, %p6225_p7 }
  0x84   : > { %p5040_p13 = pneg %p5039_p12 }
  0x86   : > { %p5045_p2 = pnand %p5043_p0, %p5040_p13 }
  0x88   : > { %5048 = shalt.err (!%p5045_p2)
}
  0x89   : > { %s5049_s24 = scalar_lea.vmem %s755_s5, 1024  ;;  %p5057_p9 = scmp.lt.s32.totalorder %s755_s5, %s755_s5 }
  0x8a   : > { %p5050_p4 = scmp.ne.s32.totalorder %s755_s5, %s5049_s24  ;;  %p5058_p10 = scmp.lt.s32.totalorder %s5049_s24, %s5049_s24 }
  0x8c   : > { %p5052_p6 = pnand %p5050_p4, %p6225_p7  ;;  %p5059_p1 = por %p5058_p10, %p5057_p9 }
  0x8e   : > { %p5053_p8 = pneg %p5052_p6 }
  0x90   : > { %p5060_p3 = pnand %p5059_p1, %p5053_p8 }
  0x92   : > { %5063 = shalt.err (!%p5060_p3)
}
  0x93   : > { %4580 = dma.hbm_to_vmem [thread:$0]  (!%p6209_p5), %s7396_s12, 1024, %s755_s5, [#allocation16], %s7327_s30, %s7327_s30, %s7325_s3  }
  0x94   : > { %s5957_s11 = smov [#allocation18]   ;;  %s5958_s2 = smov [#allocation21]  }
  0x95   : > { %s779_s29 = sshll.u32 %s5957_s11, 4  ;;  %s801_s6 = sshll.u32 %s5958_s2, 4  ;;  %s780_s29 = int_to_ptr.vmem [resolvable:$true] %s779_s29  ;;  %s802_s6 = int_to_ptr.vmem [resolvable:$true] %s801_s6 }
  0x96   : > { %s7397_s9 = sld [smem:[#allocation88_spill]] }
  0x9c   : > { %s7398_s4 = smov %s7397_s9  ;;  %s5064_s24 = scalar_lea.hbm %s7397_s9, 16 }
  0x9d   : > { %p5065_p1 = scmp.ne.s32.totalorder %s7398_s4, %s5064_s24  ;;  %p5071_p12 = scmp.lt.u32.totalorder %s5064_s24, %s7398_s4 }
  0x9f   : > { %p5067_p3 = pnand %p5065_p1, %p6225_p7 }
  0xa1   : > { %p5068_p11 = pneg %p5067_p3 }
  0xa3   : > { %p5073_p13 = pnand %p5071_p12, %p5068_p11 }
  0xa5   : > { %5076 = shalt.err (!%p5073_p13)
}
  0xa6   : > { %s5077_s5 = scalar_lea.vmem %s780_s29, 16  ;;  %s5084_s26 = scalar_lea.vmem %s780_s29, 32 }
  0xa7   : > { %p5078_p0 = scmp.ne.s32.totalorder %s780_s29, %s5077_s5  ;;  %p5085_p6 = scmp.lt.s32.totalorder %s780_s29, %s780_s29 }
  0xa8   : > { %p5086_p8 = scmp.lt.s32.totalorder %s5084_s26, %s5077_s5 }
  0xa9   : > { %p5080_p2 = pnand %p5078_p0, %p6225_p7 }
  0xaa   : > { %p5087_p9 = por %p5086_p8, %p5085_p6 }
  0xab   : > { %p5081_p4 = pneg %p5080_p2 }
  0xad   : > { %p5088_p10 = pnand %p5087_p9, %p5081_p4 }
  0xaf   : > { %5091 = shalt.err (!%p5088_p10)
}
  0xb0   : > { %4586 = dma.hbm_to_vmem [thread:$0]  (!%p6209_p5), %s7398_s4, 16, %s780_s29, [#allocation19]  }
  0xb1   : > { %s7399_s2 = sld [smem:[#allocation90_spill]] }
  0xb7   : > { %s7400_s24 = smov %s7399_s2  ;;  %s5092_s0 = scalar_lea.hbm %s7399_s2, 16 }
  0xb8   : > { %p5093_p1 = scmp.ne.s32.totalorder %s7400_s24, %s5092_s0  ;;  %p5099_p12 = scmp.lt.u32.totalorder %s5092_s0, %s7400_s24 }
  0xba   : > { %p5095_p3 = pnand %p5093_p1, %p6225_p7 }
  0xbc   : > { %p5096_p11 = pneg %p5095_p3 }
  0xbe   : > { %p5101_p13 = pnand %p5099_p12, %p5096_p11 }
  0xc0   : > { %5104 = shalt.err (!%p5101_p13)
}
  0xc1   : > { %s5105_s26 = scalar_lea.vmem %s802_s6, 16  ;;  %s5112_s29 = scalar_lea.vmem %s802_s6, 32 }
  0xc2   : > { %p5106_p0 = scmp.ne.s32.totalorder %s802_s6, %s5105_s26  ;;  %p5113_p6 = scmp.lt.s32.totalorder %s802_s6, %s802_s6 }
  0xc3   : > { %p5114_p8 = scmp.lt.s32.totalorder %s5112_s29, %s5105_s26 }
  0xc4   : > { %p5108_p2 = pnand %p5106_p0, %p6225_p7 }
  0xc5   : > { %p5115_p9 = por %p5114_p8, %p5113_p6 }
  0xc6   : > { %p5109_p4 = pneg %p5108_p2 }
  0xc8   : > { %p5116_p10 = pnand %p5115_p9, %p5109_p4 }
  0xca   : > { %5119 = shalt.err (!%p5116_p10)
}
  0xcb   : > { %4592 = dma.hbm_to_vmem [thread:$0]  (!%p6209_p5), %s7400_s24, 16, %s802_s6, [#allocation22]  }
  0xcc   : > { %s5959_s22 = smov [#allocation24]   ;;  %s5960_s2 = smov [#allocation27]  }
  0xcd   : > { %s824_s11 = sshll.u32 %s5959_s22, 4  ;;  %s850_s0 = sshll.u32 %s5960_s2, 4  ;;  %s825_s11 = int_to_ptr.vmem [resolvable:$true] %s824_s11  ;;  %s851_s0 = int_to_ptr.vmem [resolvable:$true] %s850_s0 }
  0xce   : > { %s7401_s10 = sld [smem:[#allocation92_spill]] }
  0xd4   : > { %s7402_s3 = smov %s7401_s10  ;;  %s5120_s5 = scalar_lea.hbm %s7401_s10, 1024 }
  0xd5   : > { %p5121_p1 = scmp.ne.s32.totalorder %s7402_s3, %s5120_s5  ;;  %p5127_p12 = scmp.lt.u32.totalorder %s5120_s5, %s7402_s3 }
  0xd7   : > { %p5123_p3 = pnand %p5121_p1, %p6225_p7 }
  0xd9   : > { %p5124_p11 = pneg %p5123_p3 }
  0xdb   : > { %p5129_p13 = pnand %p5127_p12, %p5124_p11 }
  0xdd   : > { %5132 = shalt.err (!%p5129_p13)
}
  0xde   : > { %s5133_s6 = scalar_lea.vmem %s825_s11, 1024  ;;  %p5141_p6 = scmp.lt.s32.totalorder %s825_s11, %s825_s11 }
  0xdf   : > { %p5134_p0 = scmp.ne.s32.totalorder %s825_s11, %s5133_s6  ;;  %p5142_p8 = scmp.lt.s32.totalorder %s5133_s6, %s5133_s6 }
  0xe1   : > { %p5136_p2 = pnand %p5134_p0, %p6225_p7  ;;  %p5143_p9 = por %p5142_p8, %p5141_p6 }
  0xe3   : > { %p5137_p4 = pneg %p5136_p2 }
  0xe5   : > { %p5144_p10 = pnand %p5143_p9, %p5137_p4 }
  0xe7   : > { %5147 = shalt.err (!%p5144_p10)
}
  0xe8   : > { %s7403_s1 = smov 4   ;;  %s7404_s22 = smov 64  }
  0xe9   : > { %4598 = dma.hbm_to_vmem [thread:$0]  (!%p6209_p5), %s7402_s3, 1024, %s825_s11, [#allocation25], %s7404_s22, %s7404_s22, %s7403_s1  }
  0xea   : > { %s7405_s13 = sld [smem:[#allocation94_spill]] }
  0xf0   : > { %s5148_s10 = scalar_lea.hbm %s7405_s13, 1024 }
  0xf1   : > { %p5149_p1 = scmp.ne.s32.totalorder %s7405_s13, %s5148_s10  ;;  %p5155_p12 = scmp.lt.u32.totalorder %s5148_s10, %s7405_s13 }
  0xf3   : > { %p5151_p3 = pnand %p5149_p1, %p6225_p7 }
  0xf5   : > { %p5152_p11 = pneg %p5151_p3 }
  0xf7   : > { %p5157_p13 = pnand %p5155_p12, %p5152_p11 }
  0xf9   : > { %5160 = shalt.err (!%p5157_p13)
}
  0xfa   : > { %s5161_s6 = scalar_lea.vmem %s851_s0, 1024  ;;  %p5169_p6 = scmp.lt.s32.totalorder %s851_s0, %s851_s0 }
  0xfb   : > { %p5162_p0 = scmp.ne.s32.totalorder %s851_s0, %s5161_s6  ;;  %p5170_p8 = scmp.lt.s32.totalorder %s5161_s6, %s5161_s6 }
  0xfd   : > { %p5164_p2 = pnand %p5162_p0, %p6225_p7  ;;  %p5171_p9 = por %p5170_p8, %p5169_p6 }
  0xff   : > { %p5165_p4 = pneg %p5164_p2 }
 0x101   : > { %p5172_p10 = pnand %p5171_p9, %p5165_p4 }
 0x103   : > { %5175 = shalt.err (!%p5172_p10)
}
 0x104   : > { %4604 = dma.hbm_to_vmem [thread:$0]  (!%p6209_p5), %s7405_s13, 1024, %s851_s0, [#allocation28], %s7404_s22, %s7404_s22, %s7403_s1  }
 0x105   : > { %s5961_s2 = smov [#allocation30]   ;;  %s5962_s9 = smov [#allocation33]  }
 0x106   : > { %s875_s8 = sshll.u32 %s5961_s2, 4  ;;  %s897_s10 = sshll.u32 %s5962_s9, 4  ;;  %s876_s8 = int_to_ptr.vmem [resolvable:$true] %s875_s8  ;;  %s898_s10 = int_to_ptr.vmem [resolvable:$true] %s897_s10 }
 0x107   : > { %s7406_s15 = sld [smem:[#allocation96_spill]] }
 0x10d   : > { %s5176_s29 = scalar_lea.hbm %s7406_s15, 16 }
 0x10e   : > { %p5177_p1 = scmp.ne.s32.totalorder %s7406_s15, %s5176_s29  ;;  %p5183_p12 = scmp.lt.u32.totalorder %s5176_s29, %s7406_s15 }
 0x110   : > { %p5179_p3 = pnand %p5177_p1, %p6225_p7 }
 0x112   : > { %p5180_p11 = pneg %p5179_p3 }
 0x114   : > { %p5185_p13 = pnand %p5183_p12, %p5180_p11 }
 0x116   : > { %5188 = shalt.err (!%p5185_p13)
}
 0x117   : > { %s5189_s0 = scalar_lea.vmem %s876_s8, 16  ;;  %s5196_s30 = scalar_lea.vmem %s876_s8, 32 }
 0x118   : > { %p5190_p0 = scmp.ne.s32.totalorder %s876_s8, %s5189_s0  ;;  %p5197_p6 = scmp.lt.s32.totalorder %s876_s8, %s876_s8 }
 0x119   : > { %p5198_p8 = scmp.lt.s32.totalorder %s5196_s30, %s5189_s0 }
 0x11a   : > { %p5192_p2 = pnand %p5190_p0, %p6225_p7 }
 0x11b   : > { %p5199_p9 = por %p5198_p8, %p5197_p6 }
 0x11c   : > { %p5193_p4 = pneg %p5192_p2 }
 0x11e   : > { %p5200_p10 = pnand %p5199_p9, %p5193_p4 }
 0x120   : > { %5203 = shalt.err (!%p5200_p10)
}
 0x121   : > { %4610 = dma.hbm_to_vmem [thread:$0]  (!%p6209_p5), %s7406_s15, 16, %s876_s8, [#allocation31]  }
 0x122   : > { %s7407_s17 = sld [smem:[#allocation98_spill]] }
 0x128   : > { %s5204_s26 = scalar_lea.hbm %s7407_s17, 16 }
 0x129   : > { %p5205_p1 = scmp.ne.s32.totalorder %s7407_s17, %s5204_s26  ;;  %p5211_p12 = scmp.lt.u32.totalorder %s5204_s26, %s7407_s17 }
 0x12b   : > { %p5207_p3 = pnand %p5205_p1, %p6225_p7 }
 0x12d   : > { %p5208_p11 = pneg %p5207_p3 }
 0x12f   : > { %p5213_p13 = pnand %p5211_p12, %p5208_p11 }
 0x131   : > { %5216 = shalt.err (!%p5213_p13)
}
 0x132   : > { %s5217_s0 = scalar_lea.vmem %s898_s10, 16  ;;  %s5224_s8 = scalar_lea.vmem %s898_s10, 32 }
 0x133   : > { %p5218_p0 = scmp.ne.s32.totalorder %s898_s10, %s5217_s0  ;;  %p5225_p6 = scmp.lt.s32.totalorder %s898_s10, %s898_s10 }
 0x134   : > { %p5226_p8 = scmp.lt.s32.totalorder %s5224_s8, %s5217_s0 }
 0x135   : > { %p5220_p2 = pnand %p5218_p0, %p6225_p7 }
 0x136   : > { %p5227_p9 = por %p5226_p8, %p5225_p6 }
 0x137   : > { %p5221_p4 = pneg %p5220_p2 }
 0x139   : > { %p5228_p10 = pnand %p5227_p9, %p5221_p4 }
 0x13b   : > { %5231 = shalt.err (!%p5228_p10)
}
 0x13c   : > { %4616 = dma.hbm_to_vmem [thread:$0]  (!%p6209_p5), %s7407_s17, 16, %s898_s10, [#allocation34]  }
 0x13d   : > { %s5963_s9 = smov [#allocation36]   ;;  %s5964_s5 = smov [#allocation39]  }
 0x13e   : > { %s921_s3 = sshll.u32 %s5963_s9, 4  ;;  %s945_s26 = sshll.u32 %s5964_s5, 4  ;;  %s922_s3 = int_to_ptr.vmem [resolvable:$true] %s921_s3  ;;  %s946_s26 = int_to_ptr.vmem [resolvable:$true] %s945_s26 }
 0x13f   : > { %s7408_s19 = sld [smem:[#allocation100_spill]] }
 0x145   : > { %s5232_s6 = scalar_lea.hbm %s7408_s19, 32 }
 0x146   : > { %p5233_p1 = scmp.ne.s32.totalorder %s7408_s19, %s5232_s6  ;;  %p5239_p12 = scmp.lt.u32.totalorder %s5232_s6, %s7408_s19 }
 0x148   : > { %p5235_p3 = pnand %p5233_p1, %p6225_p7 }
 0x14a   : > { %p5236_p11 = pneg %p5235_p3 }
 0x14c   : > { %p5241_p13 = pnand %p5239_p12, %p5236_p11 }
 0x14e   : > { %5244 = shalt.err (!%p5241_p13)
}
 0x14f   : > { %s5245_s10 = scalar_lea.vmem %s922_s3, 32  ;;  %p5253_p6 = scmp.lt.s32.totalorder %s922_s3, %s922_s3 }
 0x150   : > { %p5246_p0 = scmp.ne.s32.totalorder %s922_s3, %s5245_s10  ;;  %p5254_p8 = scmp.lt.s32.totalorder %s5245_s10, %s5245_s10 }
 0x152   : > { %p5248_p2 = pnand %p5246_p0, %p6225_p7  ;;  %p5255_p9 = por %p5254_p8, %p5253_p6 }
 0x154   : > { %p5249_p4 = pneg %p5248_p2 }
 0x156   : > { %p5256_p10 = pnand %p5255_p9, %p5249_p4 }
 0x158   : > { %5259 = shalt.err (!%p5256_p10)
}
 0x159   : > { %4622 = dma.hbm_to_vmem [thread:$0]  (!%p6209_p5), %s7408_s19, 32, %s922_s3, [#allocation37]  }
 0x15a   : > { %s7409_s21 = sld [smem:[#allocation102_spill]] }
 0x160   : > { %s5260_s27 = scalar_lea.hbm %s7409_s21, 16 }
 0x161   : > { %p5261_p1 = scmp.ne.s32.totalorder %s7409_s21, %s5260_s27  ;;  %p5267_p12 = scmp.lt.u32.totalorder %s5260_s27, %s7409_s21 }
 0x163   : > { %p5263_p3 = pnand %p5261_p1, %p6225_p7 }
 0x165   : > { %p5264_p11 = pneg %p5263_p3 }
 0x167   : > { %p5269_p13 = pnand %p5267_p12, %p5264_p11 }
 0x169   : > { %5272 = shalt.err (!%p5269_p13)
}
 0x16a   : > { %s5273_s30 = scalar_lea.vmem %s946_s26, 16  ;;  %s5280_s3 = scalar_lea.vmem %s946_s26, 32 }
 0x16b   : > { %p5274_p0 = scmp.ne.s32.totalorder %s946_s26, %s5273_s30  ;;  %p5281_p6 = scmp.lt.s32.totalorder %s946_s26, %s946_s26 }
 0x16c   : > { %p5282_p8 = scmp.lt.s32.totalorder %s5280_s3, %s5273_s30 }
 0x16d   : > { %p5276_p2 = pnand %p5274_p0, %p6225_p7 }
 0x16e   : > { %p5283_p9 = por %p5282_p8, %p5281_p6 }
 0x16f   : > { %p5277_p4 = pneg %p5276_p2 }
 0x171   : > { %p5284_p10 = pnand %p5283_p9, %p5277_p4 }
 0x173   : > { %5287 = shalt.err (!%p5284_p10)
}
 0x174   : > { %4628 = dma.hbm_to_vmem [thread:$0]  (!%p6209_p5), %s7409_s21, 16, %s946_s26, [#allocation40]  }
 0x175   : > { %s5965_s9 = smov [#allocation42]   ;;  %s5966_s29 = smov [#allocation45]  }
 0x176   : > { %s967_s5 = sshll.u32 %s5965_s9, 4  ;;  %s989_s27 = sshll.u32 %s5966_s29, 4  ;;  %s968_s5 = int_to_ptr.vmem [resolvable:$true] %s967_s5  ;;  %s990_s27 = int_to_ptr.vmem [resolvable:$true] %s989_s27 }
 0x177   : > { %s7410_s23 = sld [smem:[#allocation104_spill]] }
 0x17d   : > { %s5288_s0 = scalar_lea.hbm %s7410_s23, 16 }
 0x17e   : > { %p5289_p1 = scmp.ne.s32.totalorder %s7410_s23, %s5288_s0  ;;  %p5295_p12 = scmp.lt.u32.totalorder %s5288_s0, %s7410_s23 }
 0x180   : > { %p5291_p3 = pnand %p5289_p1, %p6225_p7 }
 0x182   : > { %p5292_p11 = pneg %p5291_p3 }
 0x184   : > { %p5297_p13 = pnand %p5295_p12, %p5292_p11 }
 0x186   : > { %5300 = shalt.err (!%p5297_p13)
}
 0x187   : > { %s5301_s26 = scalar_lea.vmem %s968_s5, 16  ;;  %s5308_s2 = scalar_lea.vmem %s968_s5, 32 }
 0x188   : > { %p5302_p0 = scmp.ne.s32.totalorder %s968_s5, %s5301_s26  ;;  %p5309_p6 = scmp.lt.s32.totalorder %s968_s5, %s968_s5 }
 0x189   : > { %p5310_p8 = scmp.lt.s32.totalorder %s5308_s2, %s5301_s26 }
 0x18a   : > { %p5304_p2 = pnand %p5302_p0, %p6225_p7 }
 0x18b   : > { %p5311_p9 = por %p5310_p8, %p5309_p6 }
 0x18c   : > { %p5305_p4 = pneg %p5304_p2 }
 0x18e   : > { %p5312_p10 = pnand %p5311_p9, %p5305_p4 }
 0x190   : > { %5315 = shalt.err (!%p5312_p10)
}
 0x191   : > { %4634 = dma.hbm_to_vmem [thread:$0]  (!%p6209_p5), %s7410_s23, 16, %s968_s5, [#allocation43]  }
 0x192   : > { %s5316_s0 = scalar_lea.hbm %s7284_s25, 16 }
 0x193   : > { %p5317_p1 = scmp.ne.s32.totalorder %s7284_s25, %s5316_s0  ;;  %p5323_p12 = scmp.lt.u32.totalorder %s5316_s0, %s7284_s25 }
 0x195   : > { %p5319_p3 = pnand %p5317_p1, %p6225_p7 }
 0x197   : > { %p5320_p11 = pneg %p5319_p3 }
 0x199   : > { %p5325_p13 = pnand %p5323_p12, %p5320_p11 }
 0x19b   : > { %5328 = shalt.err (!%p5325_p13)
}
 0x19c   : > { %s5329_s26 = scalar_lea.vmem %s990_s27, 16  ;;  %s5336_s5 = scalar_lea.vmem %s990_s27, 32 }
 0x19d   : > { %p5330_p0 = scmp.ne.s32.totalorder %s990_s27, %s5329_s26  ;;  %p5337_p6 = scmp.lt.s32.totalorder %s990_s27, %s990_s27 }
 0x19e   : > { %p5338_p8 = scmp.lt.s32.totalorder %s5336_s5, %s5329_s26 }
 0x19f   : > { %p5332_p2 = pnand %p5330_p0, %p6225_p7 }
 0x1a0   : > { %p5339_p9 = por %p5338_p8, %p5337_p6 }
 0x1a1   : > { %p5333_p4 = pneg %p5332_p2 }
 0x1a3   : > { %p5340_p10 = pnand %p5339_p9, %p5333_p4 }
 0x1a5   : > { %5343 = shalt.err (!%p5340_p10)
}
 0x1a6   : > { %4640 = dma.hbm_to_vmem [thread:$0]  (!%p6209_p5), %s7284_s25, 16, %s990_s27, [#allocation46]  }
 0x1a7   : > { %s5967_s29 = smov [#allocation14]   ;;  %s5968_s11 = smov [#allocation17]  }
 0x1a8   : > { %s741_s6 = sshll.u32 %s5967_s29, 4  ;;  %s768_s0 = sshll.u32 %s5968_s11, 4  ;;  %s742_s6 = int_to_ptr.vmem [resolvable:$true] %s741_s6  ;;  %s769_s0 = int_to_ptr.vmem [resolvable:$true] %s768_s0 }
 0x1a9   : > { %s7411_s3 = sld [smem:[#allocation85_spill]] }
 0x1af   : > { %s5344_s10 = scalar_lea.hbm %s7411_s3, 1024 }
 0x1b0   : > { %p5345_p1 = scmp.ne.s32.totalorder %s7411_s3, %s5344_s10  ;;  %p5351_p12 = scmp.lt.u32.totalorder %s5344_s10, %s7411_s3 }
 0x1b2   : > { %p5347_p3 = pnand %p5345_p1, %p6225_p7 }
 0x1b4   : > { %p5348_p11 = pneg %p5347_p3 }
 0x1b6   : > { %p5353_p13 = pnand %p5351_p12, %p5348_p11 }
 0x1b8   : > { %5356 = shalt.err (!%p5353_p13)
}
 0x1b9   : > { %s5357_s27 = scalar_lea.vmem %s742_s6, 1024  ;;  %p5365_p6 = scmp.lt.s32.totalorder %s742_s6, %s742_s6 }
 0x1ba   : > { %p5358_p0 = scmp.ne.s32.totalorder %s742_s6, %s5357_s27  ;;  %p5366_p8 = scmp.lt.s32.totalorder %s5357_s27, %s5357_s27 }
 0x1bc   : > { %p5360_p2 = pnand %p5358_p0, %p6225_p7  ;;  %p5367_p9 = por %p5366_p8, %p5365_p6 }
 0x1be   : > { %p5361_p4 = pneg %p5360_p2 }
 0x1c0   : > { %p5368_p10 = pnand %p5367_p9, %p5361_p4 }
 0x1c2   : > { %5371 = shalt.err (!%p5368_p10)
}
 0x1c3   : > { %4577 = dma.hbm_to_vmem [thread:$0]  (!%p6209_p5), %s7411_s3, 1024, %s742_s6, [#allocation13], %s7404_s22, %s7404_s22, %s7403_s1  }
 0x1c4   : > { %s7412_s8 = sld [smem:[#allocation87_spill]] }
 0x1ca   : > { %s7413_s26 = smov %s7412_s8  ;;  %s5372_s30 = scalar_lea.hbm %s7412_s8, 16 }
 0x1cb   : > { %p5373_p1 = scmp.ne.s32.totalorder %s7413_s26, %s5372_s30  ;;  %p5379_p12 = scmp.lt.u32.totalorder %s5372_s30, %s7413_s26 }
 0x1cd   : > { %p5375_p3 = pnand %p5373_p1, %p6225_p7 }
 0x1cf   : > { %p5376_p11 = pneg %p5375_p3 }
 0x1d1   : > { %p5381_p13 = pnand %p5379_p12, %p5376_p11 }
 0x1d3   : > { %5384 = shalt.err (!%p5381_p13)
}
 0x1d4   : > { %s5385_s4 = scalar_lea.vmem %s769_s0, 16  ;;  %s5392_s6 = scalar_lea.vmem %s769_s0, 32 }
 0x1d5   : > { %p5386_p0 = scmp.ne.s32.totalorder %s769_s0, %s5385_s4  ;;  %p5393_p6 = scmp.lt.s32.totalorder %s769_s0, %s769_s0 }
 0x1d6   : > { %p5394_p8 = scmp.lt.s32.totalorder %s5392_s6, %s5385_s4 }
 0x1d7   : > { %p5388_p2 = pnand %p5386_p0, %p6225_p7 }
 0x1d8   : > { %p5395_p9 = por %p5394_p8, %p5393_p6 }
 0x1d9   : > { %p5389_p4 = pneg %p5388_p2 }
 0x1db   : > { %p5396_p10 = pnand %p5395_p9, %p5389_p4 }
 0x1dd   : > { %5399 = shalt.err (!%p5396_p10)
}
 0x1de   : > { %4583 = dma.hbm_to_vmem [thread:$0]  (!%p6209_p5), %s7413_s26, 16, %s769_s0, [#allocation16]  }
 0x1df   : > { %s5969_s11 = smov [#allocation20]   ;;  %s5970_s30 = smov [#allocation23]  }
 0x1e0   : > { %s790_s8 = sshll.u32 %s5969_s11, 4  ;;  %s811_s10 = sshll.u32 %s5970_s30, 4  ;;  %s791_s8 = int_to_ptr.vmem [resolvable:$true] %s790_s8  ;;  %s812_s10 = int_to_ptr.vmem [resolvable:$true] %s811_s10 }
 0x1e1   : > { %s7414_s27 = sld [smem:[#allocation89_spill]] }
 0x1e7   : > { %s5400_s3 = scalar_lea.hbm %s7414_s27, 16 }
 0x1e8   : > { %p5401_p1 = scmp.ne.s32.totalorder %s7414_s27, %s5400_s3  ;;  %p5407_p12 = scmp.lt.u32.totalorder %s5400_s3, %s7414_s27 }
 0x1ea   : > { %p5403_p3 = pnand %p5401_p1, %p6225_p7 }
 0x1ec   : > { %p5404_p11 = pneg %p5403_p3 }
 0x1ee   : > { %p5409_p13 = pnand %p5407_p12, %p5404_p11 }
 0x1f0   : > { %5412 = shalt.err (!%p5409_p13)
}
 0x1f1   : > { %s5413_s0 = scalar_lea.vmem %s791_s8, 16  ;;  %s5420_s29 = scalar_lea.vmem %s791_s8, 32 }
 0x1f2   : > { %p5414_p0 = scmp.ne.s32.totalorder %s791_s8, %s5413_s0  ;;  %p5421_p6 = scmp.lt.s32.totalorder %s791_s8, %s791_s8 }
 0x1f3   : > { %p5422_p8 = scmp.lt.s32.totalorder %s5420_s29, %s5413_s0 }
 0x1f4   : > { %p5416_p2 = pnand %p5414_p0, %p6225_p7 }
 0x1f5   : > { %p5423_p9 = por %p5422_p8, %p5421_p6 }
 0x1f6   : > { %p5417_p4 = pneg %p5416_p2 }
 0x1f8   : > { %p5424_p10 = pnand %p5423_p9, %p5417_p4 }
 0x1fa   : > { %5427 = shalt.err (!%p5424_p10)
}
 0x1fb   : > { %4589 = dma.hbm_to_vmem [thread:$0]  (!%p6209_p5), %s7414_s27, 16, %s791_s8, [#allocation19]  }
 0x1fc   : > { %s7415_s5 = sld [smem:[#allocation91_spill]] }
 0x202   : > { %s7416_s4 = smov %s7415_s5  ;;  %s5428_s2 = scalar_lea.hbm %s7415_s5, 1024 }
 0x203   : > { %p5429_p1 = scmp.ne.s32.totalorder %s7416_s4, %s5428_s2  ;;  %p5435_p12 = scmp.lt.u32.totalorder %s5428_s2, %s7416_s4 }
 0x205   : > { %p5431_p3 = pnand %p5429_p1, %p6225_p7 }
 0x207   : > { %p5432_p11 = pneg %p5431_p3 }
 0x209   : > { %p5437_p13 = pnand %p5435_p12, %p5432_p11 }
 0x20b   : > { %5440 = shalt.err (!%p5437_p13)
}
 0x20c   : > { %s5441_s11 = scalar_lea.vmem %s812_s10, 1024  ;;  %p5449_p6 = scmp.lt.s32.totalorder %s812_s10, %s812_s10 }
 0x20d   : > { %p5442_p0 = scmp.ne.s32.totalorder %s812_s10, %s5441_s11  ;;  %p5450_p8 = scmp.lt.s32.totalorder %s5441_s11, %s5441_s11 }
 0x20f   : > { %p5444_p2 = pnand %p5442_p0, %p6225_p7  ;;  %p5451_p9 = por %p5450_p8, %p5449_p6 }
 0x211   : > { %p5445_p4 = pneg %p5444_p2 }
 0x213   : > { %p5452_p10 = pnand %p5451_p9, %p5445_p4 }
 0x215   : > { %5455 = shalt.err (!%p5452_p10)
}
 0x216   : > { %4595 = dma.hbm_to_vmem [thread:$0]  (!%p6209_p5), %s7416_s4, 1024, %s812_s10, [#allocation22], %s7404_s22, %s7404_s22, %s7403_s1  }
 0x217   : > { %s5971_s12 = smov [#allocation26]   ;;  %s5972_s5 = smov [#allocation29]  }
 0x218   : > { %s837_s3 = sshll.u32 %s5971_s12, 4  ;;  %s864_s2 = sshll.u32 %s5972_s5, 4  ;;  %s838_s3 = int_to_ptr.vmem [resolvable:$true] %s837_s3  ;;  %s865_s2 = int_to_ptr.vmem [resolvable:$true] %s864_s2 }
 0x219   : > { %s7417_s0 = sld [smem:[#allocation93_spill]] }
 0x21f   : > { %s7418_s13 = smov %s7417_s0  ;;  %s5456_s29 = scalar_lea.hbm %s7417_s0, 1024 }
 0x220   : > { %p5457_p1 = scmp.ne.s32.totalorder %s7418_s13, %s5456_s29  ;;  %p5463_p12 = scmp.lt.u32.totalorder %s5456_s29, %s7418_s13 }
 0x222   : > { %p5459_p3 = pnand %p5457_p1, %p6225_p7 }
 0x224   : > { %p5460_p11 = pneg %p5459_p3 }
 0x226   : > { %p5465_p13 = pnand %p5463_p12, %p5460_p11 }
 0x228   : > { %5468 = shalt.err (!%p5465_p13)
}
 0x229   : > { %s5469_s10 = scalar_lea.vmem %s838_s3, 1024  ;;  %p5477_p6 = scmp.lt.s32.totalorder %s838_s3, %s838_s3 }
 0x22a   : > { %p5470_p0 = scmp.ne.s32.totalorder %s838_s3, %s5469_s10  ;;  %p5478_p8 = scmp.lt.s32.totalorder %s5469_s10, %s5469_s10 }
 0x22c   : > { %p5472_p2 = pnand %p5470_p0, %p6225_p7  ;;  %p5479_p9 = por %p5478_p8, %p5477_p6 }
 0x22e   : > { %p5473_p4 = pneg %p5472_p2 }
 0x230   : > { %p5480_p10 = pnand %p5479_p9, %p5473_p4 }
 0x232   : > { %5483 = shalt.err (!%p5480_p10)
}
 0x233   : > { %4601 = dma.hbm_to_vmem [thread:$0]  (!%p6209_p5), %s7418_s13, 1024, %s838_s3, [#allocation25], %s7404_s22, %s7404_s22, %s7403_s1  }
 0x234   : > { %s7419_s14 = sld [smem:[#allocation95_spill]] }
 0x23a   : > { %s5484_s5 = scalar_lea.hbm %s7419_s14, 16 }
 0x23b   : > { %p5485_p1 = scmp.ne.s32.totalorder %s7419_s14, %s5484_s5  ;;  %p5491_p12 = scmp.lt.u32.totalorder %s5484_s5, %s7419_s14 }
 0x23d   : > { %p5487_p3 = pnand %p5485_p1, %p6225_p7 }
 0x23f   : > { %p5488_p11 = pneg %p5487_p3 }
 0x241   : > { %p5493_p13 = pnand %p5491_p12, %p5488_p11 }
 0x243   : > { %5496 = shalt.err (!%p5493_p13)
}
 0x244   : > { %s5497_s11 = scalar_lea.vmem %s865_s2, 16  ;;  %s5504_s3 = scalar_lea.vmem %s865_s2, 32 }
 0x245   : > { %p5498_p0 = scmp.ne.s32.totalorder %s865_s2, %s5497_s11  ;;  %p5505_p6 = scmp.lt.s32.totalorder %s865_s2, %s865_s2 }
 0x246   : > { %p5506_p8 = scmp.lt.s32.totalorder %s5504_s3, %s5497_s11 }
 0x247   : > { %p5500_p2 = pnand %p5498_p0, %p6225_p7 }
 0x248   : > { %p5507_p9 = por %p5506_p8, %p5505_p6 }
 0x249   : > { %p5501_p4 = pneg %p5500_p2 }
 0x24b   : > { %p5508_p10 = pnand %p5507_p9, %p5501_p4 }
 0x24d   : > { %5511 = shalt.err (!%p5508_p10)
}
 0x24e   : > { %4607 = dma.hbm_to_vmem [thread:$0]  (!%p6209_p5), %s7419_s14, 16, %s865_s2, [#allocation28]  }
 0x24f   : > { %s5973_s15 = smov [#allocation32]   ;;  %s5974_s30 = smov [#allocation35]  }
 0x250   : > { %s886_s17 = sshll.u32 %s5973_s15, 4  ;;  %s907_s12 = sshll.u32 %s5974_s30, 4  ;;  %s887_s17 = int_to_ptr.vmem [resolvable:$true] %s886_s17  ;;  %s908_s12 = int_to_ptr.vmem [resolvable:$true] %s907_s12 }
 0x251   : > { %s7420_s16 = sld [smem:[#allocation97_spill]] }
 0x257   : > { %s5512_s9 = scalar_lea.hbm %s7420_s16, 16 }
 0x258   : > { %p5513_p1 = scmp.ne.s32.totalorder %s7420_s16, %s5512_s9  ;;  %p5519_p12 = scmp.lt.u32.totalorder %s5512_s9, %s7420_s16 }
 0x25a   : > { %p5515_p3 = pnand %p5513_p1, %p6225_p7 }
 0x25c   : > { %p5516_p11 = pneg %p5515_p3 }
 0x25e   : > { %p5521_p13 = pnand %p5519_p12, %p5516_p11 }
 0x260   : > { %5524 = shalt.err (!%p5521_p13)
}
 0x261   : > { %s5525_s2 = scalar_lea.vmem %s887_s17, 16  ;;  %s5532_s8 = scalar_lea.vmem %s887_s17, 32 }
 0x262   : > { %p5526_p0 = scmp.ne.s32.totalorder %s887_s17, %s5525_s2  ;;  %p5533_p6 = scmp.lt.s32.totalorder %s887_s17, %s887_s17 }
 0x263   : > { %p5534_p8 = scmp.lt.s32.totalorder %s5532_s8, %s5525_s2 }
 0x264   : > { %p5528_p2 = pnand %p5526_p0, %p6225_p7 }
 0x265   : > { %p5535_p9 = por %p5534_p8, %p5533_p6 }
 0x266   : > { %p5529_p4 = pneg %p5528_p2 }
 0x268   : > { %p5536_p10 = pnand %p5535_p9, %p5529_p4 }
 0x26a   : > { %5539 = shalt.err (!%p5536_p10)
}
 0x26b   : > { %4613 = dma.hbm_to_vmem [thread:$0]  (!%p6209_p5), %s7420_s16, 16, %s887_s17, [#allocation31]  }
 0x26c   : > { %s7421_s18 = sld [smem:[#allocation99_spill]] }
 0x272   : > { %s5540_s6 = scalar_lea.hbm %s7421_s18, 2048 }
 0x273   : > { %p5541_p1 = scmp.ne.s32.totalorder %s7421_s18, %s5540_s6  ;;  %p5547_p12 = scmp.lt.u32.totalorder %s5540_s6, %s7421_s18 }
 0x275   : > { %p5543_p3 = pnand %p5541_p1, %p6225_p7 }
 0x277   : > { %p5544_p11 = pneg %p5543_p3 }
 0x279   : > { %p5549_p13 = pnand %p5547_p12, %p5544_p11 }
 0x27b   : > { %5552 = shalt.err (!%p5549_p13)
}
 0x27c   : > { %s5553_s3 = scalar_lea.vmem %s908_s12, 2048  ;;  %p5561_p6 = scmp.lt.s32.totalorder %s908_s12, %s908_s12 }
 0x27d   : > { %p5554_p0 = scmp.ne.s32.totalorder %s908_s12, %s5553_s3  ;;  %p5562_p8 = scmp.lt.s32.totalorder %s5553_s3, %s5553_s3 }
 0x27f   : > { %p5556_p2 = pnand %p5554_p0, %p6225_p7  ;;  %p5563_p9 = por %p5562_p8, %p5561_p6 }
 0x281   : > { %p5557_p4 = pneg %p5556_p2 }
 0x283   : > { %p5564_p10 = pnand %p5563_p9, %p5557_p4 }
 0x285   : > { %5567 = shalt.err (!%p5564_p10)
}
 0x286   : > { %s7335_s17 = smov 128   ;;  %s7337_s2 = smov 8  }
 0x287   : > { %4619 = dma.hbm_to_vmem [thread:$0]  (!%p6209_p5), %s7421_s18, 2048, %s908_s12, [#allocation34], %s7335_s17, %s7335_s17, %s7337_s2  }
 0x288   : > { %s5977_s15 = smov [#allocation38]   ;;  %s5978_s5 = smov [#allocation41]  }
 0x289   : > { %s931_s30 = sshll.u32 %s5977_s15, 4  ;;  %s956_s6 = sshll.u32 %s5978_s5, 4  ;;  %s932_s30 = int_to_ptr.vmem [resolvable:$true] %s931_s30  ;;  %s957_s6 = int_to_ptr.vmem [resolvable:$true] %s956_s6 }
 0x28a   : > { %s7422_s20 = sld [smem:[#allocation101_spill]] }
 0x290   : > { %s5568_s29 = scalar_lea.hbm %s7422_s20, 2048 }
 0x291   : > { %p5569_p1 = scmp.ne.s32.totalorder %s7422_s20, %s5568_s29  ;;  %p5575_p12 = scmp.lt.u32.totalorder %s5568_s29, %s7422_s20 }
 0x293   : > { %p5571_p3 = pnand %p5569_p1, %p6225_p7 }
 0x295   : > { %p5572_p11 = pneg %p5571_p3 }
 0x297   : > { %p5577_p13 = pnand %p5575_p12, %p5572_p11 }
 0x299   : > { %5580 = shalt.err (!%p5577_p13)
}
 0x29a   : > { %s5581_s12 = scalar_lea.vmem %s932_s30, 2048  ;;  %p5589_p6 = scmp.lt.s32.totalorder %s932_s30, %s932_s30 }
 0x29b   : > { %p5582_p0 = scmp.ne.s32.totalorder %s932_s30, %s5581_s12  ;;  %p5590_p8 = scmp.lt.s32.totalorder %s5581_s12, %s5581_s12 }
 0x29d   : > { %p5584_p2 = pnand %p5582_p0, %p6225_p7  ;;  %p5591_p9 = por %p5590_p8, %p5589_p6 }
 0x29f   : > { %p5585_p4 = pneg %p5584_p2 }
 0x2a1   : > { %p5592_p10 = pnand %p5591_p9, %p5585_p4 }
 0x2a3   : > { %5595 = shalt.err (!%p5592_p10)
}
 0x2a4   : > { %4625 = dma.hbm_to_vmem [thread:$0]  (!%p6209_p5), %s7422_s20, 2048, %s932_s30, [#allocation37], %s7404_s22, %s7404_s22, %s7403_s1  }
 0x2a5   : > { %s7423_s15 = sld [smem:[#allocation103_spill]] }
 0x2ab   : > { %s5596_s5 = scalar_lea.hbm %s7423_s15, 16 }
 0x2ac   : > { %p5597_p1 = scmp.ne.s32.totalorder %s7423_s15, %s5596_s5  ;;  %p5603_p12 = scmp.lt.u32.totalorder %s5596_s5, %s7423_s15 }
 0x2ae   : > { %p5599_p3 = pnand %p5597_p1, %p6225_p7 }
 0x2b0   : > { %p5600_p11 = pneg %p5599_p3 }
 0x2b2   : > { %p5605_p13 = pnand %p5603_p12, %p5600_p11 }
 0x2b4   : > { %5608 = shalt.err (!%p5605_p13)
}
 0x2b5   : > { %s5609_s3 = scalar_lea.vmem %s957_s6, 16  ;;  %s5616_s1 = scalar_lea.vmem %s957_s6, 32 }
 0x2b6   : > { %p5610_p0 = scmp.ne.s32.totalorder %s957_s6, %s5609_s3  ;;  %p5617_p6 = scmp.lt.s32.totalorder %s957_s6, %s957_s6 }
 0x2b7   : > { %p5618_p8 = scmp.lt.s32.totalorder %s5616_s1, %s5609_s3 }
 0x2b8   : > { %p5612_p2 = pnand %p5610_p0, %p6225_p7 }
 0x2b9   : > { %p5619_p9 = por %p5618_p8, %p5617_p6 }
 0x2ba   : > { %p5613_p4 = pneg %p5612_p2 }
 0x2bc   : > { %p5620_p10 = pnand %p5619_p9, %p5613_p4 }
 0x2be   : > { %5623 = shalt.err (!%p5620_p10)
}
 0x2bf   : > { %4631 = dma.hbm_to_vmem [thread:$0]  (!%p6209_p5), %s7423_s15, 16, %s957_s6, [#allocation40]  }
 0x2c0   : > { %s5979_s12 = smov [#allocation44]   ;;  %s5980_s4 = smov [#allocation47]  }
 0x2c1   : > { %s978_s13 = sshll.u32 %s5979_s12, 4  ;;  %s1000_s8 = sshll.u32 %s5980_s4, 4  ;;  %s979_s13 = int_to_ptr.vmem [resolvable:$true] %s978_s13  ;;  %s1001_s8 = int_to_ptr.vmem [resolvable:$true] %s1000_s8 }
 0x2c2   : > { %s7424_s9 = sld [smem:[#allocation105_spill]] }
 0x2c8   : > { %s7425_s17 = smov %s7424_s9  ;;  %s5624_s0 = scalar_lea.hbm %s7424_s9, 16 }
 0x2c9   : > { %p5625_p1 = scmp.ne.s32.totalorder %s7425_s17, %s5624_s0  ;;  %p5631_p12 = scmp.lt.u32.totalorder %s5624_s0, %s7425_s17 }
 0x2cb   : > { %p5627_p3 = pnand %p5625_p1, %p6225_p7 }
 0x2cd   : > { %p5628_p11 = pneg %p5627_p3 }
 0x2cf   : > { %p5633_p13 = pnand %p5631_p12, %p5628_p11 }
 0x2d1   : > { %5636 = shalt.err (!%p5633_p13)
}
 0x2d2   : > { %s5637_s6 = scalar_lea.vmem %s979_s13, 16  ;;  %s5644_s22 = scalar_lea.vmem %s979_s13, 32 }
 0x2d3   : > { %p5638_p0 = scmp.ne.s32.totalorder %s979_s13, %s5637_s6  ;;  %p5645_p6 = scmp.lt.s32.totalorder %s979_s13, %s979_s13 }
 0x2d4   : > { %p5646_p8 = scmp.lt.s32.totalorder %s5644_s22, %s5637_s6 }
 0x2d5   : > { %p5640_p2 = pnand %p5638_p0, %p6225_p7 }
 0x2d6   : > { %p5647_p9 = por %p5646_p8, %p5645_p6 }
 0x2d7   : > { %p5641_p4 = pneg %p5640_p2 }
 0x2d9   : > { %p5648_p10 = pnand %p5647_p9, %p5641_p4 }
 0x2db   : > { %5651 = shalt.err (!%p5648_p10)
}
 0x2dc   : > { %4637 = dma.hbm_to_vmem [thread:$0]  (!%p6209_p5), %s7425_s17, 16, %s979_s13, [#allocation43]  }
 0x2dd   : > { %s7426_s5 = sld [smem:[#allocation106_spill]] }
 0x2e3   : > { %s7427_s3 = smov %s7426_s5  ;;  %s5652_s9 = scalar_lea.hbm %s7426_s5, 16 }
 0x2e4   : > { %p5653_p1 = scmp.ne.s32.totalorder %s7427_s3, %s5652_s9  ;;  %p5659_p12 = scmp.lt.u32.totalorder %s5652_s9, %s7427_s3 }
 0x2e6   : > { %p5655_p3 = pnand %p5653_p1, %p6225_p7 }
 0x2e8   : > { %p5656_p11 = pneg %p5655_p3 }
 0x2ea   : > { %p5661_p13 = pnand %p5659_p12, %p5656_p11 }
 0x2ec   : > { %5664 = shalt.err (!%p5661_p13)
}
 0x2ed   : > { %s5665_s6 = scalar_lea.vmem %s1001_s8, 16  ;;  %s5672_s13 = scalar_lea.vmem %s1001_s8, 32 }
 0x2ee   : > { %p5666_p0 = scmp.ne.s32.totalorder %s1001_s8, %s5665_s6  ;;  %p5673_p6 = scmp.lt.s32.totalorder %s1001_s8, %s1001_s8 }
 0x2ef   : > { %p5674_p8 = scmp.lt.s32.totalorder %s5672_s13, %s5665_s6 }
 0x2f0   : > { %p5668_p2 = pnand %p5666_p0, %p6225_p7 }
 0x2f1   : > { %p5675_p9 = por %p5674_p8, %p5673_p6 }
 0x2f2   : > { %p5669_p4 = pneg %p5668_p2 }
 0x2f4   : > { %p5676_p10 = pnand %p5675_p9, %p5669_p4 }
 0x2f6   : > { %5679 = shalt.err (!%p5676_p10)
}
 0x2f7   : > { %4643 = dma.hbm_to_vmem [thread:$0]  (!%p6209_p5), %s7427_s3, 16, %s1001_s8, [#allocation46]  }
 0x2f8   : > { %s5981_s12 = smov [#allocation48]   ;;  %s7428_s9 = sld [smem:[#allocation107_spill]] }
 0x2f9   : > { %s1011_s4 = sshll.u32 %s5981_s12, 4  ;;  %s1012_s4 = int_to_ptr.vmem [resolvable:$true] %s1011_s4 }
 0x2fe   : > { %s7429_s1 = smov %s7428_s9  ;;  %s5680_s0 = scalar_lea.hbm %s7428_s9, 16 }
 0x2ff   : > { %p5681_p1 = scmp.ne.s32.totalorder %s7429_s1, %s5680_s0  ;;  %p5687_p12 = scmp.lt.u32.totalorder %s5680_s0, %s7429_s1 }
 0x301   : > { %p5683_p3 = pnand %p5681_p1, %p6225_p7 }
 0x303   : > { %p5684_p11 = pneg %p5683_p3 }
 0x305   : > { %p5689_p13 = pnand %p5687_p12, %p5684_p11 }
 0x307   : > { %5692 = shalt.err (!%p5689_p13)
}
 0x308   : > { %s5693_s8 = scalar_lea.vmem %s1012_s4, 16  ;;  %s5700_s22 = scalar_lea.vmem %s1012_s4, 32 }
 0x309   : > { %p5694_p0 = scmp.ne.s32.totalorder %s1012_s4, %s5693_s8  ;;  %p5701_p6 = scmp.lt.s32.totalorder %s1012_s4, %s1012_s4 }
 0x30a   : > { %p5702_p8 = scmp.lt.s32.totalorder %s5700_s22, %s5693_s8 }
 0x30b   : > { %p5696_p2 = pnand %p5694_p0, %p6225_p7 }
 0x30c   : > { %p5703_p9 = por %p5702_p8, %p5701_p6 }
 0x30d   : > { %p5697_p4 = pneg %p5696_p2 }
 0x30f   : > { %p5704_p10 = pnand %p5703_p9, %p5697_p4 }
 0x311   : > { %5707 = shalt.err (!%p5704_p10)
}
 0x312   : > { %s7430_s10 = sld [smem:[#allocation78_spill]]  ;;  %s7431_s5 = sld [smem:[#allocation76_spill]] }
 0x313   : > { %s7432_s9 = sld [smem:[#allocation77_spill]]  ;;  %s7433_s0 = sld [smem:[#allocation73_spill]] }
 0x314   : > { %s7434_s29 = sld [smem:[#allocation72_spill]]  ;;  %s7435_s7 = sld [smem:[#allocation71_spill]] }
 0x315   : > { %s7436_s11 = sld [smem:[#allocation79_spill]]  ;;  %s7437_s6 = sld [smem:[#allocation70_spill]] }
 0x316   : > { %4646 = dma.hbm_to_vmem [thread:$0]  (!%p6209_p5), %s7429_s1, 16, %s1012_s4, [#allocation49]  }
 0x317   : > { %s7438_s8 = sld [smem:[#allocation69_spill]]  ;;  %s7439_s4 = sld [smem:[#allocation68_spill]] }
 0x318   : > { %s3875_s13 = sadd.s32 4294967294, %s7430_s10   ;;  %s69_s28 = sadd.s32 1, %s7431_s5 }
 0x319   : > { %p70_p7 = scmp.ge.s32.totalorder %s69_s28, 2  ;;  %s72_s22 = sadd.s32 1, %s7432_s9 }
 0x31a   : > { %s79_s30 = sadd.s32 1, %s7433_s0  ;;  %p86_p1 = scmp.ne.s32.totalorder %s7433_s0, %s7434_s29 }
 0x31b   : > { %s7504_s28 = smov (%p70_p7, %s69_s28), 0  ;;  %s7506_s22 = smov (!%p70_p7, %s72_s22), %s7432_s9 }
 0x31c   : > { %p87_p3 = scmp.eq.s32.totalorder %s7430_s10, 0  ;;  %p92_p11 = scmp.ne.s32.totalorder %s7434_s29, %s7435_s7 }
 0x31d   : > { %p74_p5 = scmp.ge.s32.totalorder %s7506_s22, 2  ;;  %s675_s12 = ssub.s32 %s7431_s5, %s7504_s28 }
 0x31e   : > { %p6746_p12 = por %p87_p3, %p86_p1  ;;  %p7441_p13 = scmp.eq.s32.totalorder %s7436_s11, 0 }
 0x31f   : > { %s7508_s22 = smov (%p74_p5, %s7506_s22), 0  ;;  %s679_s3 = sadd.s32 1, %s7437_s6 }
 0x320   : > { %p6752_p0 = por %p7441_p13, %p92_p11  ;;  %p689_p2 = scmp.ne.s32.totalorder %s7437_s6, %s7438_s8 }
 0x321   : > { %s76_s29 = ssub.s32 %s7432_s9, %s7508_s22  ;;  %p690_p4 = scmp.eq.s32.totalorder %s7436_s11, 3 }
 0x322   : > { %p77_p6 = scmp.eq.s32.totalorder %s76_s29, 0  ;;  %s676_s5 = sor.u32 %s675_s12, %s76_s29 }
 0x323   : > { %p677_p8 = scmp.eq.s32.totalorder %s676_s5, 0  ;;  %p6764_p9 = por %p690_p4, %p689_p2 }
 0x324   : > { %s6769_s14 = scalar_select %p77_p6, %s7433_s0, %s79_s30  }
 0x325   : > { %s7443_s7 = scalar_select %p6764_p9, 1, 0 }
 0x326   : > { %s7510_s6 = smov (!%p677_p8, %s7437_s6), %s679_s3  ;;  %p695_p10 = scmp.ne.s32.totalorder %s7438_s8, %s7439_s4 }
 0x327   : > { %p696_p7 = scmp.eq.s32.totalorder %s3875_s13, 3  ;;  %p4684_p1 = scmp.lt.s32.totalorder %s7430_s10, 4 }
 0x328   : > { %s1022_s15 = sand.u32 1, %s7433_s0   ;;  %s4074_s12 = sshll.u32 %s7432_s9, 8 }
 0x329   : > { %p6778_p3 = por %p696_p7, %p695_p10  ;;  %s6782_s11 = sshll.u32 %s1022_s15, 4 }
 0x32a   : > { %s7445_s17 = sld [smem:[#allocation81_spill]]  ;;  %s1026_s3 = scalar_lea.vmem [#allocation6], %s6782_s11 }
 0x32b   : > { %s7444_s16 = scalar_select %p6778_p3, 1, 0 }
 0x32c   : > { %s1033_s13 = sshll.u32 %s1026_s3, 4  ;;  %p6793_p11 = pnand %p4684_p1, %p6746_p12  ;;  %s6797_s13 = int_to_ptr.vmem [resolvable:$true] %s1033_s13 }
 0x32d   : > { %s7447_s30 = sld [smem:[#allocation82_spill]]  ;;  %s6804_s5 = scalar_lea.sflag [#allocation7], %s1022_s15 }
 0x32e   : > { %p5710_p13 = pneg %p6793_p11 }
 0x330   : > { %s6788_s18 = scalar_lea.hbm %s7445_s17, %s4074_s12  ;;  %s5713_s20 = scalar_lea.hbm %s7445_s17, 512 }
 0x331   : > { %s5708_s19 = scalar_lea.hbm %s6788_s18, 256  ;;  %p5714_p4 = scmp.lt.u32.totalorder %s6788_s18, %s7445_s17 }
 0x332   : > { %p5709_p5 = scmp.ne.s32.totalorder %s6788_s18, %s5708_s19  ;;  %p5715_p6 = scmp.lt.u32.totalorder %s5713_s20, %s5708_s19 }
 0x333   : > { %s7448_s4 = smov %s7447_s30  ;;  %s6802_s29 = scalar_lea.hbm %s7447_s30, %s4074_s12 }
 0x334   : > { %p5711_p12 = pnand %p5710_p13, %p5709_p5  ;;  %p5716_p8 = por %p5715_p6, %p5714_p4 }
 0x335   : > { %p5717_p10 = scmp.lt.u32.totalorder %s5708_s19, %s6788_s18 }
 0x336   : > { %p5712_p2 = pneg %p5711_p12 }
 0x337   : > { %p5718_p7 = por %p5717_p10, %p5716_p8 }
 0x339   : > { %p5719_p1 = pnand %p5718_p7, %p5712_p2 }
 0x33b   : > { %5722 = shalt.err (!%p5719_p1)
}
 0x33c   : > { %s5723_s15 = scalar_lea.vmem %s6797_s13, 256  ;;  %s5982_s12 = smov [#allocation6]  }
 0x33d   : > { %p5724_p5 = scmp.ne.s32.totalorder %s6797_s13, %s5723_s15  ;;  %s5728_s9 = sshll.u32 %s5982_s12, 4  ;;  %s5729_s9 = int_to_ptr.vmem [resolvable:$false] %s5728_s9 }
 0x33e   : > { %s5730_s21 = scalar_lea.vmem %s5729_s9, 512  ;;  %p5731_p9 = scmp.lt.s32.totalorder %s6797_s13, %s5729_s9 }
 0x33f   : > { %p5726_p12 = pnand %p5724_p5, %p5710_p13  ;;  %p5732_p4 = scmp.lt.s32.totalorder %s5730_s21, %s5723_s15 }
 0x341   : > { %p5727_p3 = pneg %p5726_p12  ;;  %p5733_p6 = por %p5732_p4, %p5731_p9 }
 0x343   : > { %p5734_p8 = pnand %p5733_p6, %p5727_p3 }
 0x345   : > { %5737 = shalt.err (!%p5734_p8)
}
 0x346   : > { %s7449_s19 = smov 8   ;;  %s7450_s20 = smov 128  }
 0x347   : > { %4650 = dma.hbm_to_vmem [thread:$0]  (!%p6793_p11), %s6788_s18, 256, %s6797_s13, %s6804_s5, %s7450_s20, %s7450_s20, %s7449_s19  }
 0x348   : > { %s1047_s23 = scalar_lea.vmem [#allocation9], %s6782_s11  ;;  %s1043_s30 = sand.u32 1, %s7430_s10  }
 0x349   : > { %s1054_s8 = sshll.u32 %s1047_s23, 4  ;;  %s6839_s2 = scalar_lea.sflag [#allocation10], %s1043_s30  ;;  %s6837_s8 = int_to_ptr.vmem [resolvable:$true] %s1054_s8 }
 0x34a   : > { %s5738_s3 = scalar_lea.hbm %s6802_s29, 256  ;;  %s5743_s9 = scalar_lea.hbm %s7448_s4, 512 }
 0x34b   : > { %p5739_p9 = scmp.ne.s32.totalorder %s6802_s29, %s5738_s3  ;;  %p5744_p10 = scmp.lt.u32.totalorder %s6802_s29, %s7448_s4 }
 0x34c   : > { %p5745_p7 = scmp.lt.u32.totalorder %s5743_s9, %s5738_s3  ;;  %p5747_p5 = scmp.lt.u32.totalorder %s5738_s3, %s6802_s29 }
 0x34d   : > { %p5741_p3 = pnand %p5739_p9, %p5710_p13 }
 0x34e   : > { %p5746_p1 = por %p5745_p7, %p5744_p10 }
 0x34f   : > { %p5742_p2 = pneg %p5741_p3 }
 0x350   : > { %p5748_p12 = por %p5747_p5, %p5746_p1 }
 0x352   : > { %p5749_p4 = pnand %p5748_p12, %p5742_p2 }
 0x354   : > { %5752 = shalt.err (!%p5749_p4)
}
 0x355   : > { %s5753_s18 = scalar_lea.vmem %s6837_s8, 256  ;;  %s5983_s10 = smov [#allocation9]  }
 0x356   : > { %p5754_p6 = scmp.ne.s32.totalorder %s6837_s8, %s5753_s18  ;;  %s5758_s11 = sshll.u32 %s5983_s10, 4  ;;  %s5759_s11 = int_to_ptr.vmem [resolvable:$false] %s5758_s11 }
 0x357   : > { %s5760_s17 = scalar_lea.vmem %s5759_s11, 512  ;;  %p5761_p3 = scmp.lt.s32.totalorder %s6837_s8, %s5759_s11 }
 0x358   : > { %p5756_p8 = pnand %p5754_p6, %p5710_p13  ;;  %p5762_p10 = scmp.lt.s32.totalorder %s5760_s17, %s5753_s18 }
 0x35a   : > { %p5757_p9 = pneg %p5756_p8  ;;  %p5763_p7 = por %p5762_p10, %p5761_p3 }
 0x35c   : > { %p5764_p1 = pnand %p5763_p7, %p5757_p9 }
 0x35e   : > { %5767 = shalt.err (!%p5764_p1)
}
 0x35f   : > { %4653 = dma.hbm_to_vmem [thread:$0]  (!%p6793_p11), %s6802_s29, 256, %s6837_s8, %s6839_s2, %s7450_s20, %s7450_s20, %s7449_s19  }
 0x360   : > { %s7451_s13 = sld [smem:[#allocation80_spill]] }
 0x366   : > { %p7452_p13 = scmp.ne.s32.totalorder %s7451_s13, 0 }
 0x367   : > { %s7453_s5 = sld [smem:[#allocation72_spill]] (!%p7452_p13) }
 0x368   : > { %1066 = sbr.rel (%p7452_p13) target bundleno = 7020 (0x1b6c), region = 132 }
 0x36d   : > { %s1068_s23 = sand.u32 (!%p7452_p13), 1, %s7453_s5  }
 0x36e   : > { %s6871_s30 = sshll.u32 (!%p7452_p13), %s1068_s23, 4  ;;  %s1069_s3 = scalar_lea.sflag (!%p7452_p13), [#allocation7], %s1068_s23 }
 0x36f   : > { %s6874_s15 = scalar_lea.vmem [#allocation6], %s6871_s30 }
 0x370   : > { %5841 = dma.done.wait (%p6752_p0), %s1069_s3, 256  }
 0x371   : > { %5843 = vsyncadd (%p6752_p0), %s1069_s3, 4294967040  ;;  %s7454_s0 = sld [smem:[#allocation79_spill]]  ;;  %s1081_s20 = scalar_lea.vmem [#allocation9], %s6871_s30 }
 0x377   : > { %s1077_s29 = sand.u32 1, %s7454_s0  }
 0x378   : > { %s1078_s19 = scalar_lea.sflag [#allocation10], %s1077_s29 }
 0x379   : > { %5845 = dma.done.wait (%p6752_p0), %s1078_s19, 256  }
 0x37a   : > { %5847 = vsyncadd (%p6752_p0), %s1078_s19, 4294967040  ;;  %p7455_p11 = scmp.eq.s32.totalorder %s7454_s0, 0 }
 0x37c   : > { %5849 = dma.done.wait (%p7455_p11), [#allocation10], 1024   ;;  %p7456_p2 = pmov %p7455_p11 }
 0x37e   : > { %5851 = vsyncadd (%p7456_p2), [#allocation10], 4294966272  ;;  %p7457_p5 = pmov %p7456_p2 }
 0x37f   : > { %p7458_p12 = pmov %p7456_p2 }
 0x380   : > { %5853 = dma.done.wait (%p7457_p5), [#allocation13], 2048  }
 0x381   : > { %5855 = vsyncadd (%p7458_p12), [#allocation13], 4294965248  ;;  %p7459_p4 = pmov %p7456_p2 }
 0x382   : > { %p7460_p6 = pmov %p7456_p2 }
 0x383   : > { %5857 = dma.done.wait (%p7459_p4), [#allocation16], 1040  }
 0x384   : > { %5859 = vsyncadd (%p7460_p6), [#allocation16], 4294966256  ;;  %p7461_p0 = pmov %p7456_p2 }
 0x386   : > { %5861 = dma.done.wait (%p7461_p0), [#allocation19], 32   ;;  %p7462_p8 = pmov %p7461_p0 }
 0x387   : > { %p7463_p9 = pmov %p7461_p0 }
 0x388   : > { %5863 = vsyncadd (%p7462_p8), [#allocation19], 4294967264 }
 0x389   : > { %5865 = dma.done.wait (%p7463_p9), [#allocation22], 1040   ;;  %p7464_p3 = pmov %p7461_p0 }
 0x38a   : > { %p7465_p10 = pmov %p7461_p0 }
 0x38b   : > { %5867 = vsyncadd (%p7464_p3), [#allocation22], 4294966256 }
 0x38c   : > { %5869 = dma.done.wait (%p7465_p10), [#allocation25], 2048   ;;  %p7466_p7 = pmov %p7461_p0 }
 0x38d   : > { %p7467_p1 = pmov %p7461_p0 }
 0x38e   : > { %5871 = vsyncadd (%p7466_p7), [#allocation25], 4294965248 }
 0x38f   : > { %5873 = dma.done.wait (%p7467_p1), [#allocation28], 1040   ;;  %p7468_p13 = pmov %p7461_p0 }
 0x390   : > { %p7469_p11 = pmov %p7461_p0 }
 0x391   : > { %5875 = vsyncadd (%p7468_p13), [#allocation28], 4294966256 }
 0x392   : > { %5877 = dma.done.wait (%p7469_p11), [#allocation31], 32   ;;  %p7470_p2 = pmov %p7461_p0 }
 0x393   : > { %p7471_p5 = pmov %p7461_p0 }
 0x394   : > { %5879 = vsyncadd (%p7470_p2), [#allocation31], 4294967264 }
 0x395   : > { %5881 = dma.done.wait (%p7471_p5), [#allocation34], 2064   ;;  %p7472_p12 = pmov %p7461_p0 }
 0x396   : > { %p7473_p4 = pmov %p7461_p0 }
 0x397   : > { %5883 = vsyncadd (%p7472_p12), [#allocation34], 4294965232 }
 0x398   : > { %5885 = dma.done.wait (%p7473_p4), [#allocation37], 2080   ;;  %p7474_p6 = pmov %p7461_p0 }
 0x39a   : > { %5887 = vsyncadd (%p7474_p6), [#allocation37], 4294965216 }
 0x39b   : > { %5889 = dma.done.wait (%p7461_p0), [#allocation40], 32   ;;  %p7475_p8 = pmov %p7461_p0 }
 0x39c   : > { %p7476_p9 = pmov %p7461_p0 }
 0x39d   : > { %5891 = vsyncadd (%p7475_p8), [#allocation40], 4294967264 }
 0x39e   : > { %5893 = dma.done.wait (%p7476_p9), [#allocation43], 32   ;;  %p7477_p3 = pmov %p7461_p0 }
 0x39f   : > { %p7478_p10 = pmov %p7461_p0 }
 0x3a0   : > { %5895 = vsyncadd (%p7477_p3), [#allocation43], 4294967264 }
 0x3a1   : > { %5897 = dma.done.wait (%p7478_p10), [#allocation46], 32   ;;  %p7479_p7 = pmov %p7461_p0 }
 0x3a2   : > { %p7480_p1 = pmov %p7461_p0 }
 0x3a3   : > { %5899 = vsyncadd (%p7479_p7), [#allocation46], 4294967264 }
 0x3a4   : > { %5901 = dma.done.wait (%p7480_p1), [#allocation49], 16   ;;  %p7481_p13 = pmov %p7461_p0 }
 0x3a5   : > { %s7482_s1 = sld [smem:[#allocation69_spill]]  ;;  %s7483_s9 = sld [smem:[#allocation74_spill]] }
 0x3a6   : > { %5903 = vsyncadd (%p7481_p13), [#allocation49], 4294967280 }
 0x3ab   : > { %s1260_s8 = sand.u32 1, %s7482_s1   ;;  %p3940_p11 = scmp.ne.s32.totalorder %s7483_s9, 0 }
 0x3ac   : > { %s6945_s2 = sshll.u32 %s1260_s8, 3  ;;  %v4838_v0 = vld [vmem:[#allocation12] sm:$0xff] (!%p3940_p11)   ;;  %v5984_v1 = vmov (!%p3940_p11), 0.0   ;;  %v4840_v3 = vld [vmem:[#allocation12 + $0x8] sm:$0xff] (!%p3940_p11)   ;;  %vm5985_vm0 = vmmov (!%p3940_p11), 0   ;;  %v4842_v5 = vld [vmem:[#allocation12 + $0x10] sm:$0xff] (!%p3940_p11)  }
 0x3ad   : > { %s1262_s12 = scalar_lea.vmem [#allocation50], %s6945_s2  ;;  %1267 = sbr.rel (%p3940_p11) target bundleno = 1225 (0x4c9), region = 248  ;;  %4202 = vmatprep.subr.bf16.mxu0 (!%p3940_p11), %v5984_v1  ;;  %4222 = vmatprep.subr.bf16.mxu1 (!%p3940_p11), %v5984_v1  ;;  %v4839_v2 = vld [vmem:[#allocation14] sm:$0xff] (!%p3940_p11)   ;;  %v4841_v4 = vld [vmem:[#allocation14 + $0x8] sm:$0xff] (!%p3940_p11)   ;;  %v4843_v6 = vld [vmem:[#allocation14 + $0x10] sm:$0xff] (!%p3940_p11)  }
 0x3ae   : > { %4203 = vmatpush3.bf16.msra.mxu0 (!%p3940_p11), %v4838_v0  ;;  %4218 = vmatprep.mubr.msk.bf16.mxu0 (!%p3940_p11), %vm5985_vm0, %v5984_v1  ;;  %v4844_v7 = vld [vmem:[#allocation12 + $0x18] sm:$0xff] (!%p3940_p11)   ;;  %v4846_v9 = vld [vmem:[#allocation12 + $0x20] sm:$0xff] (!%p3940_p11)   ;;  %v4848_v11 = vld [vmem:[#allocation12 + $0x28] sm:$0xff] (!%p3940_p11)  }
 0x3af   : > { %4223 = vmatpush3.bf16.msra.mxu1 (!%p3940_p11), %v4839_v2  ;;  %4204 = vmatprep.subr.bf16.mxu0 (!%p3940_p11), %v5984_v1  ;;  %v4845_v8 = vld [vmem:[#allocation14 + $0x18] sm:$0xff] (!%p3940_p11)   ;;  %v4847_v10 = vld [vmem:[#allocation14 + $0x20] sm:$0xff] (!%p3940_p11)   ;;  %v4849_v12 = vld [vmem:[#allocation14 + $0x28] sm:$0xff] (!%p3940_p11)  }
 0x3b0   : > { %4224 = vmatprep.subr.bf16.mxu1 (!%p3940_p11), %v5984_v1  ;;  %4238 = vmatprep.mubr.msk.bf16.mxu1 (!%p3940_p11), %vm5985_vm0, %v5984_v1  ;;  %v4850_v13 = vld [vmem:[#allocation12 + $0x30] sm:$0xff] (!%p3940_p11)   ;;  %v4852_v15 = vld [vmem:[#allocation12 + $0x38] sm:$0xff] (!%p3940_p11)   ;;  %v4854_v20 = vld [vmem:[#allocation24] sm:$0xff] (!%p3940_p11)  }
 0x3b1   : > { %v4851_v14 = vld [vmem:[#allocation14 + $0x30] sm:$0xff] (!%p3940_p11)   ;;  %v1269_v17 = vld [vmem:[%s6874_s15 + $0x8] sm:$0xff] (!%p3940_p11)  ;;  %v4860_v26 = vld [vmem:[#allocation24 + $0x18] sm:$0xff] (!%p3940_p11)  }
 0x3b2   : > { %4205 = vmatpush3.bf16.msra.mxu0 (!%p3940_p11), %v4840_v3  ;;  %v1268_v16 = vld [vmem:[%s6874_s15] sm:$0xff] (!%p3940_p11)  ;;  %v4853_v18 = vld [vmem:[#allocation14 + $0x38] sm:$0xff] (!%p3940_p11)   ;;  %v4855_v21 = vld [vmem:[#allocation26] sm:$0xff] (!%p3940_p11)  }
 0x3b3   : > { %4225 = vmatpush3.bf16.msra.mxu1 (!%p3940_p11), %v4841_v4  ;;  %4206 = vmatprep.subr.bf16.mxu0 (!%p3940_p11), %v5984_v1  ;;  %v1270_v19 = vpack.c.bf16 (!%p3940_p11), %v1269_v17, %v1268_v16  ;;  %v4856_v22 = vld [vmem:[#allocation24 + $0x8] sm:$0xff] (!%p3940_p11)   ;;  %v4858_v24 = vld [vmem:[#allocation24 + $0x10] sm:$0xff] (!%p3940_p11)   ;;  %v4861_v27 = vld [vmem:[#allocation26 + $0x18] sm:$0xff] (!%p3940_p11)  }
 0x3b4   : > { %4226 = vmatprep.subr.bf16.mxu1 %v5984_v1  ;;  %v4857_v23 = vld [vmem:[#allocation26 + $0x8] sm:$0xff]   ;;  %v4859_v25 = vld [vmem:[#allocation26 + $0x10] sm:$0xff]   ;;  %v4862_v28 = vld [vmem:[#allocation24 + $0x20] sm:$0xff]  }
 0x3b5   : > { %v4863_v29 = vld [vmem:[#allocation26 + $0x20] sm:$0xff]   ;;  %v4864_v30 = vld [vmem:[#allocation24 + $0x28] sm:$0xff]   ;;  %v4866_v32 = vld [vmem:[#allocation24 + $0x30] sm:$0xff]  }
 0x3b6   : > { %4207 = vmatpush3.bf16.msra.mxu0 %v4842_v5  ;;  %v4865_v31 = vld [vmem:[#allocation26 + $0x28] sm:$0xff]   ;;  %v4867_v33 = vld [vmem:[#allocation26 + $0x30] sm:$0xff]   ;;  %v4868_v34 = vld [vmem:[#allocation24 + $0x38] sm:$0xff]  }
 0x3b7   : > { %4227 = vmatpush3.bf16.msra.mxu1 %v4843_v6  ;;  %4208 = vmatprep.subr.bf16.mxu0 %v5984_v1  ;;  %v1271_v35 = vld [vmem:[%s1081_s20] sm:$0xff]  ;;  %v1272_v36 = vld [vmem:[%s1081_s20 + $0x8] sm:$0xff] }
 0x3b8   : > { %4228 = vmatprep.subr.bf16.mxu1 %v5984_v1  ;;  %v4869_v37 = vld [vmem:[#allocation26 + $0x38] sm:$0xff]   ;;  %v1273_v38 = vpack.c.bf16 %v1272_v36, %v1271_v35  ;;  %v3959_v55 = vld [vmem:[#allocation30] ss:$0 sm:$0xff]  ;;  %v3968_v57 = vld [vmem:[#allocation32] ss:$0 sm:$0xff] }
 0x3b9   : > { %v3941_v39 = vld [vmem:[#allocation18] ss:$0 sm:$0xff]  ;;  %v3950_v40 = vld [vmem:[#allocation20] ss:$0 sm:$0xff] }
 0x3ba   : > { %4209 = vmatpush3.bf16.msra.mxu0 %v4844_v7 }
 0x3bb   : > { %4229 = vmatpush3.bf16.msra.mxu1 %v4845_v8  ;;  %4210 = vmatprep.subr.bf16.mxu0 %v5984_v1 }
 0x3bc   : > { %4230 = vmatprep.subr.bf16.mxu1 %v5984_v1 }
 0x3be   : > { %4211 = vmatpush3.bf16.msra.mxu0 %v4846_v9 }
 0x3bf   : > { %4231 = vmatpush3.bf16.msra.mxu1 %v4847_v10  ;;  %4212 = vmatprep.subr.bf16.mxu0 %v5984_v1 }
 0x3c0   : > { %4232 = vmatprep.subr.bf16.mxu1 %v5984_v1 }
 0x3c2   : > { %4213 = vmatpush3.bf16.msra.mxu0 %v4848_v11 }
 0x3c3   : > { %4233 = vmatpush3.bf16.msra.mxu1 %v4849_v12  ;;  %4214 = vmatprep.subr.bf16.mxu0 %v5984_v1 }
 0x3c4   : > { %4234 = vmatprep.subr.bf16.mxu1 %v5984_v1 }
 0x3c6   : > { %4215 = vmatpush3.bf16.msra.mxu0 %v4850_v13 }
 0x3c7   : > { %4235 = vmatpush3.bf16.msra.mxu1 %v4851_v14  ;;  %4216 = vmatprep.subr.bf16.mxu0 %v5984_v1 }
 0x3c8   : > { %4236 = vmatprep.subr.bf16.mxu1 %v5984_v1 }
 0x3ca   : > { %4217 = vmatpush3.bf16.msra.mxu0 %v4852_v15 }
 0x3cb   : > { %4237 = vmatpush3.bf16.msra.mxu1 %v4853_v18  ;;  %4242 = vmatprep.subr.bf16.mxu0 %v5984_v1 }
 0x3cc   : > { %4262 = vmatprep.subr.bf16.mxu1 %v5984_v1 }
 0x3cd   : > { %4219 = vmatmul.mubr.bf16.vlgmr.msra.gmra.mrb[0].mxu0 %v1270_v19 }
 0x3ce   : > { %4239 = vmatmul.mubr.bf16.vlgmr.msra.gmra.mrb[0].mxu1 %v1270_v19  ;;  %4243 = vmatpush3.bf16.msra.mxu0 %v4854_v20 }
 0x3cf   : > { %4263 = vmatpush3.bf16.msra.mxu1 %v4855_v21  ;;  %4244 = vmatprep.subr.bf16.mxu0 %v5984_v1 }
 0x3d0   : > { %4264 = vmatprep.subr.bf16.mxu1 %v5984_v1  ;;  %4258 = vmatprep.mubr.msk.bf16.mxu0 %vm5985_vm0, %v5984_v1 }
 0x3d1   : > { %4278 = vmatprep.mubr.msk.bf16.mxu1 %vm5985_vm0, %v5984_v1 }
 0x3d2   : > { %4245 = vmatpush3.bf16.msra.mxu0 %v4856_v22 }
 0x3d3   : > { %4265 = vmatpush3.bf16.msra.mxu1 %v4857_v23  ;;  %4246 = vmatprep.subr.bf16.mxu0 %v5984_v1 }
 0x3d4   : > { %4266 = vmatprep.subr.bf16.mxu1 %v5984_v1 }
 0x3d6   : > { %4247 = vmatpush3.bf16.msra.mxu0 %v4858_v24 }
 0x3d7   : > { %4267 = vmatpush3.bf16.msra.mxu1 %v4859_v25  ;;  %4248 = vmatprep.subr.bf16.mxu0 %v5984_v1 }
 0x3d8   : > { %4268 = vmatprep.subr.bf16.mxu1 %v5984_v1 }
 0x3da   : > { %4249 = vmatpush3.bf16.msra.mxu0 %v4860_v26 }
 0x3db   : > { %4269 = vmatpush3.bf16.msra.mxu1 %v4861_v27  ;;  %4250 = vmatprep.subr.bf16.mxu0 %v5984_v1 }
 0x3dc   : > { %4270 = vmatprep.subr.bf16.mxu1 %v5984_v1 }
 0x3de   : > { %4251 = vmatpush3.bf16.msra.mxu0 %v4862_v28 }
 0x3df   : > { %4271 = vmatpush3.bf16.msra.mxu1 %v4863_v29  ;;  %4252 = vmatprep.subr.bf16.mxu0 %v5984_v1 }
 0x3e0   : > { %4272 = vmatprep.subr.bf16.mxu1 %v5984_v1 }
 0x3e2   : > { %4253 = vmatpush3.bf16.msra.mxu0 %v4864_v30 }
 0x3e3   : > { %4273 = vmatpush3.bf16.msra.mxu1 %v4865_v31  ;;  %4254 = vmatprep.subr.bf16.mxu0 %v5984_v1 }
 0x3e4   : > { %4274 = vmatprep.subr.bf16.mxu1 %v5984_v1 }
 0x3e6   : > { %4255 = vmatpush3.bf16.msra.mxu0 %v4866_v32 }
 0x3e7   : > { %4275 = vmatpush3.bf16.msra.mxu1 %v4867_v33  ;;  %4256 = vmatprep.subr.bf16.mxu0 %v5984_v1 }
 0x3e8   : > { %4276 = vmatprep.subr.bf16.mxu1 %v5984_v1 }
 0x3ea   : > { %4257 = vmatpush3.bf16.msra.mxu0 %v4868_v34 }
 0x3eb   : > { %4277 = vmatpush3.bf16.msra.mxu1 %v4869_v37 }
 0x3ed   : > { %4259 = vmatmul.mubr.bf16.vlgmr.msra.gmra.mrb[4].mxu0 %v1273_v38 }
 0x3ee   : > { %4279 = vmatmul.mubr.bf16.vlgmr.msra.gmra.mrb[4].mxu1 %v1273_v38 }
 0x4a0   : > { %v1379_v41 = vpop.f32.mrb[0].mxu0 }
 0x4a1   : > { %v1380_v42 = vadd.f32 %v3941_v39, %v1379_v41  ;;  %v1493_v43 = vpop.f32.mrb[0].mxu1  ;;  %v4220_v44 = vpop.f32.mrb[1].mxu0 }
 0x4a2   : > { %v1494_v45 = vadd.f32 %v3950_v40, %v1493_v43  ;;  %v4240_v46 = vpop.f32.mrb[1].mxu1  ;;  %v1382_v47 = vpop.f32.mrb[2].mxu0 }
 0x4a3   : > { %v1383_v48 = vadd.f32 %v3941_v39, %v1382_v47  ;;  %v1496_v49 = vpop.f32.mrb[2].mxu1  ;;  %v4221_v50 = vpop.f32.mrb[3].mxu0 }
 0x4a4   : > { %v1497_v51 = vadd.f32 %v3950_v40, %v1496_v49  ;;  %v4241_v52 = vpop.f32.mrb[3].mxu1 }
 0x4a5   : > { %v1386_v53 = vpack.c.bf16 %v1383_v48, %v1380_v42 }
 0x4a6   : > { %v1500_v54 = vpack.c.bf16 %v1497_v51, %v1494_v45 }
 0x4a7   : > { %1387 = vst [vmem:[#allocation2] sm:$0xff] %v1386_v53 }
 0x4a8   : > { %1501 = vst [vmem:[#allocation3] sm:$0xff] %v1500_v54 }
 0x4c0   : > { %v1607_v56 = vpop.f32.mrb[4].mxu0 }
 0x4c1   : > { %v1721_v58 = vpop.f32.mrb[4].mxu1  ;;  %v4260_v59 = vpop.f32.mrb[5].mxu0  ;;  %v1608_v62 = vadd.f32 %v3959_v55, %v1607_v56 }
 0x4c2   : > { %v4280_v60 = vpop.f32.mrb[5].mxu1  ;;  %v1610_v61 = vpop.f32.mrb[6].mxu0  ;;  %v1722_v2 = vadd.f32 %v3968_v57, %v1721_v58 }
 0x4c3   : > { %v1611_v63 = vadd.f32 %v3959_v55, %v1610_v61  ;;  %v1724_v0 = vpop.f32.mrb[6].mxu1  ;;  %v4261_v1 = vpop.f32.mrb[7].mxu0 }
 0x4c4   : > { %v1725_v3 = vadd.f32 %v3968_v57, %v1724_v0  ;;  %v4281_v4 = vpop.f32.mrb[7].mxu1 }
 0x4c5   : > { %v1614_v5 = vpack.c.bf16 %v1611_v63, %v1608_v62 }
 0x4c6   : > { %v1728_v6 = vpack.c.bf16 %v1725_v3, %v1722_v2 }
 0x4c7   : > { %1615 = vst [vmem:[#allocation4] sm:$0xff] %v1614_v5 }
 0x4c8   : > { %1729 = vst [vmem:[#allocation5] sm:$0xff] %v1728_v6 }
 0x4c9 PF: > { %v4870_v7 = vld [vmem:[#allocation11] sm:$0xff]   ;;  %s7484_s21 = sld [smem:[#allocation74_spill]]  ;;  %v5986_v8 = vmov 0.0   ;;  %v4871_v9 = vld [vmem:[#allocation11 + $0x8] sm:$0xff]   ;;  %vm5987_vm1 = vmmov 0   ;;  %v4872_v10 = vld [vmem:[#allocation11 + $0x10] sm:$0xff]  }
 0x4ca   : > { %4282 = vmatprep.subr.bf16.mxu0 %v5986_v8  ;;  %4302 = vmatprep.subr.bf16.mxu1 %v5986_v8  ;;  %vm1848_vm2 = vcmask 261120   ;;  %v4873_v11 = vld [vmem:[#allocation11 + $0x18] sm:$0xff]   ;;  %v7004_v12 = vld [vmem:[#allocation2] sm:$0xff]  ;;  %v4875_v15 = vld [vmem:[#allocation11 + $0x28] sm:$0xff]   ;;  %s5988_s11 = smov 96   ;;  %vm1896_vm3 = vcmask 130048  }
 0x4cb   : > { %4283 = vmatpush3.bf16.msra.mxu0 %v4870_v7  ;;  %4298 = vmatprep.mubr.msk.bf16.mxu0 %vm5987_vm1, %v5986_v8  ;;  %v1853_v13 = vsel %vm1848_vm2, %v7004_v12, 0  ;;  %v4874_v14 = vld [vmem:[#allocation11 + $0x20] sm:$0xff]   ;;  %v4876_v16 = vld [vmem:[#allocation11 + $0x30] sm:$0xff]   ;;  %v4877_v17 = vld [vmem:[#allocation11 + $0x38] sm:$0xff]   ;;  %s5989_s17 = smov 64   ;;  %s5990_s13 = smov 32  }
 0x4cc   : > { %4284 = vmatprep.subr.bf16.mxu0 %v5986_v8  ;;  %4304 = vmatprep.mubr.msk.bf16.mxu1 %vm5987_vm1, %v5986_v8  ;;  %v3978_v20 = vld [vmem:[#allocation17] ss:$0 sm:$0xff]  ;;  %v7034_v38 = vld [vmem:[#allocation3] sm:$0xff]  ;;  %vm2295_vm4 = vcmask 523264   ;;  %vm2297_vm5 = vcmask 785408   ;;  %s7485_s5 = sld [smem:[#allocation75_spill]] }
 0x4cd   : > { %4303 = vmatpush3.bf16.xpose.msra.mxu1 %v1853_v13  ;;  %1956 = vrot.lane.b32.xlu1 %v7004_v12, %s5988_s11  ;;  %s3519_s0 = sshll.u32 %s1262_s12, 4  ;;  %s7487_s20 = sld [smem:[#allocation108_spill]]  ;;  %s7195_s0 = int_to_ptr.vmem [resolvable:$true] %s3519_s0 }
 0x4ce   : > { %4308 = vmatprep.subr.bf16.mxu1 %v5986_v8  ;;  %s3504_s9 = scalar_lea.sflag [#allocation8], %s1260_s8  ;;  %p7488_p5 = scmp.ne.s32.totalorder %s7443_s7, 0 }
 0x4cf   : > { %4285 = vmatpush3.bf16.msra.mxu0 %v4871_v9  ;;  %s3977_s18 = sshll.u32 %s7484_s21, 3 }
 0x4d0   : > { %4286 = vmatprep.subr.bf16.mxu0 %v5986_v8  ;;  %s1731_s10 = scalar_lea.vmem %s6874_s15, %s3977_s18 [#allocation6]  ;;  %s5992_s18 = smov [#allocation50]  }
 0x4d1   : > { %v7014_v18 = vld [vmem:[%s1731_s10] sm:$0xff]  ;;  %s5772_s10 = sshll.u32 %s5992_s18, 4  ;;  %s5773_s10 = int_to_ptr.vmem [resolvable:$false] %s5772_s10 }
 0x4d2   : > { %v1733_v19 = vpack.c.bf16 %v7014_v18, %v7014_v18  ;;  %s4070_s30 = sshll.u32 %s7485_s5, 1  ;;  %p5775_p6 = scmp.lt.s32.totalorder %s7195_s0, %s5773_s10 }
 0x4d3   : > { %4287 = vmatpush3.bf16.msra.mxu0 %v4872_v10  ;;  %s3515_s3 = sadd.s32 %s7484_s21, %s4070_s30  ;;  %s5768_s21 = scalar_lea.vmem %s7195_s0, 128 }
 0x4d4   : > { %4288 = vmatprep.subr.bf16.mxu0 %v5986_v8  ;;  %s4071_s15 = sshll.u32 %s3515_s3, 7  ;;  %p5769_p2 = scmp.ne.s32.totalorder %s7195_s0, %s5768_s21 }
 0x4d5   : > { %s7193_s1 = scalar_lea.hbm %s7487_s20, %s4071_s15 }
 0x4d6   : > { %p5770_p12 = pnand %p5769_p2, %p7488_p5 }
 0x4d7   : > { %4289 = vmatpush3.bf16.msra.mxu0 %v4873_v11 }
 0x4d8   : > { %4290 = vmatprep.subr.bf16.mxu0 %v5986_v8  ;;  %p5771_p4 = pneg %p5770_p12 }
 0x4db   : > { %4291 = vmatpush3.bf16.msra.mxu0 %v4874_v14 }
 0x4dc   : > { %4292 = vmatprep.subr.bf16.mxu0 %v5986_v8 }
 0x4df   : > { %4293 = vmatpush3.bf16.msra.mxu0 %v4875_v15 }
 0x4e0   : > { %4294 = vmatprep.subr.bf16.mxu0 %v5986_v8 }
 0x4e3   : > { %4295 = vmatpush3.bf16.msra.mxu0 %v4876_v16 }
 0x4e4   : > { %4296 = vmatprep.subr.bf16.mxu0 %v5986_v8 }
 0x4e7   : > { %4297 = vmatpush3.bf16.msra.mxu0 %v4877_v17 }
 0x4e8   : > { %4350 = vmatprep.subr.bf16.mxu0 %v5986_v8 }
 0x4ea   : > { %4299 = vmatmul.mubr.bf16.vlgmr.msra.gmra.mrb[0].mxu0 %v1733_v19 }
 0x4eb   : > { %4366 = vmatprep.mubr.msk.bf16.mxu0 %vm5987_vm1, %v5986_v8 }
 0x53f   : > { %v1957_v42 = vpop.permute.xlu1 %1956 }
 0x540   : > { %v1962_v43 = vsel %vm1848_vm2, %v1957_v42, 0 }
 0x5bd   : > { %v1839_v21 = vpop.f32.mrb[0].mxu0 }
 0x5be   : > { %v1840_v22 = vadd.f32 %v3978_v20, %v1839_v21  ;;  %v4300_v23 = vpop.f32.mrb[1].mxu0 }
 0x5bf   : > { %v1842_v24 = vpop.f32.mrb[2].mxu0 }
 0x5c0   : > { %v7024_v25 = vpack.c.bf16 %v1840_v22, %v1840_v22  ;;  %v4301_v26 = vpop.f32.mrb[3].mxu0 }
 0x5c2   : > { %1953 = vrot.lane.b32.xlu1 %v7024_v25, %s5988_s11  ;;  %4305 = vmatmul.mubr.msk.bf16.vlgmr.msra.gmra.mrb[0].mxu1 %vm1848_vm2, %v7024_v25 }
 0x5c3   : > { %4310 = vmatprep.mubr.msk.bf16.mxu1 %vm5987_vm1, %v5986_v8  ;;  %4309 = vmatpush3.bf16.msra.mxu1 %v7034_v38 }
 0x5c4   : > { %4314 = vmatprep.subr.bf16.mxu1 %v5986_v8 }
 0x634   : > { %v1954_v45 = vpop.permute.xlu1 %1953 }
 0x695   : > { %v1889_v27 = vpop.f32.mrb[0].mxu1 }
 0x696   : > { %v1895_v28 = vmul.f32 0.17677669, %v1889_v27  ;;  %v4306_v29 = vpop.f32.mrb[1].mxu1 }
 0x697   : > { %v1892_v30 = vpop.f32.mrb[2].mxu1 }
 0x698   : > { %v4307_v31 = vpop.f32.mrb[3].mxu1  ;;  %v1897_v32 = vsel %vm1896_vm3, %v1895_v28, -inf }
 0x699   : > { %1898 = vmax.xlane.f32.xlu0 %v1897_v32 }
 0x726   : > { %v1899_v33 = vpop.xlane.xlu0 %1898 }
 0x727   : > { %v1900_v34 = vsub.f32 %v1895_v28, %v1899_v33 }
 0x729   : > { %v1901_v35 = vmul.f32 1.442695, %v1900_v34 }
 0x72b   : > { %4942 = vpow2.f32 %v1901_v35 }
 0x735   : > { %v4943_v36 = vpop.eup %4942 }
 0x736   : > { %v1903_v37 = vsel %vm1896_vm3, %v4943_v36, 0.0 }
 0x737   : > { %1904 = vadd.xlane.f32.xlu0 %v1903_v37 }
 0x7c4   : > { %v1905_v39 = vpop.xlane.xlu0 %1904 }
 0x7c5   : > { %4944 = vrcp.f32 %v1905_v39 }
 0x7cf   : > { %v4945_v40 = vpop.eup %4944 }
 0x7d0   : > { %v1907_v41 = vmul.f32 %v4945_v40, %v4943_v36 }
 0x7d2   : > { %v1908_v44 = vpack.c.bf16 %v1907_v41, %v1907_v41 }
 0x7d4   : > { %4311 = vmatmul.mubr.msk.bf16.vlgmr.msra.gmra.mrb[4].mxu1 %vm1896_vm3, %v1908_v44 }
 0x7d5   : > { %4315 = vmatpush3.bf16.xpose.msra.mxu1 %v1962_v43  ;;  %4316 = vmatprep.mubr.msk.bf16.mxu1 %vm5987_vm1, %v5986_v8 }
 0x7d6   : > { %4320 = vmatprep.subr.bf16.mxu1 %v5986_v8 }
 0x7dc   : > { %4317 = vmatmul.mubr.msk.bf16.vlgmr.msra.gmra.mrb[8].mxu1 %vm1848_vm2, %v1954_v45 }
 0x7dd   : > { %4322 = vmatprep.mubr.msk.bf16.mxu1 %vm5987_vm1, %v5986_v8 }
 0x8a7   : > { %v7046_v46 = vpop.f32.mrb[4].mxu1 }
 0x8a8   : > { %v4312_v47 = vpop.f32.mrb[5].mxu1 }
 0x8a9   : > { %v1949_v48 = vpop.f32.mrb[6].mxu1 }
 0x8aa   : > { %v4313_v49 = vpop.f32.mrb[7].mxu1 }
 0x8af   : > { %v1998_v50 = vpop.f32.mrb[8].mxu1 }
 0x8b0   : > { %v2004_v51 = vmul.f32 0.17677669, %v1998_v50  ;;  %v4318_v52 = vpop.f32.mrb[9].mxu1 }
 0x8b1   : > { %v2001_v53 = vpop.f32.mrb[10].mxu1  ;;  %v4879_v52 = vld [vmem:[#allocation15 + $0x8] sm:$0xff]  }
 0x8b2   : > { %v4319_v54 = vpop.f32.mrb[11].mxu1  ;;  %v2005_v55 = vsel %vm1896_vm3, %v2004_v51, -inf  ;;  %v4880_v53 = vld [vmem:[#allocation15 + $0x10] sm:$0xff]  }
 0x8b3   : > { %2006 = vmax.xlane.f32.xlu0 %v2005_v55  ;;  %v4881_v54 = vld [vmem:[#allocation15 + $0x18] sm:$0xff]   ;;  %v4882_v55 = vld [vmem:[#allocation15 + $0x20] sm:$0xff]  }
 0x8c9   : > { %2018 = vrot.lane.b32.xlu0 %v7034_v38, %s5988_s11 }
 0x8cd   : > { %2066 = vrot.lane.b32.xlu0 %v7004_v12, %s5989_s17 }
 0x8d1   : > { %2064 = vrot.lane.b32.xlu0 %v7024_v25, %s5989_s17 }
 0x940   : > { %v2007_v56 = vpop.xlane.xlu0 %2006 }
 0x941   : > { %v2008_v57 = vsub.f32 %v2004_v51, %v2007_v56  ;;  %v4878_v51 = vld [vmem:[#allocation15] sm:$0xff]   ;;  %v4883_v56 = vld [vmem:[#allocation15 + $0x28] sm:$0xff]  }
 0x942   : > { %4351 = vmatpush3.bf16.msra.mxu0 %v4878_v51 }
 0x943   : > { %v2009_v58 = vmul.f32 1.442695, %v2008_v57  ;;  %4352 = vmatprep.subr.bf16.mxu0 %v5986_v8  ;;  %v4884_v57 = vld [vmem:[#allocation15 + $0x30] sm:$0xff]  }
 0x944   : > { %v2019_v59 = vpop.permute.xlu0 %2018 }
 0x945   : > { %4946 = vpow2.f32 %v2009_v58  ;;  %4321 = vmatpush3.bf16.msra.mxu1 %v2019_v59  ;;  %v4885_v58 = vld [vmem:[#allocation15 + $0x38] sm:$0xff]  }
 0x946   : > { %4326 = vmatprep.subr.bf16.mxu1 %v5986_v8  ;;  %4353 = vmatpush3.bf16.msra.mxu0 %v4879_v52 }
 0x947   : > { %4354 = vmatprep.subr.bf16.mxu0 %v5986_v8 }
 0x948   : > { %v2067_v1 = vpop.permute.xlu0 %2066 }
 0x949   : > { %v2072_v2 = vsel %vm1848_vm2, %v2067_v1, 0 }
 0x94a   : > { %4355 = vmatpush3.bf16.msra.mxu0 %v4880_v53 }
 0x94b   : > { %4356 = vmatprep.subr.bf16.mxu0 %v5986_v8 }
 0x94c   : > { %v2065_v4 = vpop.permute.xlu0 %2064 }
 0x94e   : > { %4357 = vmatpush3.bf16.msra.mxu0 %v4881_v54 }
 0x94f   : > { %v4947_v60 = vpop.eup %4946  ;;  %4358 = vmatprep.subr.bf16.mxu0 %v5986_v8 }
 0x950   : > { %v2011_v61 = vsel %vm1896_vm3, %v4947_v60, 0.0 }
 0x951   : > { %2012 = vadd.xlane.f32.xlu1 %v2011_v61 }
 0x952   : > { %4359 = vmatpush3.bf16.msra.mxu0 %v4882_v55 }
 0x953   : > { %4360 = vmatprep.subr.bf16.mxu0 %v5986_v8 }
 0x956   : > { %4361 = vmatpush3.bf16.msra.mxu0 %v4883_v56 }
 0x957   : > { %4362 = vmatprep.subr.bf16.mxu0 %v5986_v8 }
 0x95a   : > { %4363 = vmatpush3.bf16.msra.mxu0 %v4884_v57 }
 0x95b   : > { %4364 = vmatprep.subr.bf16.mxu0 %v5986_v8 }
 0x95e   : > { %4365 = vmatpush3.bf16.msra.mxu0 %v4885_v58 }
 0x95f   : > { %4390 = vmatprep.subr.bf16.mxu0 %v5986_v8 }
 0x962   : > { %2127 = vrot.lane.b32.xlu1 %v7034_v38, %s5989_s17 }
 0x9de   : > { %v2013_v62 = vpop.xlane.xlu1 %2012 }
 0x9df   : > { %4948 = vrcp.f32 %v2013_v62 }
 0x9e2   : > { %v2128_v17 = vpop.permute.xlu1 %2127 }
 0x9e9   : > { %v4949_v63 = vpop.eup %4948 }
 0x9ea   : > { %v2015_v0 = vmul.f32 %v4949_v63, %v4947_v60 }
 0x9ec   : > { %v2016_v3 = vpack.c.bf16 %v2015_v0, %v2015_v0 }
 0x9ee   : > { %4323 = vmatmul.mubr.msk.bf16.vlgmr.msra.gmra.mrb[12].mxu1 %vm1896_vm3, %v2016_v3 }
 0x9ef   : > { %4327 = vmatpush3.bf16.xpose.msra.mxu1 %v2072_v2  ;;  %4328 = vmatprep.mubr.msk.bf16.mxu1 %vm5987_vm1, %v5986_v8 }
 0x9f0   : > { %4332 = vmatprep.subr.bf16.mxu1 %v5986_v8 }
 0x9f6   : > { %4329 = vmatmul.mubr.msk.bf16.vlgmr.msra.gmra.mrb[16].mxu1 %vm1848_vm2, %v2065_v4 }
 0x9f7   : > { %4334 = vmatprep.mubr.msk.bf16.mxu1 %vm5987_vm1, %v5986_v8  ;;  %4333 = vmatpush3.bf16.msra.mxu1 %v2128_v17 }
 0x9f8   : > { %4338 = vmatprep.subr.bf16.mxu1 %v5986_v8 }
 0xac1   : > { %v2058_v5 = vpop.f32.mrb[12].mxu1 }
 0xac2   : > { %v4324_v6 = vpop.f32.mrb[13].mxu1 }
 0xac3   : > { %v2061_v7 = vpop.f32.mrb[14].mxu1  ;;  %v3995_v6 = vld [vmem:[#allocation21] ss:$0 sm:$0xff] }
 0xac4   : > { %v4325_v9 = vpop.f32.mrb[15].mxu1 }
 0xac9   : > { %v2108_v10 = vpop.f32.mrb[16].mxu1 }
 0xaca   : > { %v2114_v11 = vmul.f32 0.17677669, %v2108_v10  ;;  %v4330_v13 = vpop.f32.mrb[17].mxu1 }
 0xacb   : > { %v2111_v14 = vpop.f32.mrb[18].mxu1 }
 0xacc   : > { %v4331_v15 = vpop.f32.mrb[19].mxu1  ;;  %v2115_v16 = vsel %vm1896_vm3, %v2114_v11, -inf }
 0xacd   : > { %2116 = vmax.xlane.f32.xlu0 %v2115_v16  ;;  %v4887_v15 = vld [vmem:[#allocation23 + $0x8] sm:$0xff]  }
 0xb5a   : > { %v2117_v19 = vpop.xlane.xlu0 %2116 }
 0xb5b   : > { %v2118_v20 = vsub.f32 %v2114_v11, %v2117_v19 }
 0xb5d   : > { %v2119_v21 = vmul.f32 1.442695, %v2118_v20 }
 0xb5f   : > { %4950 = vpow2.f32 %v2119_v21  ;;  %v4888_v21 = vld [vmem:[#allocation23 + $0x10] sm:$0xff]  }
 0xb69   : > { %v4951_v22 = vpop.eup %4950 }
 0xb6a   : > { %v2121_v23 = vsel %vm1896_vm3, %v4951_v22, 0.0 }
 0xb6b   : > { %2122 = vadd.xlane.f32.xlu1 %v2121_v23  ;;  %v4891_v23 = vld [vmem:[#allocation23 + $0x28] sm:$0xff]  }
 0xb7c   : > { %2175 = vrot.lane.b32.xlu1 %v7004_v12, %s5990_s13 }
 0xb80   : > { %2173 = vrot.lane.b32.xlu1 %v7024_v25, %s5990_s13 }
 0xbf8   : > { %v2123_v24 = vpop.xlane.xlu1 %2122 }
 0xbf9   : > { %4952 = vrcp.f32 %v2123_v24  ;;  %v4892_v24 = vld [vmem:[#allocation23 + $0x30] sm:$0xff]  }
 0xbfc   : > { %v2176_v28 = vpop.permute.xlu1 %2175 }
 0xbfd   : > { %v2181_v29 = vsel %vm1848_vm2, %v2176_v28, 0 }
 0xc00   : > { %v2174_v12 = vpop.permute.xlu1 %2173 }
 0xc03   : > { %v4953_v26 = vpop.eup %4952 }
 0xc04   : > { %v2125_v27 = vmul.f32 %v4953_v26, %v4951_v22  ;;  %v4889_v22 = vld [vmem:[#allocation23 + $0x18] sm:$0xff]  }
 0xc05   : > { %v4893_v26 = vld [vmem:[#allocation23 + $0x38] sm:$0xff]  }
 0xc06   : > { %v2126_v30 = vpack.c.bf16 %v2125_v27, %v2125_v27  ;;  %v2554_v27 = vld [vmem:[#allocation4] sm:$0xff] }
 0xc07   : > { %v2560_v28 = vsel %vm1848_vm2, %v2554_v27, 0 }
 0xc08   : > { %4335 = vmatmul.mubr.msk.bf16.vlgmr.msra.gmra.mrb[20].mxu1 %vm1896_vm3, %v2126_v30 }
 0xc09   : > { %4339 = vmatpush3.bf16.xpose.msra.mxu1 %v2181_v29  ;;  %4340 = vmatprep.mubr.msk.bf16.mxu1 %vm5987_vm1, %v5986_v8 }
 0xc0a   : > { %4344 = vmatprep.subr.bf16.mxu1 %v5986_v8 }
 0xc10   : > { %4341 = vmatmul.mubr.msk.bf16.vlgmr.msra.gmra.mrb[24].mxu1 %vm1848_vm2, %v2174_v12 }
 0xc11   : > { %4346 = vmatprep.mubr.msk.bf16.mxu1 %vm5987_vm1, %v5986_v8 }
 0xcdb   : > { %v2167_v25 = vpop.f32.mrb[20].mxu1 }
 0xcdc   : > { %v4336_v31 = vpop.f32.mrb[21].mxu1 }
 0xcdd   : > { %v2170_v32 = vpop.f32.mrb[22].mxu1  ;;  %v4004_v31 = vld [vmem:[#allocation41] ss:$0 sm:$0xff] }
 0xcde   : > { %v4337_v33 = vpop.f32.mrb[23].mxu1 }
 0xcdf   : > { %v4005_v33 = vld [vmem:[#allocation42] ss:$0 sm:$0xff] }
 0xce3   : > { %v2217_v34 = vpop.f32.mrb[24].mxu1 }
 0xce4   : > { %v2223_v35 = vmul.f32 0.17677669, %v2217_v34  ;;  %v4342_v36 = vpop.f32.mrb[25].mxu1 }
 0xce5   : > { %v2220_v37 = vpop.f32.mrb[26].mxu1 }
 0xce6   : > { %v4343_v39 = vpop.f32.mrb[27].mxu1  ;;  %v2224_v40 = vsel %vm1896_vm3, %v2223_v35, -inf }
 0xce7   : > { %2225 = vmax.xlane.f32.xlu0 %v2224_v40  ;;  %v4006_v39 = vld [vmem:[#allocation29] ss:$0 sm:$0xff] }
 0xcfd   : > { %2236 = vrot.lane.b32.xlu0 %v7034_v38, %s5990_s13 }
 0xd01   : > { %2283 = vrot.lane.b32.xlu0 %v2058_v5, %s5990_s13 }
 0xd05   : > { %2287 = vrot.lane.b32.xlu0 %v2167_v25, %s5989_s17 }
 0xd74   : > { %v2226_v41 = vpop.xlane.xlu0 %2225 }
 0xd75   : > { %v2227_v42 = vsub.f32 %v2223_v35, %v2226_v41 }
 0xd77   : > { %v2228_v43 = vmul.f32 1.442695, %v2227_v42 }
 0xd78   : > { %v2237_v44 = vpop.permute.xlu0 %2236 }
 0xd79   : > { %4954 = vpow2.f32 %v2228_v43  ;;  %4345 = vmatpush3.bf16.msra.mxu1 %v2237_v44 }
 0xd7a   : > { %4370 = vmatprep.subr.bf16.mxu1 %v5986_v8 }
 0xd7c   : > { %v2284_v63 = vpop.permute.xlu0 %2283 }
 0xd7d   : > { %v2294_v1 = vsel %vm1848_vm2, %v7046_v46, %v2284_v63  ;;  %v4886_v46 = vld [vmem:[#allocation23] sm:$0xff]  }
 0xd80   : > { %v2288_v0 = vpop.permute.xlu0 %2287 }
 0xd81   : > { %v2296_v2 = vsel %vm2295_vm4, %v2294_v1, %v2288_v0 }
 0xd83   : > { %v4955_v45 = vpop.eup %4954 }
 0xd84   : > { %v2230_v47 = vsel %vm1896_vm3, %v4955_v45, 0.0 }
 0xd85   : > { %2231 = vadd.xlane.f32.xlu1 %v2230_v47 }
 0xe12   : > { %v2232_v48 = vpop.xlane.xlu1 %2231 }
 0xe13   : > { %4956 = vrcp.f32 %v2232_v48 }
 0xe1d   : > { %v4957_v49 = vpop.eup %4956 }
 0xe1e   : > { %v2234_v38 = vmul.f32 %v4957_v49, %v4955_v45 }
 0xe20   : > { %v2235_v50 = vpack.c.bf16 %v2234_v38, %v2234_v38 }
 0xe22   : > { %4347 = vmatmul.mubr.msk.bf16.vlgmr.msra.gmra.mrb[28].mxu1 %vm1896_vm3, %v2235_v50 }
 0xe23   : > { %4386 = vmatprep.mubr.msk.bf16.mxu1 %vm5987_vm1, %v5986_v8  ;;  %4371 = vmatpush3.bf16.msra.mxu1 %v4886_v46 }
 0xe24   : > { %4372 = vmatprep.subr.bf16.mxu1 %v5986_v8 }
 0xe27   : > { %4373 = vmatpush3.bf16.msra.mxu1 %v4887_v15 }
 0xe28   : > { %4374 = vmatprep.subr.bf16.mxu1 %v5986_v8 }
 0xe2b   : > { %4375 = vmatpush3.bf16.msra.mxu1 %v4888_v21 }
 0xe2c   : > { %4376 = vmatprep.subr.bf16.mxu1 %v5986_v8 }
 0xe2f   : > { %4377 = vmatpush3.bf16.msra.mxu1 %v4889_v22  ;;  %v2555_v22 = vld [vmem:[#allocation5] sm:$0xff] }
 0xe30   : > { %4378 = vmatprep.subr.bf16.mxu1 %v5986_v8 }
 0xef5   : > { %v2276_v59 = vpop.f32.mrb[28].mxu1 }
 0xef6   : > { %2291 = vrot.lane.b32.xlu0 %v2276_v59, %s5988_s11  ;;  %v4348_v60 = vpop.f32.mrb[29].mxu1 }
 0xef7   : > { %v2279_v61 = vpop.f32.mrb[30].mxu1 }
 0xef8   : > { %v4349_v62 = vpop.f32.mrb[31].mxu1 }
 0xf68   : > { %v2292_v3 = vpop.permute.xlu0 %2291 }
 0xf69   : > { %v2298_v4 = vsel %vm2297_vm5, %v2296_v2, %v2292_v3 }
 0xf6a   : > { %v2299_v5 = vpack.c.bf16 %v2298_v4, %v2298_v4 }
 0xf6c   : > { %4367 = vmatmul.mubr.bf16.vlgmr.msra.gmra.mrb[4].mxu0 %v2299_v5 }
 0xf6d   : > { %4392 = vmatprep.mubr.msk.bf16.mxu0 %vm5987_vm1, %v5986_v8  ;;  %4391 = vmatpush3.bf16.xpose.msra.mxu0 %v2560_v28 }
 0xf6e   : > { %4402 = vmatprep.subr.bf16.mxu0 %v5986_v8 }
0x103f   : > { %v2405_v7 = vpop.f32.mrb[4].mxu0 }
0x1040   : > { %v2406_v9 = vadd.f32 %v3995_v6, %v2405_v7  ;;  %v4368_v10 = vpop.f32.mrb[5].mxu0 }
0x1041   : > { %v2408_v11 = vpop.f32.mrb[6].mxu0 }
0x1042   : > { %v4369_v13 = vpop.f32.mrb[7].mxu0  ;;  %v2413_v14 = vadd.f32 %v2406_v9, %v7014_v18  ;;  %v4890_v18 = vld [vmem:[#allocation23 + $0x20] sm:$0xff]  }
0x1043   : > { %4379 = vmatpush3.bf16.msra.mxu1 %v4890_v18 }
0x1044   : > { %2414 = vadd.xlane.f32.xlu1 %v2413_v14  ;;  %4380 = vmatprep.subr.bf16.mxu1 %v5986_v8 }
0x1047   : > { %4381 = vmatpush3.bf16.msra.mxu1 %v4891_v23 }
0x1048   : > { %4382 = vmatprep.subr.bf16.mxu1 %v5986_v8 }
0x104b   : > { %4383 = vmatpush3.bf16.msra.mxu1 %v4892_v24 }
0x104c   : > { %4384 = vmatprep.subr.bf16.mxu1 %v5986_v8 }
0x104f   : > { %4385 = vmatpush3.bf16.msra.mxu1 %v4893_v26 }
0x1050   : > { %4396 = vmatprep.subr.bf16.mxu1 %v5986_v8 }
0x1055   : > { %2662 = vrot.lane.b32.xlu1 %v2554_v27, %s5988_s11 }
0x10d1   : > { %v2415_v16 = vpop.xlane.xlu1 %2414 }
0x10d2   : > { %v2417_v17 = vmul.f32 0.0078125, %v2415_v16 }
0x10d4   : > { %v2418_v19 = vsub.f32 %v2413_v14, %v2417_v17 }
0x10d5   : > { %v2663_v41 = vpop.permute.xlu1 %2662 }
0x10d6   : > { %v2419_v20 = vmul.f32 %v2418_v19, %v2418_v19  ;;  %v2668_v48 = vsel %vm1848_vm2, %v2663_v41, 0 }
0x10d8   : > { %2420 = vadd.xlane.f32.xlu0 %v2419_v20 }
0x10ee   : > { %2881 = vrot.lane.b32.xlu0 %v2554_v27, %s5990_s13 }
0x1165   : > { %v2421_v29 = vpop.xlane.xlu0 %2420 }
0x1166   : > { %v2422_v30 = vmul.f32 0.0078125, %v2421_v29 }
0x1168   : > { %v2423_v12 = vadd.f32 1e-05, %v2422_v30 }
0x1169   : > { %v2882_v51 = vpop.permute.xlu0 %2881 }
0x116a   : > { %4958 = vrsqrt.f32 %v2423_v12  ;;  %v2887_v52 = vsel %vm1848_vm2, %v2882_v51, 0 }
0x1174   : > { %v4959_v25 = vpop.eup %4958 }
0x1175   : > { %v2425_v32 = vmul.f32 %v4959_v25, %v2418_v19 }
0x1177   : > { %v2432_v34 = vmul.f32 %v4004_v31, %v2425_v32 }
0x1179   : > { %v2439_v35 = vadd.f32 %v4005_v33, %v2432_v34 }
0x117b   : > { %v7120_v36 = vmax.f32 %v2439_v35, 0.0 }
0x117d   : > { %v2441_v37 = vpack.c.bf16 %v7120_v36, %v7120_v36 }
0x117f   : > { %4387 = vmatmul.mubr.bf16.vlgmr.msra.gmra.mrb[32].mxu1 %v2441_v37 }
0x1180   : > { %4398 = vmatprep.mubr.msk.bf16.mxu1 %vm5987_vm1, %v5986_v8  ;;  %4397 = vmatpush3.bf16.msra.mxu1 %v2555_v22 }
0x1181   : > { %4408 = vmatprep.subr.bf16.mxu1 %v5986_v8 }
0x1252   : > { %v2547_v40 = vpop.f32.mrb[32].mxu1 }
0x1253   : > { %v2548_v42 = vadd.f32 %v4006_v39, %v2547_v40  ;;  %v4388_v43 = vpop.f32.mrb[33].mxu1 }
0x1254   : > { %v2550_v44 = vpop.f32.mrb[34].mxu1 }
0x1255   : > { %v2553_v45 = vpack.c.bf16 %v2548_v42, %v2548_v42  ;;  %v4389_v47 = vpop.f32.mrb[35].mxu1 }
0x1257   : > { %2659 = vrot.lane.b32.xlu1 %v2553_v45, %s5988_s11  ;;  %4393 = vmatmul.mubr.msk.bf16.vlgmr.msra.gmra.mrb[8].mxu0 %vm1848_vm2, %v2553_v45 }
0x1258   : > { %4403 = vmatpush3.bf16.xpose.msra.mxu0 %v2668_v48  ;;  %4404 = vmatprep.mubr.msk.bf16.mxu0 %vm5987_vm1, %v5986_v8 }
0x1259   : > { %4414 = vmatprep.subr.bf16.mxu0 %v5986_v8 }
0x125b   : > { %2772 = vrot.lane.b32.xlu1 %v2554_v27, %s5989_s17 }
0x125f   : > { %2770 = vrot.lane.b32.xlu1 %v2553_v45, %s5989_s17 }
0x1263   : > { %2879 = vrot.lane.b32.xlu1 %v2553_v45, %s5990_s13 }
0x12c9   : > { %v2660_v49 = vpop.permute.xlu1 %2659 }
0x12ca   : > { %4405 = vmatmul.mubr.msk.bf16.vlgmr.msra.gmra.mrb[12].mxu0 %vm1848_vm2, %v2660_v49 }
0x12cb   : > { %4416 = vmatprep.mubr.msk.bf16.mxu0 %vm5987_vm1, %v5986_v8 }
0x12cd   : > { %v2773_v38 = vpop.permute.xlu1 %2772 }
0x12ce   : > { %v2778_v50 = vsel %vm1848_vm2, %v2773_v38, 0 }
0x12cf   : > { %4415 = vmatpush3.bf16.xpose.msra.mxu0 %v2778_v50 }
0x12d0   : > { %4426 = vmatprep.subr.bf16.mxu0 %v5986_v8 }
0x12d1   : > { %v2771_v53 = vpop.permute.xlu1 %2770 }
0x12d5   : > { %v2880_v54 = vpop.permute.xlu1 %2879 }
0x12d6   : > { %4417 = vmatmul.mubr.msk.bf16.vlgmr.msra.gmra.mrb[16].mxu0 %vm1848_vm2, %v2771_v53 }
0x12d7   : > { %4427 = vmatpush3.bf16.xpose.msra.mxu0 %v2887_v52  ;;  %4428 = vmatprep.mubr.msk.bf16.mxu0 %vm5987_vm1, %v5986_v8 }
0x12d8   : > { %4438 = vmatprep.subr.bf16.mxu0 %v5986_v8 }
0x12de   : > { %4429 = vmatmul.mubr.msk.bf16.vlgmr.msra.gmra.mrb[20].mxu0 %vm1848_vm2, %v2880_v54 }
0x12df   : > { %4454 = vmatprep.mubr.msk.bf16.mxu0 %vm5987_vm1, %v5986_v8 }
0x132a   : > { %v2596_v55 = vpop.f32.mrb[8].mxu0 }
0x132b   : > { %v2602_v56 = vmul.f32 0.17677669, %v2596_v55  ;;  %v4394_v57 = vpop.f32.mrb[9].mxu0 }
0x132c   : > { %v2599_v58 = vpop.f32.mrb[10].mxu0 }
0x132d   : > { %v4395_v59 = vpop.f32.mrb[11].mxu0  ;;  %v2603_v60 = vsel %vm1896_vm3, %v2602_v56, -inf }
0x132e   : > { %2604 = vmax.xlane.f32.xlu1 %v2603_v60 }
0x139d   : > { %v2704_v61 = vpop.f32.mrb[12].mxu0 }
0x139e   : > { %v2710_v62 = vmul.f32 0.17677669, %v2704_v61  ;;  %v4406_v63 = vpop.f32.mrb[13].mxu0  ;;  %v4894_v61 = vld [vmem:[#allocation27] sm:$0xff]  }
0x139f   : > { %v2707_v0 = vpop.f32.mrb[14].mxu0  ;;  %4439 = vmatpush3.bf16.msra.mxu0 %v4894_v61  ;;  %v4935_v61 = vld [vmem:[#allocation38 + $0x20] sm:$0xff]  }
0x13a0   : > { %v4407_v1 = vpop.f32.mrb[15].mxu0  ;;  %v2711_v2 = vsel %vm1896_vm3, %v2710_v62, -inf  ;;  %4440 = vmatprep.subr.bf16.mxu0 %v5986_v8 }
0x13a1   : > { %2712 = vmax.xlane.f32.xlu0 %v2711_v2  ;;  %v4896_v2 = vld [vmem:[#allocation27 + $0x10] sm:$0xff]  }
0x13a9   : > { %v2814_v3 = vpop.f32.mrb[16].mxu0 }
0x13aa   : > { %v2820_v4 = vmul.f32 0.17677669, %v2814_v3  ;;  %v4418_v5 = vpop.f32.mrb[17].mxu0 }
0x13ab   : > { %v2817_v6 = vpop.f32.mrb[18].mxu0 }
0x13ac   : > { %v4419_v7 = vpop.f32.mrb[19].mxu0  ;;  %v2821_v9 = vsel %vm1896_vm3, %v2820_v4, -inf }
0x13ad   : > { %2822 = vmax.xlane.f32.xlu1 %v2821_v9  ;;  %v4898_v9 = vld [vmem:[#allocation27 + $0x20] sm:$0xff]  }
0x13b1   : > { %v2923_v10 = vpop.f32.mrb[20].mxu0 }
0x13b2   : > { %v2929_v11 = vmul.f32 0.17677669, %v2923_v10  ;;  %v4430_v13 = vpop.f32.mrb[21].mxu0 }
0x13b3   : > { %v2926_v14 = vpop.f32.mrb[22].mxu0  ;;  %v4900_v13 = vld [vmem:[#allocation27 + $0x30] sm:$0xff]  }
0x13b4   : > { %v4431_v46 = vpop.f32.mrb[23].mxu0  ;;  %v2930_v15 = vsel %vm1896_vm3, %v2929_v11, -inf  ;;  %v4901_v14 = vld [vmem:[#allocation27 + $0x38] sm:$0xff]  }
0x13b5   : > { %2931 = vmax.xlane.f32.xlu1 %v2930_v15 }
0x13bb   : > { %v2605_v16 = vpop.xlane.xlu1 %2604 }
0x13bc   : > { %v2606_v17 = vsub.f32 %v2602_v56, %v2605_v16 }
0x13be   : > { %v2607_v19 = vmul.f32 1.442695, %v2606_v17 }
0x13c0   : > { %4960 = vpow2.f32 %v2607_v19 }
0x13ca   : > { %v4961_v20 = vpop.eup %4960 }
0x13cb   : > { %v2609_v21 = vsel %vm1896_vm3, %v4961_v20, 0.0 }
0x13cc   : > { %2610 = vadd.xlane.f32.xlu1 %v2609_v21 }
0x142e   : > { %v2713_v18 = vpop.xlane.xlu0 %2712 }
0x142f   : > { %v2714_v23 = vsub.f32 %v2710_v62, %v2713_v18  ;;  %v4895_v62 = vld [vmem:[#allocation27 + $0x8] sm:$0xff]  }
0x1430   : > { %4441 = vmatpush3.bf16.msra.mxu0 %v4895_v62  ;;  %v4936_v62 = vld [vmem:[#allocation38 + $0x68] sm:$0xff]  }
0x1431   : > { %v2715_v24 = vmul.f32 1.442695, %v2714_v23  ;;  %4442 = vmatprep.subr.bf16.mxu0 %v5986_v8 }
0x1433   : > { %4962 = vpow2.f32 %v2715_v24 }
0x1434   : > { %4443 = vmatpush3.bf16.msra.mxu0 %v4896_v2 }
0x1435   : > { %4444 = vmatprep.subr.bf16.mxu0 %v5986_v8 }
0x143a   : > { %v2823_v26 = vpop.xlane.xlu1 %2822 }
0x143b   : > { %v2824_v27 = vsub.f32 %v2820_v4, %v2823_v26  ;;  %v4897_v4 = vld [vmem:[#allocation27 + $0x18] sm:$0xff]  }
0x143c   : > { %4445 = vmatpush3.bf16.msra.mxu0 %v4897_v4  ;;  %v4032_v4 = vld [vmem:[#allocation44] ss:$0 sm:$0xff] }
0x143d   : > { %v4963_v28 = vpop.eup %4962  ;;  %v2825_v29 = vmul.f32 1.442695, %v2824_v27  ;;  %4446 = vmatprep.subr.bf16.mxu0 %v5986_v8 }
0x143e   : > { %v2717_v30 = vsel %vm1896_vm3, %v4963_v28, 0.0 }
0x143f   : > { %4964 = vpow2.f32 %v2825_v29  ;;  %2718 = vadd.xlane.f32.xlu1 %v2717_v30 }
0x1440   : > { %4447 = vmatpush3.bf16.msra.mxu0 %v4898_v9 }
0x1441   : > { %4448 = vmatprep.subr.bf16.mxu0 %v5986_v8 }
0x1442   : > { %v2932_v31 = vpop.xlane.xlu1 %2931 }
0x1443   : > { %v2933_v33 = vsub.f32 %v2929_v11, %v2932_v31  ;;  %v4899_v11 = vld [vmem:[#allocation27 + $0x28] sm:$0xff]  }
0x1444   : > { %4449 = vmatpush3.bf16.msra.mxu0 %v4899_v11  ;;  %v4904_v31 = vld [vmem:[#allocation35 + $0x4] ss:$8 sps:$4 sm:$0xff]  }
0x1445   : > { %v2934_v34 = vmul.f32 1.442695, %v2933_v33  ;;  %4450 = vmatprep.subr.bf16.mxu0 %v5986_v8  ;;  %v4905_v33 = vld [vmem:[#allocation35 + $0x10] ss:$8 sps:$4 sm:$0xff]  }
0x1448   : > { %4451 = vmatpush3.bf16.msra.mxu0 %v4900_v13  ;;  %v4938_v13 = vld [vmem:[#allocation38 + $0x70] sm:$0xff]  }
0x1449   : > { %v4965_v12 = vpop.eup %4964  ;;  %4452 = vmatprep.subr.bf16.mxu0 %v5986_v8 }
0x144a   : > { %v2827_v25 = vsel %vm1896_vm3, %v4965_v12, 0.0 }
0x144b   : > { %2828 = vadd.xlane.f32.xlu0 %v2827_v25  ;;  %v4902_v25 = vld [vmem:[#allocation35] ss:$8 sps:$4 sm:$0xff]  }
0x144c   : > { %4453 = vmatpush3.bf16.msra.mxu0 %v4901_v14  ;;  %v4939_v14 = vld [vmem:[#allocation38 + $0x30] sm:$0xff]  }
0x1450   : > { %2833 = vrot.lane.b32.xlu1 %v2555_v22, %s5989_s17 }
0x1459   : > { %v2611_v32 = vpop.xlane.xlu1 %2610 }
0x145a   : > { %4966 = vrcp.f32 %v2611_v32  ;;  %v4907_v32 = vld [vmem:[#allocation35 + $0x14] ss:$8 sps:$4 sm:$0xff]  }
0x145b   : > { %4968 = vpow2.f32 %v2934_v34 }
0x1461   : > { %2724 = vrot.lane.b32.xlu0 %v2555_v22, %s5988_s11 }
0x1464   : > { %v4967_v35 = vpop.eup %4966 }
0x1465   : > { %v2613_v37 = vmul.f32 %v4967_v35, %v4961_v20  ;;  %v4969_v40 = vpop.eup %4968 }
0x1466   : > { %v2936_v41 = vsel %vm1896_vm3, %v4969_v40, 0.0 }
0x1467   : > { %v2614_v39 = vpack.c.bf16 %v2613_v37, %v2613_v37 }
0x1469   : > { %4399 = vmatmul.mubr.msk.bf16.vlgmr.msra.gmra.mrb[36].mxu1 %vm1896_vm3, %v2614_v39 }
0x146a   : > { %4410 = vmatprep.mubr.msk.bf16.mxu1 %vm5987_vm1, %v5986_v8 }
0x1474   : > { %2937 = vadd.xlane.f32.xlu1 %v2936_v41  ;;  %v4908_v41 = vld [vmem:[#allocation35 + $0x20] ss:$8 sps:$4 sm:$0xff]  }
0x1485   : > { %2942 = vrot.lane.b32.xlu1 %v2555_v22, %s5990_s13 }
0x14cc   : > { %v2719_v42 = vpop.xlane.xlu1 %2718 }
0x14cd   : > { %4970 = vrcp.f32 %v2719_v42  ;;  %v4913_v42 = vld [vmem:[#allocation35 + $0x34] ss:$8 sps:$4 sm:$0xff]  }
0x14d0   : > { %v2834_v49 = vpop.permute.xlu1 %2833 }
0x14d7   : > { %v4971_v43 = vpop.eup %4970 }
0x14d8   : > { %v2829_v44 = vpop.xlane.xlu0 %2828  ;;  %v2721_v45 = vmul.f32 %v4971_v43, %v4963_v28  ;;  %v4916_v43 = vld [vmem:[#allocation35 + $0x44] ss:$8 sps:$4 sm:$0xff]  }
0x14d9   : > { %4972 = vrcp.f32 %v2829_v44  ;;  %v4914_v44 = vld [vmem:[#allocation35 + $0x40] ss:$8 sps:$4 sm:$0xff]  }
0x14da   : > { %v2722_v48 = vpack.c.bf16 %v2721_v45, %v2721_v45  ;;  %v4919_v45 = vld [vmem:[#allocation35 + $0x54] ss:$8 sps:$4 sm:$0xff]  }
0x14dc   : > { %v2725_v47 = vpop.permute.xlu0 %2724 }
0x14dd   : > { %4409 = vmatpush3.bf16.msra.mxu1 %v2725_v47  ;;  %v4917_v47 = vld [vmem:[#allocation35 + $0x50] ss:$8 sps:$4 sm:$0xff]  }
0x14de   : > { %4420 = vmatprep.subr.bf16.mxu1 %v5986_v8 }
0x14e0   : > { %4411 = vmatmul.mubr.msk.bf16.vlgmr.msra.gmra.mrb[40].mxu1 %vm1896_vm3, %v2722_v48  ;;  %v4920_v48 = vld [vmem:[#allocation35 + $0x60] ss:$8 sps:$4 sm:$0xff]  }
0x14e1   : > { %4421 = vmatpush3.bf16.msra.mxu1 %v2834_v49  ;;  %4422 = vmatprep.mubr.msk.bf16.mxu1 %vm5987_vm1, %v5986_v8  ;;  %v4922_v49 = vld [vmem:[#allocation35 + $0x64] ss:$8 sps:$4 sm:$0xff]  }
0x14e2   : > { %4432 = vmatprep.subr.bf16.mxu1 %v5986_v8 }
0x14e3   : > { %v4973_v38 = vpop.eup %4972 }
0x14e4   : > { %v2831_v50 = vmul.f32 %v4973_v38, %v4965_v12  ;;  %v4925_v38 = vld [vmem:[#allocation35 + $0x74] ss:$8 sps:$4 sm:$0xff]  }
0x14e6   : > { %v2832_v51 = vpack.c.bf16 %v2831_v50, %v2831_v50  ;;  %v5991_v50 = vmov 0  }
0x14e8   : > { %4423 = vmatmul.mubr.msk.bf16.vlgmr.msra.gmra.mrb[44].mxu1 %vm1896_vm3, %v2832_v51  ;;  %v4923_v51 = vld [vmem:[#allocation35 + $0x70] ss:$8 sps:$4 sm:$0xff]  }
0x14e9   : > { %4434 = vmatprep.mubr.msk.bf16.mxu1 %vm5987_vm1, %v5986_v8  ;;  %v4023_v8 = vld [vmem:[#allocation33] ss:$0 sm:$0xff] }
0x1501   : > { %v2938_v52 = vpop.xlane.xlu1 %2937 }
0x1502   : > { %4974 = vrcp.f32 %v2938_v52  ;;  %v4926_v52 = vld [vmem:[#allocation38 + $0x40] sm:$0xff]  }
0x1503   : > { %4180 = vmatprep.subr.bf16.mxu0 %v4926_v52 }
0x1505   : > { %v2943_v53 = vpop.permute.xlu1 %2942 }
0x1506   : > { %4433 = vmatpush3.bf16.msra.mxu1 %v2943_v53  ;;  %v4927_v53 = vld [vmem:[#allocation38] sm:$0xff]  }
0x1507   : > { %3253 = vmatprep.subr.bf16.mxu1 %v4904_v31 }
0x150c   : > { %v4975_v54 = vpop.eup %4974 }
0x150d   : > { %v2940_v55 = vmul.f32 %v4975_v54, %v4969_v40  ;;  %v4910_v40 = vld [vmem:[#allocation35 + $0x24] ss:$8 sps:$4 sm:$0xff]  }
0x150e   : > { %v4928_v54 = vld [vmem:[#allocation38 + $0x48] sm:$0xff]  }
0x150f   : > { %v2941_v56 = vpack.c.bf16 %v2940_v55, %v2940_v55  ;;  %v4929_v55 = vld [vmem:[#allocation38 + $0x8] sm:$0xff]  }
0x1511   : > { %4435 = vmatmul.mubr.msk.bf16.vlgmr.msra.gmra.mrb[48].mxu1 %vm1896_vm3, %v2941_v56  ;;  %v4930_v56 = vld [vmem:[#allocation38 + $0x50] sm:$0xff]  }
0x1512   : > { %3254 = vmatpush1.bf16.msra.mxu1 %v4902_v25  ;;  %3285 = vmatprep.mubr.bf16.mxu1 %v5991_v50  ;;  %v4068_v50 = vld [vmem:[#allocation48] ss:$0 sm:$0xff] }
0x1513   : > { %3255 = vmatprep.subr.bf16.mxu1 %v4907_v32  ;;  %v4050_v32 = vld [vmem:[#allocation39] ss:$0 sm:$0xff] }
0x1516   : > { %3256 = vmatpush1.bf16.msra.mxu1 %v4905_v33 }
0x1517   : > { %3257 = vmatprep.subr.bf16.mxu1 %v4910_v40 }
0x151a   : > { %3258 = vmatpush1.bf16.msra.mxu1 %v4908_v41 }
0x151b   : > { %3259 = vmatprep.subr.bf16.mxu1 %v4913_v42 }
0x153c   : > { %v2652_v57 = vpop.f32.mrb[36].mxu1 }
0x153d   : > { %v4400_v58 = vpop.f32.mrb[37].mxu1 }
0x153e   : > { %v2655_v59 = vpop.f32.mrb[38].mxu1  ;;  %v4932_v58 = vld [vmem:[#allocation38 + $0x58] sm:$0xff]  }
0x153f   : > { %v4401_v60 = vpop.f32.mrb[39].mxu1  ;;  %v4933_v59 = vld [vmem:[#allocation38 + $0x18] sm:$0xff]  }
0x1540   : > { %v4934_v60 = vld [vmem:[#allocation38 + $0x60] sm:$0xff]  }
0x15b3   : > { %v2764_v63 = vpop.f32.mrb[40].mxu1 }
0x15b4   : > { %2989 = vrot.lane.b32.xlu0 %v2764_v63, %s5990_s13  ;;  %v4412_v0 = vpop.f32.mrb[41].mxu1  ;;  %v4937_v63 = vld [vmem:[#allocation38 + $0x28] sm:$0xff]  }
0x15b5   : > { %v2767_v1 = vpop.f32.mrb[42].mxu1 }
0x15b6   : > { %v4413_v3 = vpop.f32.mrb[43].mxu1 }
0x15bb   : > { %v2873_v5 = vpop.f32.mrb[44].mxu1 }
0x15bc   : > { %2993 = vrot.lane.b32.xlu1 %v2873_v5, %s5989_s17  ;;  %v4424_v6 = vpop.f32.mrb[45].mxu1 }
0x15bd   : > { %v2876_v7 = vpop.f32.mrb[46].mxu1  ;;  %v4033_v6 = vld [vmem:[#allocation45] ss:$0 sm:$0xff] }
0x15be   : > { %v4425_v10 = vpop.f32.mrb[47].mxu1 }
0x15e4   : > { %v2982_v46 = vpop.f32.mrb[48].mxu1 }
0x15e5   : > { %2997 = vrot.lane.b32.xlu0 %v2982_v46, %s5988_s11  ;;  %v4436_v15 = vpop.f32.mrb[49].mxu1  ;;  %v4940_v46 = vld [vmem:[#allocation38 + $0x78] sm:$0xff]   ;;  %s5774_s11 = scalar_lea.vmem %s5773_s10, 256 }
0x15e6   : > { %v2985_v16 = vpop.f32.mrb[50].mxu1  ;;  %v4941_v15 = vld [vmem:[#allocation38 + $0x38] sm:$0xff]   ;;  %p5776_p0 = scmp.lt.s32.totalorder %s5774_s11, %s5768_s21 }
0x15e7   : > { %v4437_v17 = vpop.f32.mrb[51].mxu1  ;;  %v3163_v16 = vlaneseq }
0x15e8   : > { %p5777_p8 = por %p5776_p0, %p5775_p6 }
0x15e9   : > { %v3164_v17 = vshrl.u32 %v3163_v16, 7 }
0x15ea   : > { %p5778_p9 = pnand %p5777_p8, %p5771_p4 }
0x1626   : > { %v2990_v19 = vpop.permute.xlu0 %2989 }
0x1627   : > { %v3000_v21 = vsel %vm1848_vm2, %v2652_v57, %v2990_v19  ;;  %v4931_v57 = vld [vmem:[#allocation38 + $0x10] sm:$0xff]   ;;  %v3165_v19 = vsub.s32 0, %v3164_v17 }
0x162e   : > { %v2994_v20 = vpop.permute.xlu1 %2993 }
0x162f   : > { %v3001_v22 = vsel %vm2295_vm4, %v3000_v21, %v2994_v20  ;;  %v3161_v20 = vld [vmem:[#allocation36] sm:$0x3]  ;;  %v3169_v21 = vsub.s32 1, %v3164_v17 }
0x1657   : > { %v2998_v18 = vpop.permute.xlu0 %2997 }
0x1658   : > { %v3002_v23 = vsel %vm2297_vm5, %v3001_v22, %v2998_v18  ;;  %v3166_v22 = vrot.slane %v3161_v20, %v3165_v19  ;;  %v3170_v18 = vrot.slane %v3161_v20, %v3169_v21 }
0x1659   : > { %v3003_v24 = vpack.c.bf16 %v3002_v23, %v3002_v23 }
0x165b   : > { %4455 = vmatmul.mubr.bf16.vlgmr.msra.gmra.mrb[24].mxu0 %v3003_v24 }
0x165c   : > { %4181 = vmatpush3.bf16.msra.mxu0 %v4927_v53 }
0x165d   : > { %4182 = vmatprep.subr.bf16.mxu0 %v4928_v54 }
0x1660   : > { %4183 = vmatpush3.bf16.msra.mxu0 %v4929_v55 }
0x1661   : > { %4184 = vmatprep.subr.bf16.mxu0 %v4930_v56 }
0x1664   : > { %4185 = vmatpush3.bf16.msra.mxu0 %v4931_v57 }
0x1665   : > { %4186 = vmatprep.subr.bf16.mxu0 %v4932_v58 }
0x1668   : > { %4187 = vmatpush3.bf16.msra.mxu0 %v4933_v59 }
0x1669   : > { %4188 = vmatprep.subr.bf16.mxu0 %v4934_v60 }
0x166c   : > { %4189 = vmatpush3.bf16.msra.mxu0 %v4935_v61 }
0x166d   : > { %4190 = vmatprep.subr.bf16.mxu0 %v4936_v62 }
0x1670   : > { %4191 = vmatpush3.bf16.msra.mxu0 %v4937_v63 }
0x1671   : > { %4192 = vmatprep.subr.bf16.mxu0 %v4938_v13 }
0x1674   : > { %4193 = vmatpush3.bf16.msra.mxu0 %v4939_v14 }
0x1675   : > { %4194 = vmatprep.subr.bf16.mxu0 %v4940_v46 }
0x1678   : > { %4195 = vmatpush3.bf16.msra.mxu0 %v4941_v15 }
0x172e   : > { %v3109_v26 = vpop.f32.mrb[24].mxu0 }
0x172f   : > { %v3110_v27 = vadd.f32 %v4023_v8, %v3109_v26  ;;  %v4456_v28 = vpop.f32.mrb[25].mxu0 }
0x1730   : > { %v3112_v29 = vpop.f32.mrb[26].mxu0 }
0x1731   : > { %v4457_v30 = vpop.f32.mrb[27].mxu0  ;;  %v3117_v12 = vadd.f32 %v3110_v27, %v7120_v36  ;;  %v4911_v36 = vld [vmem:[#allocation35 + $0x30] ss:$8 sps:$4 sm:$0xff]  }
0x1732   : > { %3260 = vmatpush1.bf16.msra.mxu1 %v4911_v36 }
0x1733   : > { %3118 = vadd.xlane.f32.xlu1 %v3117_v12  ;;  %3261 = vmatprep.subr.bf16.mxu1 %v4916_v43 }
0x1736   : > { %3262 = vmatpush1.bf16.msra.mxu1 %v4914_v44 }
0x1737   : > { %3263 = vmatprep.subr.bf16.mxu1 %v4919_v45 }
0x173a   : > { %3264 = vmatpush1.bf16.msra.mxu1 %v4917_v47 }
0x173b   : > { %3265 = vmatprep.subr.bf16.mxu1 %v4922_v49  ;;  %v4067_v49 = vld [vmem:[#allocation47] ss:$0 sm:$0xff] }
0x173e   : > { %3266 = vmatpush1.bf16.msra.mxu1 %v4920_v48 }
0x173f   : > { %3267 = vmatprep.subr.bf16.mxu1 %v4925_v38 }
0x1742   : > { %3268 = vmatpush1.bf16.msra.mxu1 %v4923_v51 }
0x17c0   : > { %v3119_v34 = vpop.xlane.xlu1 %3118 }
0x17c1   : > { %v3120_v35 = vmul.f32 0.0078125, %v3119_v34 }
0x17c3   : > { %v3121_v37 = vsub.f32 %v3117_v12, %v3120_v35 }
0x17c5   : > { %v3122_v39 = vmul.f32 %v3121_v37, %v3121_v37 }
0x17c7   : > { %3123 = vadd.xlane.f32.xlu0 %v3122_v39 }
0x1854   : > { %v3124_v0 = vpop.xlane.xlu0 %3123 }
0x1855   : > { %v3125_v1 = vmul.f32 0.0078125, %v3124_v0 }
0x1857   : > { %v3126_v2 = vadd.f32 1e-05, %v3125_v1 }
0x1859   : > { %4976 = vrsqrt.f32 %v3126_v2 }
0x1863   : > { %v4977_v3 = vpop.eup %4976 }
0x1864   : > { %v3128_v5 = vmul.f32 %v4977_v3, %v3121_v37 }
0x1866   : > { %v3135_v7 = vmul.f32 %v4032_v4, %v3128_v5 }
0x1868   : > { %v3142_v9 = vadd.f32 %v4033_v6, %v3135_v7 }
0x186a   : > { %v3143_v10 = vmax.f32 %v3142_v9, 0.0 }
0x186c   : > { %v3144_v11 = vpack.c.bf16 %v3143_v10, %v3143_v10 }
0x186e   : > { %3286 = vmatmul.mubr.bf16.vlgmr.msra.gmra.mrb[52].mxu1 %v3144_v11 }
0x1941   : > { %v3287_v23 = vpop.f32.mrb[52].mxu1 }
0x1942   : > { %v3288_v24 = vadd.f32 %v3287_v23, %v3166_v22  ;;  %v3289_v8 = vpop.f32.mrb[53].mxu1 }
0x1943   : > { %v3290_v26 = vadd.f32 %v3289_v8, %v3170_v18  ;;  %v3291_v27 = vpop.f32.mrb[54].mxu1 }
0x1944   : > { %v3294_v28 = vmax.f32 %v3288_v24, 0.0  ;;  %v3292_v29 = vpop.f32.mrb[55].mxu1 }
0x1945   : > { %v3295_v30 = vmax.f32 %v3290_v26, 0.0 }
0x1946   : > { %v3296_v25 = vpack.c.bf16 %v3294_v28, %v3294_v28 }
0x1947   : > { %v3297_v12 = vpack.c.bf16 %v3295_v30, %v3295_v30 }
0x1949   : > { %3465 = vmatprep.mubr.bf16.mxu0 %v3297_v12 }
0x194a   : > { %3466 = vmatmul.mubr.bf16.vlgmr.msra.gmra.mrb[28].mxu0 %v3296_v25 }
0x1a1d   : > { %v4196_v31 = vpop.f32.mrb[28].mxu0 }
0x1a1e   : > { %v4197_v33 = vpop.f32.mrb[29].mxu0 }
0x1a1f   : > { %v4198_v34 = vadd.f32 %v4197_v33, %v4196_v31  ;;  %v4199_v35 = vpop.f32.mrb[30].mxu0 }
0x1a20   : > { %v4200_v37 = vpop.f32.mrb[31].mxu0 }
0x1a21   : > { %v3468_v39 = vadd.f32 %v4198_v34, %v4050_v32 }
0x1a23   : > { %v3475_v40 = vadd.f32 %v3468_v39, %v3143_v10 }
0x1a25   : > { %3476 = vadd.xlane.f32.xlu0 %v3475_v40 }
0x1ab2   : > { %v3477_v41 = vpop.xlane.xlu0 %3476 }
0x1ab3   : > { %v3478_v42 = vmul.f32 0.0078125, %v3477_v41 }
0x1ab5   : > { %v3479_v36 = vsub.f32 %v3475_v40, %v3478_v42 }
0x1ab7   : > { %v3480_v43 = vmul.f32 %v3479_v36, %v3479_v36 }
0x1ab9   : > { %3481 = vadd.xlane.f32.xlu1 %v3480_v43 }
0x1b46   : > { %v3482_v44 = vpop.xlane.xlu1 %3481 }
0x1b47   : > { %v3483_v45 = vmul.f32 0.0078125, %v3482_v44 }
0x1b49   : > { %v3484_v47 = vadd.f32 1e-05, %v3483_v45 }
0x1b4b   : > { %4978 = vrsqrt.f32 %v3484_v47 }
0x1b55   : > { %v4979_v48 = vpop.eup %4978 }
0x1b56   : > { %v3486_v38 = vmul.f32 %v4979_v48, %v3479_v36 }
0x1b58   : > { %v3493_v51 = vmul.f32 %v4067_v49, %v3486_v38 }
0x1b5a   : > { %v3500_v52 = vadd.f32 %v4068_v50, %v3493_v51 }
0x1b5c   : > { %v3501_v53 = vmax.f32 %v3500_v52, 0.0 }
0x1b5e   : > { %3502 = vst [vmem:[%s1262_s12] sm:$0xff] %v3501_v53 }
0x1b5f   : > { %5781 = shalt.err (!%p5778_p9)
}
0x1b60   : > { %s5782_s8 = scalar_lea.hbm %s7193_s1, 128  ;;  %s5786_s17 = scalar_lea.hbm %s7487_s20, 512 }
0x1b61   : > { %p5783_p3 = scmp.ne.s32.totalorder %s7193_s1, %s5782_s8  ;;  %p5787_p1 = scmp.lt.u32.totalorder %s7193_s1, %s7487_s20 }
0x1b62   : > { %p5788_p13 = scmp.lt.u32.totalorder %s5786_s17, %s5782_s8  ;;  %p5790_p2 = scmp.lt.u32.totalorder %s5782_s8, %s7193_s1 }
0x1b63   : > { %p5784_p10 = pnand %p5783_p3, %p7488_p5 }
0x1b64   : > { %p5789_p11 = por %p5788_p13, %p5787_p1 }
0x1b65   : > { %p5785_p7 = pneg %p5784_p10 }
0x1b66   : > { %p5791_p12 = por %p5790_p2, %p5789_p11 }
0x1b68   : > { %p5792_p4 = pnand %p5791_p12, %p5785_p7 }
0x1b6a   : > { %5795 = shalt.err (!%p5792_p4)
}
0x1b6b   : > { %4566 = dma.vmem_to_hbm [thread:$0]  (%p7488_p5), %s7195_s0, 128, %s7193_s1, %s3504_s9  }
0x1b6c PF: > { %s7489_s23 = sld [smem:[#allocation78_spill]]  ;;  %s7490_s30 = sld [smem:[#allocation68_spill]] }
0x1b6d   : > { %p7491_p0 = scmp.ne.s32.totalorder %s7444_s16, 0 }
0x1b72   : > { %p4711_p6 = scmp.ge.s32.totalorder %s7489_s23, 2  ;;  %s3531_s3 = sand.u32 1, %s7490_s30  }
0x1b73   : > { %s3532_s15 = scalar_lea.sflag [#allocation8], %s3531_s3 }
0x1b74   : > { %p4655_p8 = pnand %p4711_p6, %p7491_p0 }
0x1b76   : > { %5905 = dma.done.wait (!%p4655_p8), %s3532_s15, 128  }
0x1b77   : > { %5907 = vsyncadd (!%p4655_p8), %s3532_s15, 4294967168  ;;  %s60_s2 = sadd.s32 1, %s7489_s23   ;;  %s7492_s8 = sld [smem:[#allocation69_spill]] }
0x1b78   : > { %p57_p9 = scmp.ge.s32.totalorder %s60_s2, 6   ;;  %s7493_s5 = sld [smem:[#allocation70_spill]] }
0x1b79   : > { %s7494_s30 = sld [smem:[#allocation72_spill]]  ;;  %s7495_s3 = sld [smem:[#allocation73_spill]] }
0x1b7a   : > { %s7496_s10 = sld [smem:[#allocation76_spill]]  ;;  %s7497_s0 = sld [smem:[#allocation77_spill]] }
0x1b7b   : > { %s7498_s9 = smov %s7510_s6  ;;  %s7500_s6 = smov %s6769_s14 }
0x1b7c   : > { %s7501_s11 = smov %s7504_s28  ;;  %s7502_s29 = smov %s7508_s22 }
0x1b7d   :  { %59 = sbr.rel (!%p57_p9) target bundleno = 53 (0x35), region = 299 }
0x1b7f   : > { %7499 = sst [smem:[#allocation68_spill]] %s7495_s3 }
0x1b84   :  { %3537 = vsyncpa [#allocation7], 1 }
0x1b85   :  { %3539 = vsyncpa [#allocation7 + $0x1], 1 }
0x1b86   :  { %3540 = vsyncpa [#allocation10], 1 }
0x1b87   :  { %3542 = vsyncpa [#allocation10 + $0x1], 1 }
0x1b88   :  { %3543 = vsyncpa [#allocation13], 1 }
0x1b89   :  { %3544 = vsyncpa [#allocation16], 1 }
0x1b8a   :  { %3545 = vsyncpa [#allocation19], 1 }
0x1b8b   :  { %3546 = vsyncpa [#allocation22], 1 }
0x1b8c   :  { %3547 = vsyncpa [#allocation25], 1 }
0x1b8d   :  { %3548 = vsyncpa [#allocation28], 1 }
0x1b8e   :  { %3549 = vsyncpa [#allocation31], 1 }
0x1b8f   :  { %3550 = vsyncpa [#allocation34], 1 }
0x1b90   :  { %3551 = vsyncpa [#allocation37], 1 }
0x1b91   :  { %3552 = vsyncpa [#allocation40], 1 }
0x1b92   :  { %3553 = vsyncpa [#allocation43], 1 }
0x1b93   :  { %3554 = vsyncpa [#allocation46], 1 }
0x1b94   :  { %3555 = vsyncpa [#allocation49], 1 }
0x1b95   :  { %3556 = vsyncpa [#allocation8], 1 }
0x1b96   :  { %3558 = vsyncpa [#allocation8 + $0x1], 1 }

</bundles_post_ra>
